<compile_context>
chip_gen: v5e
topology: v5e:2x2
jax: 0.10.0
libtpu: 0.0.40
codegen_flags: <defaults>
</compile_context>

<pallas_src>
import functools

import numpy as np
import jax
import jax.numpy as jnp
from jax import lax
from jax.experimental import pallas as pl
from jax.experimental.pallas import tpu as pltpu


_MM_DTYPE = jnp.bfloat16      # MXU operand dtype (accumulation stays f32)
_USE_TANH_GELU = True         # tanh GELU runs on the EUP; set False for exact erf nn.GELU()


# ----------------------------------------------------------------------------
# generation-aware sizing
# ----------------------------------------------------------------------------
def _query_vmem():
    phys = 64 * 1024 * 1024                      # conservative default (v7x per-core VMEM)
    try:
        info = pltpu.get_tpu_info()
        phys = int(getattr(info, "vmem_capacity_bytes", phys)) or phys
    except Exception:                            # no TPU info at trace time -> keep default
        pass
    return (phys * 3) // 4, phys


_VMEM_BUDGET, _VMEM_PHYS = _query_vmem()
# v5e/v6e (128 MiB physical VMEM) get bigger tiles than v7x (64 MiB, 2 TCs).
_ATTN_ROWS_TARGET = 512 if _VMEM_PHYS >= 100 * (1 << 20) else 256
_MLP_ROWS_TARGET = 1024 if _VMEM_PHYS >= 100 * (1 << 20) else 512
_MIN_GRID_STEPS = 4           # prefer >= 2 steps per core on v7x's 2 TensorCores


# ----------------------------------------------------------------------------
# plain-JAX glue helpers (reshape / permute only)
# ----------------------------------------------------------------------------
def _window_partition(x, ws):
    B, H, W, C = x.shape
    x = x.reshape(B, H // ws, ws, W // ws, ws, C)
    return x.transpose(0, 1, 3, 2, 4, 5).reshape(-1, ws * ws, C)


def _window_reverse(xw, ws, H, W, C):
    B = xw.shape[0] // ((H // ws) * (W // ws))
    x = xw.reshape(B, H // ws, W // ws, ws, ws, C)
    return x.transpose(0, 1, 3, 2, 4, 5).reshape(B, H, W, C)


def _pick_window_batch(nW, B, N, C, num_heads, has_mask):
    """Largest divisor Wb of nW that fits the VMEM budget, keeps Wb*N near the
    generation row target, and leaves >= _MIN_GRID_STEPS grid steps."""
    # resident const blocks, worst-case double-buffered (if Buffered(1) is unavailable)
    resident = 2 * (C * 3 * C * 2 + C * C * 2 + num_heads * N * N * 4 + 8 * C)
    if has_mask:
        resident += 2 * nW * N * N * 4
    avail = max(_VMEM_BUDGET - resident, 1 << 20)
    # per-window bytes: x bf16 (2 bufs) + out f32 (2 bufs) + qkv f32 scratch +
    # head-out f32 scratch + ~3 score-sized f32 temps + ~2 (N, C) f32 temps
    per_w = (2 * N * C * 2) + (2 * N * C * 4) + (N * 3 * C * 4) + (N * C * 4) \
            + (3 * N * N * 4) + (2 * N * C * 4)
    cap_vmem = max(1, avail // per_w)
    cap_rows = max(1, _ATTN_ROWS_TARGET // N)
    min_steps = min(_MIN_GRID_STEPS, max(1, B * nW))
    need_blocks = -(-min_steps // max(1, B))              # ceil
    cap_steps = max(1, nW // max(1, need_blocks))
    cap = min(cap_vmem, cap_rows, cap_steps)
    best = 1
    for wb in range(1, nW + 1):
        if nW % wb == 0 and wb <= cap:
            best = wb
    return best


def _pick_row_tile(R, C, hidden):
    """Largest multiple-of-8 divisor of R within the VMEM budget / row target,
    keeping >= _MIN_GRID_STEPS grid steps when possible."""
    resident = 2 * (2 * C * hidden * 2 + (3 * C + hidden) * 4)
    avail = max(_VMEM_BUDGET - resident, 1 << 20)
    # per-row bytes: shortcut+attn+out f32 blocks (double-buffered) + (hidden,) f32
    # intermediate + a few (C,) f32 temps
    per_row = 2 * 3 * C * 4 + hidden * 4 + 3 * C * 4
    cap_vmem = max(8, avail // per_row)
    min_steps = min(_MIN_GRID_STEPS, max(1, R // 8))
    cap_steps = max(8, R // max(1, min_steps))
    cap = min(_MLP_ROWS_TARGET, cap_vmem, cap_steps, R)
    best = None
    for t in range(8, cap + 1, 8):
        if R % t == 0:
            best = t
    return best if best is not None else R


def _const_spec(shape, single_buffer):
    # Whole-array block with a constant index_map: the block never changes, so
    # single-buffer it when supported (no useless second VMEM copy of weights).
    idx = lambda *_: (0,) * len(shape)
    if single_buffer:
        return pl.BlockSpec(shape, idx, pipeline_mode=pl.Buffered(1))
    return pl.BlockSpec(shape, idx)


def _probe_single_buffer_support():
    """Tiny capability probe for pipeline_mode=pl.Buffered(1).  The main kernels
    then run unguarded, so genuine lowering failures surface loudly."""
    if not hasattr(pl, "Buffered"):
        return False
    try:
        def k(c_ref, x_ref, o_ref):
            o_ref[...] = x_ref[...] + c_ref[...]

        f = pl.pallas_call(
            k,
            out_shape=jax.ShapeDtypeStruct((16, 128), jnp.float32),
            grid=(2,),
            in_specs=[
                pl.BlockSpec((8, 128), lambda i: (0, 0), pipeline_mode=pl.Buffered(1)),
                pl.BlockSpec((8, 128), lambda i: (i, 0)),
            ],
            out_specs=pl.BlockSpec((8, 128), lambda i: (i, 0)),
        )
        jax.block_until_ready(f(jnp.zeros((8, 128), jnp.float32),
                                jnp.zeros((16, 128), jnp.float32)))
        return True
    except Exception:     # probe only; main kernels are not wrapped
        return False


# ----------------------------------------------------------------------------
# in-kernel math helpers
# ----------------------------------------------------------------------------
def _erf(x):
    # Abramowitz & Stegun 7.1.26 polynomial, |err| <= 1.5e-7 (exact-GELU path).
    ax = jnp.abs(x)
    t = 1.0 / (1.0 + 0.3275911 * ax)
    poly = t * (0.254829592 + t * (-0.284496736 + t * (1.421413741
                + t * (-1.453152027 + t * 1.061405429))))
    y = 1.0 - poly * jnp.exp(-(ax * ax))
    return jnp.where(x < 0, -y, y)


def _gelu(x):
    if _USE_TANH_GELU:
        # tanh lowers to the EUP (its own VLIW slot) instead of ~10 VALU ops + exp;
        # deviation vs exact erf GELU is <~1e-3 abs (fine for inference).
        return 0.5 * x * (1.0 + jnp.tanh(0.7978845608028654 *
                                         (x + 0.044715 * x * x * x)))
    return 0.5 * x * (1.0 + _erf(x * 0.7071067811865475))


# ----------------------------------------------------------------------------
# Pallas kernels
# ----------------------------------------------------------------------------
def _window_attn_kernel(x_ref, wqkv_ref, bqkv_ref, wproj_ref, bproj_ref,
                        scale_ref, rpb_ref, *rest, num_heads, head_dim, has_mask):
    # x_ref:     (Wb, N, C) bf16     Wb windows of tokens
    # wqkv_ref:  (C, 3C) bf16        pre-transposed qkv weight
    # bqkv_ref:  (1, 3C) f32         [q_bias, 0, v_bias]
    # wproj_ref: (C, C) bf16         proj^T (single full-K GEMM)
    # bproj_ref: (1, C) f32
    # scale_ref: (nH,) f32 in SMEM   exp(clamp(logit_scale, max=log(100)))
    # rpb_ref:   (nH, N, N) f32      relative position bias (shared across images)
    # mask_ref:  (nW, N, N) f32      resident shift mask (only when has_mask)
    # scratch:   qkv_s (rows, 3C) f32, head_s (rows, C) f32
    if has_mask:
        mask_ref, o_ref, qkv_s, head_s = rest
    else:
        o_ref, qkv_s, head_s = rest

    Wb, N, C = x_ref.shape
    rows = Wb * N

    # One wide QKV GEMM for all Wb windows (bf16 operands, f32 accumulation),
    # staged in VMEM so the head loop reads bounded slices instead of keeping the
    # whole (rows, 3C) value live across heads.
    x2 = x_ref[...].reshape(rows, C)
    qkv_s[...] = jnp.dot(x2, wqkv_ref[...],
                         preferred_element_type=jnp.float32) + bqkv_ref[...]

    if has_mask:
        start = pl.multiple_of(pl.program_id(1) * Wb, Wb)
        mask = mask_ref[pl.ds(start, Wb)]                     # (Wb, N, N), loaded once

    for h in range(num_heads):
        q = qkv_s[:, h * head_dim:(h + 1) * head_dim]
        k = qkv_s[:, C + h * head_dim:C + (h + 1) * head_dim]
        v = qkv_s[:, 2 * C + h * head_dim:2 * C + (h + 1) * head_dim]

        # cosine attention: F.normalize(., dim=-1, eps=1e-12) in f32
        qn = q * lax.rsqrt(jnp.maximum(jnp.sum(q * q, -1, keepdims=True), 1e-24))
        kn = k * lax.rsqrt(jnp.maximum(jnp.sum(k * k, -1, keepdims=True), 1e-24))
        qn = qn * scale_ref[h]          # per-head clamped logit scale (SMEM scalar)

        qn3 = qn.reshape(Wb, N, head_dim).astype(_MM_DTYPE)
        kn3 = kn.reshape(Wb, N, head_dim).astype(_MM_DTYPE)
        v3 = v.reshape(Wb, N, head_dim).astype(_MM_DTYPE)

        attn = jnp.einsum('wnd,wmd->wnm', qn3, kn3,
                          preferred_element_type=jnp.float32)    # (Wb, N, N)
        attn = attn + rpb_ref[h][None]
        if has_mask:
            attn = attn + mask

        # softmax over keys (f32 statistics); divide via EUP approx reciprocal
        attn = attn - jnp.max(attn, axis=-1, keepdims=True)
        e = jnp.exp(attn)
        prob = e * pl.reciprocal(jnp.sum(e, axis=-1, keepdims=True), approx=True)

        out_h = jnp.einsum('wnm,wmd->wnd', prob.astype(_MM_DTYPE), v3,
                           preferred_element_type=jnp.float32)   # (Wb, N, hd)
        head_s[:, h * head_dim:(h + 1) * head_dim] = out_h.reshape(rows, head_dim)

    # single full-K output projection (rows, C) x (C, C) on the MXU
    o = jnp.dot(head_s[...].astype(_MM_DTYPE), wproj_ref[...],
                preferred_element_type=jnp.float32) + bproj_ref[...]
    o_ref[...] = o.reshape(Wb, N, C).astype(o_ref.dtype)


def _mlp_fused_kernel(short_ref, attn_ref, gamma_ref, beta_ref, w1_ref, b1_ref,
                      w2_ref, b2_ref, o_ref):
    # x1 = shortcut + LayerNorm(attn_out);  out = x1 + GELU(x1@W1^T+b1)@W2^T + b2
    a = attn_ref[...]                                            # (Rt, C) f32
    mu = jnp.mean(a, axis=-1, keepdims=True)
    var = jnp.mean(jnp.square(a - mu), axis=-1, keepdims=True)
    ln = (a - mu) * lax.rsqrt(var + 1e-5) * gamma_ref[...] + beta_ref[...]
    x1 = short_ref[...] + ln

    h = jnp.dot(x1.astype(_MM_DTYPE), w1_ref[...],
                preferred_element_type=jnp.float32) + b1_ref[...]
    g = _gelu(h)                                   # hidden activation never hits HBM
    y = jnp.dot(g.astype(_MM_DTYPE), w2_ref[...],
                preferred_element_type=jnp.float32) + b2_ref[...]
    o_ref[...] = (x1 + y).astype(o_ref.dtype)


# ----------------------------------------------------------------------------
# pallas_call wrappers
# ----------------------------------------------------------------------------
def window_attention(xw, p, num_heads, single_buffer):
    """xw: (B, nW, N, C) bf16 window tokens -> attention output (B, nW, N, C) f32."""
    B, nW, N, C = xw.shape
    head_dim = C // num_heads
    has_mask = 'mask' in p
    Wb = _pick_window_batch(nW, B, N, C, num_heads, has_mask)
    n_blk = nW // Wb
    rows = Wb * N

    kernel = functools.partial(_window_attn_kernel, num_heads=num_heads,
                               head_dim=head_dim, has_mask=has_mask)

    in_specs = [
        pl.BlockSpec((None, Wb, N, C), lambda b, i: (b, i, 0, 0)),
        _const_spec((C, 3 * C), single_buffer),                 # wqkv^T (bf16)
        _const_spec((1, 3 * C), single_buffer),                 # qkv bias (f32)
        _const_spec((C, C), single_buffer),                     # proj^T (bf16)
        _const_spec((1, C), single_buffer),                     # proj bias
        pl.BlockSpec(memory_space=pltpu.MemorySpace.SMEM),      # logit scale (nH,)
        _const_spec((num_heads, N, N), single_buffer),          # rel. pos. bias
    ]
    args = [xw, p['wqkv_t'], p['bqkv'], p['wproj_t'], p['bproj'],
            p['scale'], p['rpb']]
    if has_mask:
        in_specs.append(_const_spec((nW, N, N), single_buffer))  # resident mask
        args.append(p['mask'])

    return pl.pallas_call(
        kernel,
        out_shape=jax.ShapeDtypeStruct((B, nW, N, C), jnp.float32),
        grid=(B, n_blk),
        in_specs=in_specs,
        out_specs=pl.BlockSpec((None, Wb, N, C), lambda b, i: (b, i, 0, 0)),
        scratch_shapes=[pltpu.VMEM((rows, 3 * C), jnp.float32),   # staged QKV
                        pltpu.VMEM((rows, C), jnp.float32)],      # concat head outs
        compiler_params=pltpu.CompilerParams(
            dimension_semantics=("parallel", "parallel"),
            vmem_limit_bytes=_VMEM_BUDGET),
    )(*args)


def fused_norm_mlp(shortcut2, attn2, p, single_buffer):
    """shortcut2/attn2: (B*L, C) f32 -> block output (B*L, C) f32."""
    R, C = shortcut2.shape
    hidden = p['w1_t'].shape[1]
    Rt = _pick_row_tile(R, C, hidden)
    return pl.pallas_call(
        _mlp_fused_kernel,
        out_shape=jax.ShapeDtypeStruct((R, C), jnp.float32),
        grid=(R // Rt,),
        in_specs=[
            pl.BlockSpec((Rt, C), lambda i: (i, 0)),
            pl.BlockSpec((Rt, C), lambda i: (i, 0)),
            _const_spec((1, C), single_buffer),          # LN gamma
            _const_spec((1, C), single_buffer),          # LN beta
            _const_spec((C, hidden), single_buffer),     # fc1 weight (bf16)
            _const_spec((1, hidden), single_buffer),     # fc1 bias
            _const_spec((hidden, C), single_buffer),     # fc2 weight (bf16)
            _const_spec((1, C), single_buffer),          # fc2 bias
        ],
        out_specs=pl.BlockSpec((Rt, C), lambda i: (i, 0)),
        compiler_params=pltpu.CompilerParams(
            dimension_semantics=("parallel",),
            vmem_limit_bytes=_VMEM_BUDGET),
    )(shortcut2, attn2, p['g1'], p['be1'], p['w1_t'], p['b1'], p['w2_t'], p['b2'])


# ----------------------------------------------------------------------------
# parameter / buffer construction (deterministic, synthetic)
# ----------------------------------------------------------------------------
def _relative_position_bias(ws, num_heads, cpb_w1, cpb_b1, cpb_w2):
    rel = np.arange(-(ws - 1), ws, dtype=np.float32)
    t = np.stack(np.meshgrid(rel, rel, indexing="ij"), axis=0)       # (2,2ws-1,2ws-1)
    t = t.transpose(1, 2, 0)[None]                                   # (1,2ws-1,2ws-1,2)
    t = t / float(ws - 1)
    t = t * 8.0
    t = np.sign(t) * np.log2(1.0 + np.abs(t)) / np.log2(8.0)
    table = jnp.asarray(t, jnp.float32)

    h = jax.nn.relu(table @ cpb_w1.T + cpb_b1)
    bias_table = (h @ cpb_w2.T).reshape(-1, num_heads)               # ((2ws-1)^2, nH)

    coords = np.stack(np.meshgrid(np.arange(ws), np.arange(ws), indexing="ij"))
    cf = coords.reshape(2, -1)
    rc = (cf[:, :, None] - cf[:, None, :]).transpose(1, 2, 0)
    rc[:, :, 0] += ws - 1
    rc[:, :, 1] += ws - 1
    rc[:, :, 0] *= 2 * ws - 1
    rel_idx = rc.sum(-1)                                             # (N, N)

    N = ws * ws
    rpb = bias_table[rel_idx.reshape(-1)].reshape(N, N, num_heads)
    return jnp.transpose(rpb, (2, 0, 1))                             # (nH, N, N)


def _shift_attn_mask(H, W, ws, shift):
    img = np.zeros((1, H, W, 1), np.float32)
    cnt = 0
    for hs in (slice(0, -ws), slice(-ws, -shift), slice(-shift, None)):
        for wsl in (slice(0, -ws), slice(-ws, -shift), slice(-shift, None)):
            img[:, hs, wsl, :] = cnt
            cnt += 1
    mw = img.reshape(1, H // ws, ws, W // ws, ws, 1)
    mw = mw.transpose(0, 1, 3, 2, 4, 5).reshape(-1, ws * ws)
    am = mw[:, None, :] - mw[:, :, None]
    am = np.where(am != 0, -100.0, 0.0).astype(np.float32)
    return jnp.asarray(am)                                           # (nW, N, N)


def init_block_params(key, dim, num_heads, hidden, ws, H, W, shift):
    ks = jax.random.split(key, 12)

    def w(k, shape):
        return jax.random.normal(k, shape, jnp.float32) * 0.02

    wqkv = w(ks[0], (3 * dim, dim))              # torch Linear layout (out, in)
    q_bias = w(ks[1], (dim,))
    v_bias = w(ks[2], (dim,))
    qkv_bias = jnp.concatenate([q_bias, jnp.zeros((dim,), jnp.float32), v_bias])

    logit_scale = jnp.log(10.0 * jnp.ones((num_heads,), jnp.float32))
    scale = jnp.exp(jnp.minimum(logit_scale, jnp.log(1.0 / 0.01)))

    cpb_w1 = w(ks[3], (512, 2))
    cpb_b1 = w(ks[4], (512,))
    cpb_w2 = w(ks[5], (num_heads, 512))

    wproj = w(ks[6], (dim, dim))
    bproj = w(ks[7], (dim,))

    g1 = jnp.ones((dim,), jnp.float32)           # LayerNorm defaults (w=1, b=0)
    be1 = jnp.zeros((dim,), jnp.float32)

    w1 = w(ks[8], (hidden, dim))
    b1 = w(ks[9], (hidden,))
    w2 = w(ks[10], (dim, hidden))
    b2 = w(ks[11], (dim,))

    rpb = _relative_position_bias(ws, num_heads, cpb_w1, cpb_b1, cpb_w2)

    p = dict(
        wqkv_t=wqkv.T.astype(_MM_DTYPE),                              # (C, 3C)
        bqkv=qkv_bias[None, :],                                       # (1, 3C) f32
        wproj_t=wproj.T.astype(_MM_DTYPE),                            # (C, C)
        bproj=bproj[None, :],
        scale=scale,                                                  # (nH,) -> SMEM
        rpb=rpb,                                                      # (nH, N, N)
        g1=g1[None, :], be1=be1[None, :],
        w1_t=w1.T.astype(_MM_DTYPE), b1=b1[None, :],
        w2_t=w2.T.astype(_MM_DTYPE), b2=b2[None, :],
    )
    if shift > 0:
        p['mask'] = _shift_attn_mask(H, W, ws, shift)                 # (nW, N, N)
    return p


# ----------------------------------------------------------------------------
# SwimTransformerBlock / BasicLayer forward
# ----------------------------------------------------------------------------
def swin_block_forward(x, p, H, W, window_size, shift_size, num_heads,
                       single_buffer):
    B, L, C = x.shape
    ws = window_size
    N = ws * ws
    nW = (H // ws) * (W // ws)
    shortcut = x

    # attention input streamed as bf16 (numerically free: only consumer is the
    # bf16 QKV GEMM); the f32 residual path is untouched.
    xi = x.reshape(B, H, W, C).astype(_MM_DTYPE)
    if shift_size > 0:
        xi = jnp.roll(xi, shift=(-shift_size, -shift_size), axis=(1, 2))
    xw = _window_partition(xi, ws).reshape(B, nW, N, C)     # (B, nW, N, C) bf16

    aw = window_attention(xw, p, num_heads, single_buffer)  # (B, nW, N, C) f32

    xi = _window_reverse(aw.reshape(B * nW, N, C), ws, H, W, C)
    if shift_size > 0:
        xi = jnp.roll(xi, shift=(shift_size, shift_size), axis=(1, 2))
    attn_out = xi.reshape(B * L, C)

    # x = shortcut + norm1(attn_out); x = x + mlp(x)  (norm2 unused by reference)
    out = fused_norm_mlp(shortcut.reshape(B * L, C), attn_out, p, single_buffer)
    return out.reshape(B, L, C)


@functools.partial(jax.jit, static_argnames=(
    "H", "W", "window_size", "num_heads", "shifts", "single_buffer"))
def basic_layer_forward(x, params, H, W, window_size, num_heads, shifts,
                        single_buffer):
    for p, shift in zip(params, shifts):
        x = swin_block_forward(x, p, H, W, window_size, shift, num_heads,
                               single_buffer)
    # downsample=None in this configuration
    return x


# ----------------------------------------------------------------------------
if __name__ == "__main__":
    key = jax.random.PRNGKey(0)

    B = 2
    H = W = 8
    dim = 32
    depth = 2
    num_heads = 2
    window_size = 4
    mlp_ratio = 4.0
    hidden = int(dim * mlp_ratio)
    L = H * W

    # SwimTransformerBlock adjustment: if min(resolution) <= window_size then
    # shift=0 and window_size=min(resolution).  Not triggered here (8 > 4).
    eff_ws = min(H, W) if min(H, W) <= window_size else window_size

    k_x, k_p = jax.random.split(key)
    x = jax.random.normal(k_x, (B, L, dim), jnp.float32)

    bkeys = jax.random.split(k_p, depth)
    params, shifts = [], []
    for i in range(depth):
        shift = 0 if (i % 2 == 0 or min(H, W) <= window_size) else eff_ws // 2
        params.append(init_block_params(bkeys[i], dim, num_heads, hidden,
                                        eff_ws, H, W, shift))
        shifts.append(shift)

    # capability probe for Buffered(1); the main kernels below run unguarded.
    single_buffer = _probe_single_buffer_support()

    y = basic_layer_forward(x, params, H=H, W=W, window_size=eff_ws,
                            num_heads=num_heads, shifts=tuple(shifts),
                            single_buffer=single_buffer)
    y = jax.block_until_ready(y)

    assert y.shape == (B, L, dim) and y.dtype == jnp.float32
    assert bool(jnp.all(jnp.isfinite(y)))
    print("KERNEL_OK")
</pallas_src>

<mosaic_0001>
module attributes {stable_mosaic.version = 11 : i64} {
  func.func @k(%arg0: i32, %arg1: memref<8x128xf32, #tpu.memory_space<vmem>>, %arg2: memref<8x128xf32, #tpu.memory_space<vmem>>, %arg3: memref<8x128xf32, #tpu.memory_space<vmem>>) attributes {dimension_semantics = [#tpu.dimension_semantics<arbitrary>], iteration_bounds = array<i64: 2>, scalar_prefetch = 0 : i64, scratch_operands = 0 : i64, tpu.core_type = #tpu.core_type<tc>, window_params = [{pipeline_mode = #tpu.pipeline_mode<synchronous>, transform_indices = @transform_0, window_bounds = array<i64: 8, 128>}, {transform_indices = @transform_1, window_bounds = array<i64: 8, 128>}, {transform_indices = @transform_2, window_bounds = array<i64: 8, 128>}]} {
    %c0 = arith.constant 0 : index
    %c0_0 = arith.constant 0 : index
    %0 = vector.load %arg2[%c0, %c0_0] : memref<8x128xf32, #tpu.memory_space<vmem>>, vector<8x128xf32>
    %c0_1 = arith.constant 0 : index
    %c0_2 = arith.constant 0 : index
    %1 = vector.load %arg1[%c0_1, %c0_2] : memref<8x128xf32, #tpu.memory_space<vmem>>, vector<8x128xf32>
    %2 = arith.addf %0, %1 : vector<8x128xf32>
    %c0_3 = arith.constant 0 : index
    %c0_4 = arith.constant 0 : index
    %3 = vector.load %arg3[%c0_3, %c0_4] : memref<8x128xf32, #tpu.memory_space<vmem>>, vector<8x128xf32>
    tpu.vector_store %arg3[%c0_3, %c0_4], %2 {strides = array<i32>} : memref<8x128xf32, #tpu.memory_space<vmem>>, vector<8x128xf32>,
    return
  }
  func.func @transform_0(%arg0: i32) -> (i32, i32) {
    %c0_i32 = arith.constant 0 : i32
    %c0_i32_0 = arith.constant 0 : i32
    %c0_i32_1 = arith.constant 0 : i32
    return %c0_i32, %c0_i32_0 : i32, i32
  }
  func.func @transform_1(%arg0: i32) -> (i32, i32) {
    %c0_i32 = arith.constant 0 : i32
    %c0_i32_0 = arith.constant 0 : i32
    return %arg0, %c0_i32 : i32, i32
  }
  func.func @transform_2(%arg0: i32) -> (i32, i32) {
    %c0_i32 = arith.constant 0 : i32
    %c0_i32_0 = arith.constant 0 : i32
    return %arg0, %c0_i32 : i32, i32
  }
}

module attributes {stable_mosaic.version = 11 : i64} {
  func.func @_window_attn_kernel(%arg0: i32, %arg1: i32, %arg2: memref<1x2x16x32xbf16, #tpu.memory_space<vmem>>, %arg3: memref<32x96xbf16, #tpu.memory_space<vmem>>, %arg4: memref<1x96xf32, #tpu.memory_space<vmem>>, %arg5: memref<32x32xbf16, #tpu.memory_space<vmem>>, %arg6: memref<1x32xf32, #tpu.memory_space<vmem>>, %arg7: memref<2xf32, #tpu.memory_space<smem>>, %arg8: memref<2x16x16xf32, #tpu.memory_space<vmem>>, %arg9: memref<1x2x16x32xf32, #tpu.memory_space<vmem>>, %arg10: memref<32x96xf32, #tpu.memory_space<vmem>>, %arg11: memref<32x32xf32, #tpu.memory_space<vmem>>) attributes {dimension_semantics = [#tpu.dimension_semantics<parallel>, #tpu.dimension_semantics<parallel>], iteration_bounds = array<i64: 2, 2>, scalar_prefetch = 0 : i64, scratch_operands = 2 : i64, tpu.core_type = #tpu.core_type<tc>, window_params = [{transform_indices = @transform_0, window_bounds = array<i64: 1, 2, 16, 32>}, {pipeline_mode = #tpu.pipeline_mode<synchronous>, transform_indices = @transform_1, window_bounds = array<i64: 32, 96>}, {pipeline_mode = #tpu.pipeline_mode<synchronous>, transform_indices = @transform_2, window_bounds = array<i64: 1, 96>}, {pipeline_mode = #tpu.pipeline_mode<synchronous>, transform_indices = @transform_3, window_bounds = array<i64: 32, 32>}, {pipeline_mode = #tpu.pipeline_mode<synchronous>, transform_indices = @transform_4, window_bounds = array<i64: 1, 32>}, {transform_indices = @transform_5, window_bounds = array<i64: 2>}, {pipeline_mode = #tpu.pipeline_mode<synchronous>, transform_indices = @transform_6, window_bounds = array<i64: 2, 16, 16>}, {transform_indices = @transform_7, window_bounds = array<i64: 1, 2, 16, 32>}]} {
    %c0 = arith.constant 0 : index
    %c0_0 = arith.constant 0 : index
    %c0_1 = arith.constant 0 : index
    %c0_2 = arith.constant 0 : index
    %0 = vector.load %arg2[%c0, %c0_0, %c0_1, %c0_2] : memref<1x2x16x32xbf16, #tpu.memory_space<vmem>>, vector<1x2x16x32xbf16>
    %1 = vector.shape_cast %0 : vector<1x2x16x32xbf16> to vector<2x16x32xbf16>
    %2 = vector.shape_cast %1 : vector<2x16x32xbf16> to vector<32x32xbf16>
    %c0_3 = arith.constant 0 : index
    %c0_4 = arith.constant 0 : index
    %3 = vector.load %arg3[%c0_3, %c0_4] : memref<32x96xbf16, #tpu.memory_space<vmem>>, vector<32x96xbf16>
    %cst = arith.constant dense<0.000000e+00> : vector<32x96xf32>
    %4 = tpu.matmul %2, %3, %cst {dimension_numbers = #tpu.dot_dimension_numbers<[1], [0], [0], [1], [0, 0, 1, 1], [], []>} : vector<32x32xbf16>, vector<32x96xbf16>, vector<32x96xf32> -> vector<32x96xf32>
    %c0_5 = arith.constant 0 : index
    %c0_6 = arith.constant 0 : index
    %5 = vector.load %arg4[%c0_5, %c0_6] : memref<1x96xf32, #tpu.memory_space<vmem>>, vector<1x96xf32>
    %6 = vector.broadcast %5 : vector<1x96xf32> to vector<32x96xf32>
    %7 = arith.addf %4, %6 : vector<32x96xf32>
    %c0_7 = arith.constant 0 : index
    %c0_8 = arith.constant 0 : index
    %8 = vector.load %arg10[%c0_7, %c0_8] : memref<32x96xf32, #tpu.memory_space<vmem>>, vector<32x96xf32>
    tpu.vector_store %arg10[%c0_7, %c0_8], %7 {strides = array<i32>} : memref<32x96xf32, #tpu.memory_space<vmem>>, vector<32x96xf32>,
    %c0_9 = arith.constant 0 : index
    %c0_10 = arith.constant 0 : index
    %9 = vector.load %arg10[%c0_9, %c0_10] : memref<32x96xf32, #tpu.memory_space<vmem>>, vector<32x16xf32>
    %c0_11 = arith.constant 0 : index
    %c32 = arith.constant 32 : index
    %10 = vector.load %arg10[%c0_11, %c32] : memref<32x96xf32, #tpu.memory_space<vmem>>, vector<32x16xf32>
    %c0_12 = arith.constant 0 : index
    %c64 = arith.constant 64 : index
    %11 = vector.load %arg10[%c0_12, %c64] : memref<32x96xf32, #tpu.memory_space<vmem>>, vector<32x16xf32>
    %12 = arith.mulf %9, %9 : vector<32x16xf32>
    %cst_13 = arith.constant dense<0.000000e+00> : vector<32xf32>
    %13 = vector.multi_reduction <add>, %12, %cst_13 [1] : vector<32x16xf32> to vector<32xf32>
    %14 = vector.shape_cast %13 : vector<32xf32> to vector<32x1xf32>
    %cst_14 = arith.constant 1.000000e-24 : f32
    %15 = vector.broadcast %cst_14 : f32 to vector<32x1xf32>
    %16 = arith.maximumf %14, %15 : vector<32x1xf32>
    %17 = math.rsqrt %16 : vector<32x1xf32>
    %18 = vector.broadcast %17 : vector<32x1xf32> to vector<32x16xf32>
    %19 = arith.mulf %9, %18 : vector<32x16xf32>
    %20 = arith.mulf %10, %10 : vector<32x16xf32>
    %cst_15 = arith.constant dense<0.000000e+00> : vector<32xf32>
    %21 = vector.multi_reduction <add>, %20, %cst_15 [1] : vector<32x16xf32> to vector<32xf32>
    %22 = vector.shape_cast %21 : vector<32xf32> to vector<32x1xf32>
    %cst_16 = arith.constant 1.000000e-24 : f32
    %23 = vector.broadcast %cst_16 : f32 to vector<32x1xf32>
    %24 = arith.maximumf %22, %23 : vector<32x1xf32>
    %25 = math.rsqrt %24 : vector<32x1xf32>
    %26 = vector.broadcast %25 : vector<32x1xf32> to vector<32x16xf32>
    %27 = arith.mulf %10, %26 : vector<32x16xf32>
    %c0_17 = arith.constant 0 : index
    %28 = memref.load %arg7[%c0_17] : memref<2xf32, #tpu.memory_space<smem>>
    %29 = vector.broadcast %28 : f32 to vector<32x16xf32>
    %30 = arith.mulf %19, %29 : vector<32x16xf32>
    %31 = vector.shape_cast %30 : vector<32x16xf32> to vector<2x16x16xf32>
    %32 = arith.truncf %31 : vector<2x16x16xf32> to vector<2x16x16xbf16>
    %33 = vector.shape_cast %27 : vector<32x16xf32> to vector<2x16x16xf32>
    %34 = arith.truncf %33 : vector<2x16x16xf32> to vector<2x16x16xbf16>
    %35 = vector.shape_cast %11 : vector<32x16xf32> to vector<2x16x16xf32>
    %36 = arith.truncf %35 : vector<2x16x16xf32> to vector<2x16x16xbf16>
    "tpu.trace_start"() <{level = 10 : i32, message = "wnd,wmd->wnm"}> : () -> ()
    %cst_18 = arith.constant dense<0.000000e+00> : vector<2x16x16xf32>
    %37 = tpu.matmul %32, %34, %cst_18 {dimension_numbers = #tpu.dot_dimension_numbers<[2], [2], [1], [1], [0, 0, 0, 1, 1, 1], [0], [0]>} : vector<2x16x16xbf16>, vector<2x16x16xbf16>, vector<2x16x16xf32> -> vector<2x16x16xf32>
    "tpu.trace_stop"() : () -> ()
    %c0_19 = arith.constant 0 : index
    %c0_20 = arith.constant 0 : index
    %c0_21 = arith.constant 0 : index
    %38 = vector.load %arg8[%c0_19, %c0_20, %c0_21] : memref<2x16x16xf32, #tpu.memory_space<vmem>>, vector<1x16x16xf32>
    %39 = vector.shape_cast %38 : vector<1x16x16xf32> to vector<16x16xf32>
    %40 = vector.shape_cast %39 : vector<16x16xf32> to vector<1x16x16xf32>
    %41 = vector.broadcast %40 : vector<1x16x16xf32> to vector<2x16x16xf32>
    %42 = arith.addf %37, %41 : vector<2x16x16xf32>
    %cst_22 = arith.constant dense<0xFF800000> : vector<2x16xf32>
    %43 = vector.multi_reduction <maximumf>, %42, %cst_22 [2] : vector<2x16x16xf32> to vector<2x16xf32>
    %44 = vector.shape_cast %43 : vector<2x16xf32> to vector<2x16x1xf32>
    %45 = vector.broadcast %44 : vector<2x16x1xf32> to vector<2x16x16xf32>
    %46 = arith.subf %42, %45 : vector<2x16x16xf32>
    %47 = math.exp %46 : vector<2x16x16xf32>
    %cst_23 = arith.constant dense<0.000000e+00> : vector<2x16xf32>
    %48 = vector.multi_reduction <add>, %47, %cst_23 [2] : vector<2x16x16xf32> to vector<2x16xf32>
    %49 = vector.shape_cast %48 : vector<2x16xf32> to vector<2x16x1xf32>
    %50 = tpu.reciprocal %49 {approx = true} : vector<2x16x1xf32> -> vector<2x16x1xf32>
    %51 = vector.broadcast %50 : vector<2x16x1xf32> to vector<2x16x16xf32>
    %52 = arith.mulf %47, %51 : vector<2x16x16xf32>
    %53 = arith.truncf %52 : vector<2x16x16xf32> to vector<2x16x16xbf16>
    "tpu.trace_start"() <{level = 10 : i32, message = "wnm,wmd->wnd"}> : () -> ()
    %cst_24 = arith.constant dense<0.000000e+00> : vector<2x16x16xf32>
    %54 = tpu.matmul %53, %36, %cst_24 {dimension_numbers = #tpu.dot_dimension_numbers<[2], [1], [1], [2], [0, 0, 0, 1, 1, 2], [0], [0]>} : vector<2x16x16xbf16>, vector<2x16x16xbf16>, vector<2x16x16xf32> -> vector<2x16x16xf32>
    "tpu.trace_stop"() : () -> ()
    %55 = vector.shape_cast %54 : vector<2x16x16xf32> to vector<32x16xf32>
    %c0_25 = arith.constant 0 : index
    %c0_26 = arith.constant 0 : index
    %56 = vector.load %arg11[%c0_25, %c0_26] : memref<32x32xf32, #tpu.memory_space<vmem>>, vector<32x16xf32>
    tpu.vector_store %arg11[%c0_25, %c0_26], %55 {strides = array<i32>} : memref<32x32xf32, #tpu.memory_space<vmem>>, vector<32x16xf32>,
    %c0_27 = arith.constant 0 : index
    %c16 = arith.constant 16 : index
    %57 = vector.load %arg10[%c0_27, %c16] : memref<32x96xf32, #tpu.memory_space<vmem>>, vector<32x16xf32>
    %c0_28 = arith.constant 0 : index
    %c48 = arith.constant 48 : index
    %58 = vector.load %arg10[%c0_28, %c48] : memref<32x96xf32, #tpu.memory_space<vmem>>, vector<32x16xf32>
    %c0_29 = arith.constant 0 : index
    %c80 = arith.constant 80 : index
    %59 = vector.load %arg10[%c0_29, %c80] : memref<32x96xf32, #tpu.memory_space<vmem>>, vector<32x16xf32>
    %60 = arith.mulf %57, %57 : vector<32x16xf32>
    %cst_30 = arith.constant dense<0.000000e+00> : vector<32xf32>
    %61 = vector.multi_reduction <add>, %60, %cst_30 [1] : vector<32x16xf32> to vector<32xf32>
    %62 = vector.shape_cast %61 : vector<32xf32> to vector<32x1xf32>
    %cst_31 = arith.constant 1.000000e-24 : f32
    %63 = vector.broadcast %cst_31 : f32 to vector<32x1xf32>
    %64 = arith.maximumf %62, %63 : vector<32x1xf32>
    %65 = math.rsqrt %64 : vector<32x1xf32>
    %66 = vector.broadcast %65 : vector<32x1xf32> to vector<32x16xf32>
    %67 = arith.mulf %57, %66 : vector<32x16xf32>
    %68 = arith.mulf %58, %58 : vector<32x16xf32>
    %cst_32 = arith.constant dense<0.000000e+00> : vector<32xf32>
    %69 = vector.multi_reduction <add>, %68, %cst_32 [1] : vector<32x16xf32> to vector<32xf32>
    %70 = vector.shape_cast %69 : vector<32xf32> to vector<32x1xf32>
    %cst_33 = arith.constant 1.000000e-24 : f32
    %71 = vector.broadcast %cst_33 : f32 to vector<32x1xf32>
    %72 = arith.maximumf %70, %71 : vector<32x1xf32>
    %73 = math.rsqrt %72 : vector<32x1xf32>
    %74 = vector.broadcast %73 : vector<32x1xf32> to vector<32x16xf32>
    %75 = arith.mulf %58, %74 : vector<32x16xf32>
    %c1 = arith.constant 1 : index
    %76 = memref.load %arg7[%c1] : memref<2xf32, #tpu.memory_space<smem>>
    %77 = vector.broadcast %76 : f32 to vector<32x16xf32>
    %78 = arith.mulf %67, %77 : vector<32x16xf32>
    %79 = vector.shape_cast %78 : vector<32x16xf32> to vector<2x16x16xf32>
    %80 = arith.truncf %79 : vector<2x16x16xf32> to vector<2x16x16xbf16>
    %81 = vector.shape_cast %75 : vector<32x16xf32> to vector<2x16x16xf32>
    %82 = arith.truncf %81 : vector<2x16x16xf32> to vector<2x16x16xbf16>
    %83 = vector.shape_cast %59 : vector<32x16xf32> to vector<2x16x16xf32>
    %84 = arith.truncf %83 : vector<2x16x16xf32> to vector<2x16x16xbf16>
    "tpu.trace_start"() <{level = 10 : i32, message = "wnd,wmd->wnm"}> : () -> ()
    %cst_34 = arith.constant dense<0.000000e+00> : vector<2x16x16xf32>
    %85 = tpu.matmul %80, %82, %cst_34 {dimension_numbers = #tpu.dot_dimension_numbers<[2], [2], [1], [1], [0, 0, 0, 1, 1, 1], [0], [0]>} : vector<2x16x16xbf16>, vector<2x16x16xbf16>, vector<2x16x16xf32> -> vector<2x16x16xf32>
    "tpu.trace_stop"() : () -> ()
    %c1_35 = arith.constant 1 : index
    %c0_36 = arith.constant 0 : index
    %c0_37 = arith.constant 0 : index
    %86 = vector.load %arg8[%c1_35, %c0_36, %c0_37] : memref<2x16x16xf32, #tpu.memory_space<vmem>>, vector<1x16x16xf32>
    %87 = vector.shape_cast %86 : vector<1x16x16xf32> to vector<16x16xf32>
    %88 = vector.shape_cast %87 : vector<16x16xf32> to vector<1x16x16xf32>
    %89 = vector.broadcast %88 : vector<1x16x16xf32> to vector<2x16x16xf32>
    %90 = arith.addf %85, %89 : vector<2x16x16xf32>
    %cst_38 = arith.constant dense<0xFF800000> : vector<2x16xf32>
    %91 = vector.multi_reduction <maximumf>, %90, %cst_38 [2] : vector<2x16x16xf32> to vector<2x16xf32>
    %92 = vector.shape_cast %91 : vector<2x16xf32> to vector<2x16x1xf32>
    %93 = vector.broadcast %92 : vector<2x16x1xf32> to vector<2x16x16xf32>
    %94 = arith.subf %90, %93 : vector<2x16x16xf32>
    %95 = math.exp %94 : vector<2x16x16xf32>
    %cst_39 = arith.constant dense<0.000000e+00> : vector<2x16xf32>
    %96 = vector.multi_reduction <add>, %95, %cst_39 [2] : vector<2x16x16xf32> to vector<2x16xf32>
    %97 = vector.shape_cast %96 : vector<2x16xf32> to vector<2x16x1xf32>
    %98 = tpu.reciprocal %97 {approx = true} : vector<2x16x1xf32> -> vector<2x16x1xf32>
    %99 = vector.broadcast %98 : vector<2x16x1xf32> to vector<2x16x16xf32>
    %100 = arith.mulf %95, %99 : vector<2x16x16xf32>
    %101 = arith.truncf %100 : vector<2x16x16xf32> to vector<2x16x16xbf16>
    "tpu.trace_start"() <{level = 10 : i32, message = "wnm,wmd->wnd"}> : () -> ()
    %cst_40 = arith.constant dense<0.000000e+00> : vector<2x16x16xf32>
    %102 = tpu.matmul %101, %84, %cst_40 {dimension_numbers = #tpu.dot_dimension_numbers<[2], [1], [1], [2], [0, 0, 0, 1, 1, 2], [0], [0]>} : vector<2x16x16xbf16>, vector<2x16x16xbf16>, vector<2x16x16xf32> -> vector<2x16x16xf32>
    "tpu.trace_stop"() : () -> ()
    %103 = vector.shape_cast %102 : vector<2x16x16xf32> to vector<32x16xf32>
    %c0_41 = arith.constant 0 : index
    %c16_42 = arith.constant 16 : index
    %104 = vector.load %arg11[%c0_41, %c16_42] : memref<32x32xf32, #tpu.memory_space<vmem>>, vector<32x16xf32>
    tpu.vector_store %arg11[%c0_41, %c16_42], %103 {strides = array<i32>} : memref<32x32xf32, #tpu.memory_space<vmem>>, vector<32x16xf32>,
    %c0_43 = arith.constant 0 : index
    %c0_44 = arith.constant 0 : index
    %105 = vector.load %arg11[%c0_43, %c0_44] : memref<32x32xf32, #tpu.memory_space<vmem>>, vector<32x32xf32>
    %106 = arith.truncf %105 : vector<32x32xf32> to vector<32x32xbf16>
    %c0_45 = arith.constant 0 : index
    %c0_46 = arith.constant 0 : index
    %107 = vector.load %arg5[%c0_45, %c0_46] : memref<32x32xbf16, #tpu.memory_space<vmem>>, vector<32x32xbf16>
    %cst_47 = arith.constant dense<0.000000e+00> : vector<32x32xf32>
    %108 = tpu.matmul %106, %107, %cst_47 {dimension_numbers = #tpu.dot_dimension_numbers<[1], [0], [0], [1], [0, 0, 1, 1], [], []>} : vector<32x32xbf16>, vector<32x32xbf16>, vector<32x32xf32> -> vector<32x32xf32>
    %c0_48 = arith.constant 0 : index
    %c0_49 = arith.constant 0 : index
    %109 = vector.load %arg6[%c0_48, %c0_49] : memref<1x32xf32, #tpu.memory_space<vmem>>, vector<1x32xf32>
    %110 = vector.broadcast %109 : vector<1x32xf32> to vector<32x32xf32>
    %111 = arith.addf %108, %110 : vector<32x32xf32>
    %112 = vector.shape_cast %111 : vector<32x32xf32> to vector<2x16x32xf32>
    %c0_50 = arith.constant 0 : index
    %c0_51 = arith.constant 0 : index
    %c0_52 = arith.constant 0 : index
    %c0_53 = arith.constant 0 : index
    %113 = vector.load %arg9[%c0_50, %c0_51, %c0_52, %c0_53] : memref<1x2x16x32xf32, #tpu.memory_space<vmem>>, vector<1x2x16x32xf32>
    %114 = vector.shape_cast %113 : vector<1x2x16x32xf32> to vector<2x16x32xf32>
    %115 = vector.shape_cast %112 : vector<2x16x32xf32> to vector<1x2x16x32xf32>
    tpu.vector_store %arg9[%c0_50, %c0_51, %c0_52, %c0_53], %115 {strides = array<i32>} : memref<1x2x16x32xf32, #tpu.memory_space<vmem>>, vector<1x2x16x32xf32>,
    return
  }
  func.func @transform_0(%arg0: i32, %arg1: i32) -> (i32, i32, i32, i32) {
    %c0_i32 = arith.constant 0 : i32
    %c0_i32_0 = arith.constant 0 : i32
    %c0_i32_1 = arith.constant 0 : i32
    return %arg0, %arg1, %c0_i32, %c0_i32_0 : i32, i32, i32, i32
  }
  func.func @transform_1(%arg0: i32, %arg1: i32) -> (i32, i32) {
    %c0_i32 = arith.constant 0 : i32
    %c0_i32_0 = arith.constant 0 : i32
    %c0_i32_1 = arith.constant 0 : i32
    return %c0_i32, %c0_i32_0 : i32, i32
  }
  func.func @transform_2(%arg0: i32, %arg1: i32) -> (i32, i32) {
    %c0_i32 = arith.constant 0 : i32
    %c0_i32_0 = arith.constant 0 : i32
    %c0_i32_1 = arith.constant 0 : i32
    return %c0_i32, %c0_i32_0 : i32, i32
  }
  func.func @transform_3(%arg0: i32, %arg1: i32) -> (i32, i32) {
    %c0_i32 = arith.constant 0 : i32
    %c0_i32_0 = arith.constant 0 : i32
    %c0_i32_1 = arith.constant 0 : i32
    return %c0_i32, %c0_i32_0 : i32, i32
  }
  func.func @transform_4(%arg0: i32, %arg1: i32) -> (i32, i32) {
    %c0_i32 = arith.constant 0 : i32
    %c0_i32_0 = arith.constant 0 : i32
    %c0_i32_1 = arith.constant 0 : i32
    return %c0_i32, %c0_i32_0 : i32, i32
  }
  func.func @transform_5(%arg0: i32, %arg1: i32) -> i32 {
    %c0_i32 = arith.constant 0 : i32
    %c0_i32_0 = arith.constant 0 : i32
    return %c0_i32 : i32
  }
  func.func @transform_6(%arg0: i32, %arg1: i32) -> (i32, i32, i32) {
    %c0_i32 = arith.constant 0 : i32
    %c0_i32_0 = arith.constant 0 : i32
    %c0_i32_1 = arith.constant 0 : i32
    %c0_i32_2 = arith.constant 0 : i32
    return %c0_i32, %c0_i32_0, %c0_i32_1 : i32, i32, i32
  }
  func.func @transform_7(%arg0: i32, %arg1: i32) -> (i32, i32, i32, i32) {
    %c0_i32 = arith.constant 0 : i32
    %c0_i32_0 = arith.constant 0 : i32
    %c0_i32_1 = arith.constant 0 : i32
    return %arg0, %arg1, %c0_i32, %c0_i32_0 : i32, i32, i32, i32
  }
}

module attributes {stable_mosaic.version = 11 : i64} {
  func.func @_mlp_fused_kernel(%arg0: i32, %arg1: memref<32x32xf32, #tpu.memory_space<vmem>>, %arg2: memref<32x32xf32, #tpu.memory_space<vmem>>, %arg3: memref<1x32xf32, #tpu.memory_space<vmem>>, %arg4: memref<1x32xf32, #tpu.memory_space<vmem>>, %arg5: memref<32x128xbf16, #tpu.memory_space<vmem>>, %arg6: memref<1x128xf32, #tpu.memory_space<vmem>>, %arg7: memref<128x32xbf16, #tpu.memory_space<vmem>>, %arg8: memref<1x32xf32, #tpu.memory_space<vmem>>, %arg9: memref<32x32xf32, #tpu.memory_space<vmem>>) attributes {dimension_semantics = [#tpu.dimension_semantics<parallel>], iteration_bounds = array<i64: 4>, scalar_prefetch = 0 : i64, scratch_operands = 0 : i64, tpu.core_type = #tpu.core_type<tc>, window_params = [{transform_indices = @transform_0, window_bounds = array<i64: 32, 32>}, {transform_indices = @transform_1, window_bounds = array<i64: 32, 32>}, {pipeline_mode = #tpu.pipeline_mode<synchronous>, transform_indices = @transform_2, window_bounds = array<i64: 1, 32>}, {pipeline_mode = #tpu.pipeline_mode<synchronous>, transform_indices = @transform_3, window_bounds = array<i64: 1, 32>}, {pipeline_mode = #tpu.pipeline_mode<synchronous>, transform_indices = @transform_4, window_bounds = array<i64: 32, 128>}, {pipeline_mode = #tpu.pipeline_mode<synchronous>, transform_indices = @transform_5, window_bounds = array<i64: 1, 128>}, {pipeline_mode = #tpu.pipeline_mode<synchronous>, transform_indices = @transform_6, window_bounds = array<i64: 128, 32>}, {pipeline_mode = #tpu.pipeline_mode<synchronous>, transform_indices = @transform_7, window_bounds = array<i64: 1, 32>}, {transform_indices = @transform_8, window_bounds = array<i64: 32, 32>}]} {
    %c0 = arith.constant 0 : index
    %c0_0 = arith.constant 0 : index
    %0 = vector.load %arg2[%c0, %c0_0] : memref<32x32xf32, #tpu.memory_space<vmem>>, vector<32x32xf32>
    %cst = arith.constant dense<0.000000e+00> : vector<32xf32>
    %1 = vector.multi_reduction <add>, %0, %cst [1] : vector<32x32xf32> to vector<32xf32>
    %2 = vector.shape_cast %1 : vector<32xf32> to vector<32x1xf32>
    %cst_1 = arith.constant 3.200000e+01 : f32
    %3 = vector.broadcast %cst_1 : f32 to vector<32x1xf32>
    %4 = arith.divf %2, %3 : vector<32x1xf32>
    %5 = vector.broadcast %4 : vector<32x1xf32> to vector<32x32xf32>
    %6 = arith.subf %0, %5 : vector<32x32xf32>
    %7 = arith.mulf %6, %6 : vector<32x32xf32>
    %cst_2 = arith.constant dense<0.000000e+00> : vector<32xf32>
    %8 = vector.multi_reduction <add>, %7, %cst_2 [1] : vector<32x32xf32> to vector<32xf32>
    %9 = vector.shape_cast %8 : vector<32xf32> to vector<32x1xf32>
    %cst_3 = arith.constant 3.200000e+01 : f32
    %10 = vector.broadcast %cst_3 : f32 to vector<32x1xf32>
    %11 = arith.divf %9, %10 : vector<32x1xf32>
    %12 = vector.broadcast %4 : vector<32x1xf32> to vector<32x32xf32>
    %13 = arith.subf %0, %12 : vector<32x32xf32>
    %cst_4 = arith.constant 9.99999974E-6 : f32
    %14 = vector.broadcast %cst_4 : f32 to vector<32x1xf32>
    %15 = arith.addf %11, %14 : vector<32x1xf32>
    %16 = math.rsqrt %15 : vector<32x1xf32>
    %17 = vector.broadcast %16 : vector<32x1xf32> to vector<32x32xf32>
    %18 = arith.mulf %13, %17 : vector<32x32xf32>
    %c0_5 = arith.constant 0 : index
    %c0_6 = arith.constant 0 : index
    %19 = vector.load %arg3[%c0_5, %c0_6] : memref<1x32xf32, #tpu.memory_space<vmem>>, vector<1x32xf32>
    %20 = vector.broadcast %19 : vector<1x32xf32> to vector<32x32xf32>
    %21 = arith.mulf %18, %20 : vector<32x32xf32>
    %c0_7 = arith.constant 0 : index
    %c0_8 = arith.constant 0 : index
    %22 = vector.load %arg4[%c0_7, %c0_8] : memref<1x32xf32, #tpu.memory_space<vmem>>, vector<1x32xf32>
    %23 = vector.broadcast %22 : vector<1x32xf32> to vector<32x32xf32>
    %24 = arith.addf %21, %23 : vector<32x32xf32>
    %c0_9 = arith.constant 0 : index
    %c0_10 = arith.constant 0 : index
    %25 = vector.load %arg1[%c0_9, %c0_10] : memref<32x32xf32, #tpu.memory_space<vmem>>, vector<32x32xf32>
    %26 = arith.addf %25, %24 : vector<32x32xf32>
    %27 = arith.truncf %26 : vector<32x32xf32> to vector<32x32xbf16>
    %c0_11 = arith.constant 0 : index
    %c0_12 = arith.constant 0 : index
    %28 = vector.load %arg5[%c0_11, %c0_12] : memref<32x128xbf16, #tpu.memory_space<vmem>>, vector<32x128xbf16>
    %cst_13 = arith.constant dense<0.000000e+00> : vector<32x128xf32>
    %29 = tpu.matmul %27, %28, %cst_13 {dimension_numbers = #tpu.dot_dimension_numbers<[1], [0], [0], [1], [0, 0, 1, 1], [], []>} : vector<32x32xbf16>, vector<32x128xbf16>, vector<32x128xf32> -> vector<32x128xf32>
    %c0_14 = arith.constant 0 : index
    %c0_15 = arith.constant 0 : index
    %30 = vector.load %arg6[%c0_14, %c0_15] : memref<1x128xf32, #tpu.memory_space<vmem>>, vector<1x128xf32>
    %31 = vector.broadcast %30 : vector<1x128xf32> to vector<32x128xf32>
    %32 = arith.addf %29, %31 : vector<32x128xf32>
    %cst_16 = arith.constant 5.000000e-01 : f32
    %33 = vector.broadcast %cst_16 : f32 to vector<32x128xf32>
    %34 = arith.mulf %33, %32 : vector<32x128xf32>
    %cst_17 = arith.constant 4.471500e-02 : f32
    %35 = vector.broadcast %cst_17 : f32 to vector<32x128xf32>
    %36 = arith.mulf %35, %32 : vector<32x128xf32>
    %37 = arith.mulf %36, %32 : vector<32x128xf32>
    %38 = arith.mulf %37, %32 : vector<32x128xf32>
    %39 = arith.addf %32, %38 : vector<32x128xf32>
    %cst_18 = arith.constant 0.797884583 : f32
    %40 = vector.broadcast %cst_18 : f32 to vector<32x128xf32>
    %41 = arith.mulf %40, %39 : vector<32x128xf32>
    %42 = math.tanh %41 : vector<32x128xf32>
    %cst_19 = arith.constant 1.000000e+00 : f32
    %43 = vector.broadcast %cst_19 : f32 to vector<32x128xf32>
    %44 = arith.addf %43, %42 : vector<32x128xf32>
    %45 = arith.mulf %34, %44 : vector<32x128xf32>
    %46 = arith.truncf %45 : vector<32x128xf32> to vector<32x128xbf16>
    %c0_20 = arith.constant 0 : index
    %c0_21 = arith.constant 0 : index
    %47 = vector.load %arg7[%c0_20, %c0_21] : memref<128x32xbf16, #tpu.memory_space<vmem>>, vector<128x32xbf16>
    %cst_22 = arith.constant dense<0.000000e+00> : vector<32x32xf32>
    %48 = tpu.matmul %46, %47, %cst_22 {dimension_numbers = #tpu.dot_dimension_numbers<[1], [0], [0], [1], [0, 0, 1, 1], [], []>} : vector<32x128xbf16>, vector<128x32xbf16>, vector<32x32xf32> -> vector<32x32xf32>
    %c0_23 = arith.constant 0 : index
    %c0_24 = arith.constant 0 : index
    %49 = vector.load %arg8[%c0_23, %c0_24] : memref<1x32xf32, #tpu.memory_space<vmem>>, vector<1x32xf32>
    %50 = vector.broadcast %49 : vector<1x32xf32> to vector<32x32xf32>
    %51 = arith.addf %48, %50 : vector<32x32xf32>
    %52 = arith.addf %26, %51 : vector<32x32xf32>
    %c0_25 = arith.constant 0 : index
    %c0_26 = arith.constant 0 : index
    %53 = vector.load %arg9[%c0_25, %c0_26] : memref<32x32xf32, #tpu.memory_space<vmem>>, vector<32x32xf32>
    tpu.vector_store %arg9[%c0_25, %c0_26], %52 {strides = array<i32>} : memref<32x32xf32, #tpu.memory_space<vmem>>, vector<32x32xf32>,
    return
  }
  func.func @transform_0(%arg0: i32) -> (i32, i32) {
    %c0_i32 = arith.constant 0 : i32
    %c0_i32_0 = arith.constant 0 : i32
    return %arg0, %c0_i32 : i32, i32
  }
  func.func @transform_1(%arg0: i32) -> (i32, i32) {
    %c0_i32 = arith.constant 0 : i32
    %c0_i32_0 = arith.constant 0 : i32
    return %arg0, %c0_i32 : i32, i32
  }
  func.func @transform_2(%arg0: i32) -> (i32, i32) {
    %c0_i32 = arith.constant 0 : i32
    %c0_i32_0 = arith.constant 0 : i32
    %c0_i32_1 = arith.constant 0 : i32
    return %c0_i32, %c0_i32_0 : i32, i32
  }
  func.func @transform_3(%arg0: i32) -> (i32, i32) {
    %c0_i32 = arith.constant 0 : i32
    %c0_i32_0 = arith.constant 0 : i32
    %c0_i32_1 = arith.constant 0 : i32
    return %c0_i32, %c0_i32_0 : i32, i32
  }
  func.func @transform_4(%arg0: i32) -> (i32, i32) {
    %c0_i32 = arith.constant 0 : i32
    %c0_i32_0 = arith.constant 0 : i32
    %c0_i32_1 = arith.constant 0 : i32
    return %c0_i32, %c0_i32_0 : i32, i32
  }
  func.func @transform_5(%arg0: i32) -> (i32, i32) {
    %c0_i32 = arith.constant 0 : i32
    %c0_i32_0 = arith.constant 0 : i32
    %c0_i32_1 = arith.constant 0 : i32
    return %c0_i32, %c0_i32_0 : i32, i32
  }
  func.func @transform_6(%arg0: i32) -> (i32, i32) {
    %c0_i32 = arith.constant 0 : i32
    %c0_i32_0 = arith.constant 0 : i32
    %c0_i32_1 = arith.constant 0 : i32
    return %c0_i32, %c0_i32_0 : i32, i32
  }
  func.func @transform_7(%arg0: i32) -> (i32, i32) {
    %c0_i32 = arith.constant 0 : i32
    %c0_i32_0 = arith.constant 0 : i32
    %c0_i32_1 = arith.constant 0 : i32
    return %c0_i32, %c0_i32_0 : i32, i32
  }
  func.func @transform_8(%arg0: i32) -> (i32, i32) {
    %c0_i32 = arith.constant 0 : i32
    %c0_i32_0 = arith.constant 0 : i32
    return %arg0, %c0_i32 : i32, i32
  }
}

module attributes {stable_mosaic.version = 11 : i64} {
  func.func @_window_attn_kernel(%arg0: i32, %arg1: i32, %arg2: memref<1x2x16x32xbf16, #tpu.memory_space<vmem>>, %arg3: memref<32x96xbf16, #tpu.memory_space<vmem>>, %arg4: memref<1x96xf32, #tpu.memory_space<vmem>>, %arg5: memref<32x32xbf16, #tpu.memory_space<vmem>>, %arg6: memref<1x32xf32, #tpu.memory_space<vmem>>, %arg7: memref<2xf32, #tpu.memory_space<smem>>, %arg8: memref<2x16x16xf32, #tpu.memory_space<vmem>>, %arg9: memref<4x16x16xf32, #tpu.memory_space<vmem>>, %arg10: memref<1x2x16x32xf32, #tpu.memory_space<vmem>>, %arg11: memref<32x96xf32, #tpu.memory_space<vmem>>, %arg12: memref<32x32xf32, #tpu.memory_space<vmem>>) attributes {dimension_semantics = [#tpu.dimension_semantics<parallel>, #tpu.dimension_semantics<parallel>], iteration_bounds = array<i64: 2, 2>, scalar_prefetch = 0 : i64, scratch_operands = 2 : i64, tpu.core_type = #tpu.core_type<tc>, window_params = [{transform_indices = @transform_0, window_bounds = array<i64: 1, 2, 16, 32>}, {pipeline_mode = #tpu.pipeline_mode<synchronous>, transform_indices = @transform_1, window_bounds = array<i64: 32, 96>}, {pipeline_mode = #tpu.pipeline_mode<synchronous>, transform_indices = @transform_2, window_bounds = array<i64: 1, 96>}, {pipeline_mode = #tpu.pipeline_mode<synchronous>, transform_indices = @transform_3, window_bounds = array<i64: 32, 32>}, {pipeline_mode = #tpu.pipeline_mode<synchronous>, transform_indices = @transform_4, window_bounds = array<i64: 1, 32>}, {transform_indices = @transform_5, window_bounds = array<i64: 2>}, {pipeline_mode = #tpu.pipeline_mode<synchronous>, transform_indices = @transform_6, window_bounds = array<i64: 2, 16, 16>}, {pipeline_mode = #tpu.pipeline_mode<synchronous>, transform_indices = @transform_7, window_bounds = array<i64: 4, 16, 16>}, {transform_indices = @transform_8, window_bounds = array<i64: 1, 2, 16, 32>}]} {
    %c0 = arith.constant 0 : index
    %c0_0 = arith.constant 0 : index
    %c0_1 = arith.constant 0 : index
    %c0_2 = arith.constant 0 : index
    %0 = vector.load %arg2[%c0, %c0_0, %c0_1, %c0_2] : memref<1x2x16x32xbf16, #tpu.memory_space<vmem>>, vector<1x2x16x32xbf16>
    %1 = vector.shape_cast %0 : vector<1x2x16x32xbf16> to vector<2x16x32xbf16>
    %2 = vector.shape_cast %1 : vector<2x16x32xbf16> to vector<32x32xbf16>
    %c0_3 = arith.constant 0 : index
    %c0_4 = arith.constant 0 : index
    %3 = vector.load %arg3[%c0_3, %c0_4] : memref<32x96xbf16, #tpu.memory_space<vmem>>, vector<32x96xbf16>
    %cst = arith.constant dense<0.000000e+00> : vector<32x96xf32>
    %4 = tpu.matmul %2, %3, %cst {dimension_numbers = #tpu.dot_dimension_numbers<[1], [0], [0], [1], [0, 0, 1, 1], [], []>} : vector<32x32xbf16>, vector<32x96xbf16>, vector<32x96xf32> -> vector<32x96xf32>
    %c0_5 = arith.constant 0 : index
    %c0_6 = arith.constant 0 : index
    %5 = vector.load %arg4[%c0_5, %c0_6] : memref<1x96xf32, #tpu.memory_space<vmem>>, vector<1x96xf32>
    %6 = vector.broadcast %5 : vector<1x96xf32> to vector<32x96xf32>
    %7 = arith.addf %4, %6 : vector<32x96xf32>
    %c0_7 = arith.constant 0 : index
    %c0_8 = arith.constant 0 : index
    %8 = vector.load %arg11[%c0_7, %c0_8] : memref<32x96xf32, #tpu.memory_space<vmem>>, vector<32x96xf32>
    tpu.vector_store %arg11[%c0_7, %c0_8], %7 {strides = array<i32>} : memref<32x96xf32, #tpu.memory_space<vmem>>, vector<32x96xf32>,
    %c2_i32 = arith.constant 2 : i32
    %9 = arith.muli %arg1, %c2_i32 : i32
    %10 = tpu.assume_multiple %9, 2 : i32
    %11 = arith.index_cast %10 : i32 to index
    %c0_9 = arith.constant 0 : index
    %c0_10 = arith.constant 0 : index
    %12 = vector.load %arg9[%11, %c0_9, %c0_10] : memref<4x16x16xf32, #tpu.memory_space<vmem>>, vector<2x16x16xf32>
    %c0_11 = arith.constant 0 : index
    %c0_12 = arith.constant 0 : index
    %13 = vector.load %arg11[%c0_11, %c0_12] : memref<32x96xf32, #tpu.memory_space<vmem>>, vector<32x16xf32>
    %c0_13 = arith.constant 0 : index
    %c32 = arith.constant 32 : index
    %14 = vector.load %arg11[%c0_13, %c32] : memref<32x96xf32, #tpu.memory_space<vmem>>, vector<32x16xf32>
    %c0_14 = arith.constant 0 : index
    %c64 = arith.constant 64 : index
    %15 = vector.load %arg11[%c0_14, %c64] : memref<32x96xf32, #tpu.memory_space<vmem>>, vector<32x16xf32>
    %16 = arith.mulf %13, %13 : vector<32x16xf32>
    %cst_15 = arith.constant dense<0.000000e+00> : vector<32xf32>
    %17 = vector.multi_reduction <add>, %16, %cst_15 [1] : vector<32x16xf32> to vector<32xf32>
    %18 = vector.shape_cast %17 : vector<32xf32> to vector<32x1xf32>
    %cst_16 = arith.constant 1.000000e-24 : f32
    %19 = vector.broadcast %cst_16 : f32 to vector<32x1xf32>
    %20 = arith.maximumf %18, %19 : vector<32x1xf32>
    %21 = math.rsqrt %20 : vector<32x1xf32>
    %22 = vector.broadcast %21 : vector<32x1xf32> to vector<32x16xf32>
    %23 = arith.mulf %13, %22 : vector<32x16xf32>
    %24 = arith.mulf %14, %14 : vector<32x16xf32>
    %cst_17 = arith.constant dense<0.000000e+00> : vector<32xf32>
    %25 = vector.multi_reduction <add>, %24, %cst_17 [1] : vector<32x16xf32> to vector<32xf32>
    %26 = vector.shape_cast %25 : vector<32xf32> to vector<32x1xf32>
    %cst_18 = arith.constant 1.000000e-24 : f32
    %27 = vector.broadcast %cst_18 : f32 to vector<32x1xf32>
    %28 = arith.maximumf %26, %27 : vector<32x1xf32>
    %29 = math.rsqrt %28 : vector<32x1xf32>
    %30 = vector.broadcast %29 : vector<32x1xf32> to vector<32x16xf32>
    %31 = arith.mulf %14, %30 : vector<32x16xf32>
    %c0_19 = arith.constant 0 : index
    %32 = memref.load %arg7[%c0_19] : memref<2xf32, #tpu.memory_space<smem>>
    %33 = vector.broadcast %32 : f32 to vector<32x16xf32>
    %34 = arith.mulf %23, %33 : vector<32x16xf32>
    %35 = vector.shape_cast %34 : vector<32x16xf32> to vector<2x16x16xf32>
    %36 = arith.truncf %35 : vector<2x16x16xf32> to vector<2x16x16xbf16>
    %37 = vector.shape_cast %31 : vector<32x16xf32> to vector<2x16x16xf32>
    %38 = arith.truncf %37 : vector<2x16x16xf32> to vector<2x16x16xbf16>
    %39 = vector.shape_cast %15 : vector<32x16xf32> to vector<2x16x16xf32>
    %40 = arith.truncf %39 : vector<2x16x16xf32> to vector<2x16x16xbf16>
    "tpu.trace_start"() <{level = 10 : i32, message = "wnd,wmd->wnm"}> : () -> ()
    %cst_20 = arith.constant dense<0.000000e+00> : vector<2x16x16xf32>
    %41 = tpu.matmul %36, %38, %cst_20 {dimension_numbers = #tpu.dot_dimension_numbers<[2], [2], [1], [1], [0, 0, 0, 1, 1, 1], [0], [0]>} : vector<2x16x16xbf16>, vector<2x16x16xbf16>, vector<2x16x16xf32> -> vector<2x16x16xf32>
    "tpu.trace_stop"() : () -> ()
    %c0_21 = arith.constant 0 : index
    %c0_22 = arith.constant 0 : index
    %c0_23 = arith.constant 0 : index
    %42 = vector.load %arg8[%c0_21, %c0_22, %c0_23] : memref<2x16x16xf32, #tpu.memory_space<vmem>>, vector<1x16x16xf32>
    %43 = vector.shape_cast %42 : vector<1x16x16xf32> to vector<16x16xf32>
    %44 = vector.shape_cast %43 : vector<16x16xf32> to vector<1x16x16xf32>
    %45 = vector.broadcast %44 : vector<1x16x16xf32> to vector<2x16x16xf32>
    %46 = arith.addf %41, %45 : vector<2x16x16xf32>
    %47 = arith.addf %46, %12 : vector<2x16x16xf32>
    %cst_24 = arith.constant dense<0xFF800000> : vector<2x16xf32>
    %48 = vector.multi_reduction <maximumf>, %47, %cst_24 [2] : vector<2x16x16xf32> to vector<2x16xf32>
    %49 = vector.shape_cast %48 : vector<2x16xf32> to vector<2x16x1xf32>
    %50 = vector.broadcast %49 : vector<2x16x1xf32> to vector<2x16x16xf32>
    %51 = arith.subf %47, %50 : vector<2x16x16xf32>
    %52 = math.exp %51 : vector<2x16x16xf32>
    %cst_25 = arith.constant dense<0.000000e+00> : vector<2x16xf32>
    %53 = vector.multi_reduction <add>, %52, %cst_25 [2] : vector<2x16x16xf32> to vector<2x16xf32>
    %54 = vector.shape_cast %53 : vector<2x16xf32> to vector<2x16x1xf32>
    %55 = tpu.reciprocal %54 {approx = true} : vector<2x16x1xf32> -> vector<2x16x1xf32>
    %56 = vector.broadcast %55 : vector<2x16x1xf32> to vector<2x16x16xf32>
    %57 = arith.mulf %52, %56 : vector<2x16x16xf32>
    %58 = arith.truncf %57 : vector<2x16x16xf32> to vector<2x16x16xbf16>
    "tpu.trace_start"() <{level = 10 : i32, message = "wnm,wmd->wnd"}> : () -> ()
    %cst_26 = arith.constant dense<0.000000e+00> : vector<2x16x16xf32>
    %59 = tpu.matmul %58, %40, %cst_26 {dimension_numbers = #tpu.dot_dimension_numbers<[2], [1], [1], [2], [0, 0, 0, 1, 1, 2], [0], [0]>} : vector<2x16x16xbf16>, vector<2x16x16xbf16>, vector<2x16x16xf32> -> vector<2x16x16xf32>
    "tpu.trace_stop"() : () -> ()
    %60 = vector.shape_cast %59 : vector<2x16x16xf32> to vector<32x16xf32>
    %c0_27 = arith.constant 0 : index
    %c0_28 = arith.constant 0 : index
    %61 = vector.load %arg12[%c0_27, %c0_28] : memref<32x32xf32, #tpu.memory_space<vmem>>, vector<32x16xf32>
    tpu.vector_store %arg12[%c0_27, %c0_28], %60 {strides = array<i32>} : memref<32x32xf32, #tpu.memory_space<vmem>>, vector<32x16xf32>,
    %c0_29 = arith.constant 0 : index
    %c16 = arith.constant 16 : index
    %62 = vector.load %arg11[%c0_29, %c16] : memref<32x96xf32, #tpu.memory_space<vmem>>, vector<32x16xf32>
    %c0_30 = arith.constant 0 : index
    %c48 = arith.constant 48 : index
    %63 = vector.load %arg11[%c0_30, %c48] : memref<32x96xf32, #tpu.memory_space<vmem>>, vector<32x16xf32>
    %c0_31 = arith.constant 0 : index
    %c80 = arith.constant 80 : index
    %64 = vector.load %arg11[%c0_31, %c80] : memref<32x96xf32, #tpu.memory_space<vmem>>, vector<32x16xf32>
    %65 = arith.mulf %62, %62 : vector<32x16xf32>
    %cst_32 = arith.constant dense<0.000000e+00> : vector<32xf32>
    %66 = vector.multi_reduction <add>, %65, %cst_32 [1] : vector<32x16xf32> to vector<32xf32>
    %67 = vector.shape_cast %66 : vector<32xf32> to vector<32x1xf32>
    %cst_33 = arith.constant 1.000000e-24 : f32
    %68 = vector.broadcast %cst_33 : f32 to vector<32x1xf32>
    %69 = arith.maximumf %67, %68 : vector<32x1xf32>
    %70 = math.rsqrt %69 : vector<32x1xf32>
    %71 = vector.broadcast %70 : vector<32x1xf32> to vector<32x16xf32>
    %72 = arith.mulf %62, %71 : vector<32x16xf32>
    %73 = arith.mulf %63, %63 : vector<32x16xf32>
    %cst_34 = arith.constant dense<0.000000e+00> : vector<32xf32>
    %74 = vector.multi_reduction <add>, %73, %cst_34 [1] : vector<32x16xf32> to vector<32xf32>
    %75 = vector.shape_cast %74 : vector<32xf32> to vector<32x1xf32>
    %cst_35 = arith.constant 1.000000e-24 : f32
    %76 = vector.broadcast %cst_35 : f32 to vector<32x1xf32>
    %77 = arith.maximumf %75, %76 : vector<32x1xf32>
    %78 = math.rsqrt %77 : vector<32x1xf32>
    %79 = vector.broadcast %78 : vector<32x1xf32> to vector<32x16xf32>
    %80 = arith.mulf %63, %79 : vector<32x16xf32>
    %c1 = arith.constant 1 : index
    %81 = memref.load %arg7[%c1] : memref<2xf32, #tpu.memory_space<smem>>
    %82 = vector.broadcast %81 : f32 to vector<32x16xf32>
    %83 = arith.mulf %72, %82 : vector<32x16xf32>
    %84 = vector.shape_cast %83 : vector<32x16xf32> to vector<2x16x16xf32>
    %85 = arith.truncf %84 : vector<2x16x16xf32> to vector<2x16x16xbf16>
    %86 = vector.shape_cast %80 : vector<32x16xf32> to vector<2x16x16xf32>
    %87 = arith.truncf %86 : vector<2x16x16xf32> to vector<2x16x16xbf16>
    %88 = vector.shape_cast %64 : vector<32x16xf32> to vector<2x16x16xf32>
    %89 = arith.truncf %88 : vector<2x16x16xf32> to vector<2x16x16xbf16>
    "tpu.trace_start"() <{level = 10 : i32, message = "wnd,wmd->wnm"}> : () -> ()
    %cst_36 = arith.constant dense<0.000000e+00> : vector<2x16x16xf32>
    %90 = tpu.matmul %85, %87, %cst_36 {dimension_numbers = #tpu.dot_dimension_numbers<[2], [2], [1], [1], [0, 0, 0, 1, 1, 1], [0], [0]>} : vector<2x16x16xbf16>, vector<2x16x16xbf16>, vector<2x16x16xf32> -> vector<2x16x16xf32>
    "tpu.trace_stop"() : () -> ()
    %c1_37 = arith.constant 1 : index
    %c0_38 = arith.constant 0 : index
    %c0_39 = arith.constant 0 : index
    %91 = vector.load %arg8[%c1_37, %c0_38, %c0_39] : memref<2x16x16xf32, #tpu.memory_space<vmem>>, vector<1x16x16xf32>
    %92 = vector.shape_cast %91 : vector<1x16x16xf32> to vector<16x16xf32>
    %93 = vector.shape_cast %92 : vector<16x16xf32> to vector<1x16x16xf32>
    %94 = vector.broadcast %93 : vector<1x16x16xf32> to vector<2x16x16xf32>
    %95 = arith.addf %90, %94 : vector<2x16x16xf32>
    %96 = arith.addf %95, %12 : vector<2x16x16xf32>
    %cst_40 = arith.constant dense<0xFF800000> : vector<2x16xf32>
    %97 = vector.multi_reduction <maximumf>, %96, %cst_40 [2] : vector<2x16x16xf32> to vector<2x16xf32>
    %98 = vector.shape_cast %97 : vector<2x16xf32> to vector<2x16x1xf32>
    %99 = vector.broadcast %98 : vector<2x16x1xf32> to vector<2x16x16xf32>
    %100 = arith.subf %96, %99 : vector<2x16x16xf32>
    %101 = math.exp %100 : vector<2x16x16xf32>
    %cst_41 = arith.constant dense<0.000000e+00> : vector<2x16xf32>
    %102 = vector.multi_reduction <add>, %101, %cst_41 [2] : vector<2x16x16xf32> to vector<2x16xf32>
    %103 = vector.shape_cast %102 : vector<2x16xf32> to vector<2x16x1xf32>
    %104 = tpu.reciprocal %103 {approx = true} : vector<2x16x1xf32> -> vector<2x16x1xf32>
    %105 = vector.broadcast %104 : vector<2x16x1xf32> to vector<2x16x16xf32>
    %106 = arith.mulf %101, %105 : vector<2x16x16xf32>
    %107 = arith.truncf %106 : vector<2x16x16xf32> to vector<2x16x16xbf16>
    "tpu.trace_start"() <{level = 10 : i32, message = "wnm,wmd->wnd"}> : () -> ()
    %cst_42 = arith.constant dense<0.000000e+00> : vector<2x16x16xf32>
    %108 = tpu.matmul %107, %89, %cst_42 {dimension_numbers = #tpu.dot_dimension_numbers<[2], [1], [1], [2], [0, 0, 0, 1, 1, 2], [0], [0]>} : vector<2x16x16xbf16>, vector<2x16x16xbf16>, vector<2x16x16xf32> -> vector<2x16x16xf32>
    "tpu.trace_stop"() : () -> ()
    %109 = vector.shape_cast %108 : vector<2x16x16xf32> to vector<32x16xf32>
    %c0_43 = arith.constant 0 : index
    %c16_44 = arith.constant 16 : index
    %110 = vector.load %arg12[%c0_43, %c16_44] : memref<32x32xf32, #tpu.memory_space<vmem>>, vector<32x16xf32>
    tpu.vector_store %arg12[%c0_43, %c16_44], %109 {strides = array<i32>} : memref<32x32xf32, #tpu.memory_space<vmem>>, vector<32x16xf32>,
    %c0_45 = arith.constant 0 : index
    %c0_46 = arith.constant 0 : index
    %111 = vector.load %arg12[%c0_45, %c0_46] : memref<32x32xf32, #tpu.memory_space<vmem>>, vector<32x32xf32>
    %112 = arith.truncf %111 : vector<32x32xf32> to vector<32x32xbf16>
    %c0_47 = arith.constant 0 : index
    %c0_48 = arith.constant 0 : index
    %113 = vector.load %arg5[%c0_47, %c0_48] : memref<32x32xbf16, #tpu.memory_space<vmem>>, vector<32x32xbf16>
    %cst_49 = arith.constant dense<0.000000e+00> : vector<32x32xf32>
    %114 = tpu.matmul %112, %113, %cst_49 {dimension_numbers = #tpu.dot_dimension_numbers<[1], [0], [0], [1], [0, 0, 1, 1], [], []>} : vector<32x32xbf16>, vector<32x32xbf16>, vector<32x32xf32> -> vector<32x32xf32>
    %c0_50 = arith.constant 0 : index
    %c0_51 = arith.constant 0 : index
    %115 = vector.load %arg6[%c0_50, %c0_51] : memref<1x32xf32, #tpu.memory_space<vmem>>, vector<1x32xf32>
    %116 = vector.broadcast %115 : vector<1x32xf32> to vector<32x32xf32>
    %117 = arith.addf %114, %116 : vector<32x32xf32>
    %118 = vector.shape_cast %117 : vector<32x32xf32> to vector<2x16x32xf32>
    %c0_52 = arith.constant 0 : index
    %c0_53 = arith.constant 0 : index
    %c0_54 = arith.constant 0 : index
    %c0_55 = arith.constant 0 : index
    %119 = vector.load %arg10[%c0_52, %c0_53, %c0_54, %c0_55] : memref<1x2x16x32xf32, #tpu.memory_space<vmem>>, vector<1x2x16x32xf32>
    %120 = vector.shape_cast %119 : vector<1x2x16x32xf32> to vector<2x16x32xf32>
    %121 = vector.shape_cast %118 : vector<2x16x32xf32> to vector<1x2x16x32xf32>
    tpu.vector_store %arg10[%c0_52, %c0_53, %c0_54, %c0_55], %121 {strides = array<i32>} : memref<1x2x16x32xf32, #tpu.memory_space<vmem>>, vector<1x2x16x32xf32>,
    return
  }
  func.func @transform_0(%arg0: i32, %arg1: i32) -> (i32, i32, i32, i32) {
    %c0_i32 = arith.constant 0 : i32
    %c0_i32_0 = arith.constant 0 : i32
    %c0_i32_1 = arith.constant 0 : i32
    return %arg0, %arg1, %c0_i32, %c0_i32_0 : i32, i32, i32, i32
  }
  func.func @transform_1(%arg0: i32, %arg1: i32) -> (i32, i32) {
    %c0_i32 = arith.constant 0 : i32
    %c0_i32_0 = arith.constant 0 : i32
    %c0_i32_1 = arith.constant 0 : i32
    return %c0_i32, %c0_i32_0 : i32, i32
  }
  func.func @transform_2(%arg0: i32, %arg1: i32) -> (i32, i32) {
    %c0_i32 = arith.constant 0 : i32
    %c0_i32_0 = arith.constant 0 : i32
    %c0_i32_1 = arith.constant 0 : i32
    return %c0_i32, %c0_i32_0 : i32, i32
  }
  func.func @transform_3(%arg0: i32, %arg1: i32) -> (i32, i32) {
    %c0_i32 = arith.constant 0 : i32
    %c0_i32_0 = arith.constant 0 : i32
    %c0_i32_1 = arith.constant 0 : i32
    return %c0_i32, %c0_i32_0 : i32, i32
  }
  func.func @transform_4(%arg0: i32, %arg1: i32) -> (i32, i32) {
    %c0_i32 = arith.constant 0 : i32
    %c0_i32_0 = arith.constant 0 : i32
    %c0_i32_1 = arith.constant 0 : i32
    return %c0_i32, %c0_i32_0 : i32, i32
  }
  func.func @transform_5(%arg0: i32, %arg1: i32) -> i32 {
    %c0_i32 = arith.constant 0 : i32
    %c0_i32_0 = arith.constant 0 : i32
    return %c0_i32 : i32
  }
  func.func @transform_6(%arg0: i32, %arg1: i32) -> (i32, i32, i32) {
    %c0_i32 = arith.constant 0 : i32
    %c0_i32_0 = arith.constant 0 : i32
    %c0_i32_1 = arith.constant 0 : i32
    %c0_i32_2 = arith.constant 0 : i32
    return %c0_i32, %c0_i32_0, %c0_i32_1 : i32, i32, i32
  }
  func.func @transform_7(%arg0: i32, %arg1: i32) -> (i32, i32, i32) {
    %c0_i32 = arith.constant 0 : i32
    %c0_i32_0 = arith.constant 0 : i32
    %c0_i32_1 = arith.constant 0 : i32
    %c0_i32_2 = arith.constant 0 : i32
    return %c0_i32, %c0_i32_0, %c0_i32_1 : i32, i32, i32
  }
  func.func @transform_8(%arg0: i32, %arg1: i32) -> (i32, i32, i32, i32) {
    %c0_i32 = arith.constant 0 : i32
    %c0_i32_0 = arith.constant 0 : i32
    %c0_i32_1 = arith.constant 0 : i32
    return %arg0, %arg1, %c0_i32, %c0_i32_0 : i32, i32, i32, i32
  }
}

</mosaic_0001>

<bundles_post_ra>
// kernel: tpu_custom_call.1
= control target key start
LH: loop header
LB: loop body
LE: loop exit
PB: predicated region body
PF: predicated region fallthrough
CT: control target
= control target key end

     0   :  { %7 = vsyncpa [#allocation3], 0  ;;  %s635_s0 = inlined_call_operand.hbm [shape: f32[8,128], index: 0, kind: input, shape index: {}]   ;;  %s636_s1 = inlined_call_operand.hbm [shape: f32[16,128], index: 1, kind: input, shape index: {}]   ;;  %s637_s2 = inlined_call_operand.hbm [shape: f32[16,128], index: 2, kind: output, shape index: {}]  }
   0x1   :  { %8 = vsyncpa [#allocation6], 0 }
   0x2   :  { %10 = vsyncpa [#allocation6 + $0x1], 0 }
   0x3   :  { %11 = vsyncpa [#allocation4], 0 }
   0x4   :  { %13 = vsyncpa [#allocation4 + $0x1], 0  ;;  %s497_s9 = smov 0   ;;  %s499_s10 = smov 0  }
   0x5   :  { %s501_s11 = smov 0   ;;  %s503_s12 = smov 0  }
   0x6 LB: > { %s518_s13 = sadd.s32 4294967295, %s479_s12   ;;  %s278_s14 = sadd.s32 4294967294, %s479_s12   ;;  %s479_s12 = sphi %s503_s12, %s647_s12   ;;  %s475_s11 = sphi %s501_s11, %s646_s11   ;;  %s471_s10 = sphi %s499_s10, %s645_s10   ;;  %s467_s9 = sphi %s497_s9, %s644_s9  }
   0x7   : > { %p60_p0 = scmp.ne.s32.totalorder %s471_s10, %s467_s9  ;;  %p61_p1 = scmp.eq.s32.totalorder %s518_s13, 0 }
   0x8   : > { %p84_p2 = scmp.eq.s32.totalorder %s518_s13, 1  ;;  %p90_p3 = scmp.eq.s32.totalorder %s278_s14, 1 }
   0x9   : > { %p527_p4 = por %p61_p1, %p60_p0  ;;  %p279_p5 = scmp.ge.s32.totalorder %s479_s12, 1 }
   0xa   : > { %p532_p6 = por %p90_p3, %p60_p0  ;;  %p97_p7 = scmp.lt.s32.totalorder %s479_s12, 3 }
   0xb   : > { %s109_s19 = sshll.u32 %s635_s0, 4  ;;  %s481_s21 = smov [#allocation2]   ;;  %s110_s19 = int_to_ptr.hbm [resolvable:$true] %s109_s19 }
   0xc   : > { %p540_p8 = pnand %p279_p5, %p97_p7  ;;  %s111_s22 = sshll.u32 %s481_s21, 4  ;;  %s112_s22 = int_to_ptr.vmem [resolvable:$true] %s111_s22 }
   0xd   : > { %s550_s23 = sadd.s32 1, %s479_s12   ;;  %s47_s24 = sadd.s32 1, %s475_s11 }
   0xe   : > { %p300_p10 = pneg %p540_p8  ;;  %s44_s25 = ssub.s32 %s479_s12, %s550_s23 }
   0xf   : > { %p45_p12 = scmp.eq.s32.totalorder %s44_s25, 0  ;;  %p54_p13 = scmp.ne.s32.totalorder %s475_s11, %s471_s10 }
  0x10   : > { %p301_p11 = pnand %p300_p10, %p61_p1  ;;  %p55_p0 = scmp.eq.s32.totalorder %s479_s12, 0 }
  0x11   : > { %s559_s26 = scalar_select %p45_p12, %s475_s11, %s47_s24  }
  0x12   : > { %303 = dma.hbm_to_vmem [thread:$0]  (!%p301_p11), %s110_s19, 128, %s112_s22, [#allocation3]  }
  0x13   : > { %p563_p3 = por %p84_p2, %p54_p13  ;;  %p313_p5 = scmp.lt.s32.totalorder %s479_s12, 2 }
  0x14   : > { %s122_s28 = sand.u32 1, %s475_s11   ;;  %s283_s29 = sshll.u32 %s479_s12, 3 }
  0x15   : > { %p56_p7 = por %p55_p0, %p54_p13  ;;  %s282_s30 = sshll.u32 %s122_s28, 3 }
  0x16   : > { %s130_s5 = scalar_lea.hbm %s636_s1, %s283_s29  ;;  %s126_s7 = scalar_lea.vmem [#allocation5], %s282_s30 }
  0x17   : > { %s132_s6 = sshll.u32 %s130_s5, 4  ;;  %s134_s8 = sshll.u32 %s126_s7, 4  ;;  %s133_s6 = int_to_ptr.hbm [resolvable:$true] %s132_s6  ;;  %s135_s8 = int_to_ptr.vmem [resolvable:$true] %s134_s8 }
  0x18   : > { %p573_p10 = pnand %p313_p5, %p56_p7  ;;  %s123_s17 = scalar_lea.sflag [#allocation6], %s122_s28 }
  0x19   : > { %s379_s18 = sshra.s32 %s133_s6, 4  ;;  %s386_s24 = scalar_lea.hbm %s636_s1, 16  ;;  %s380_s18 = int_to_ptr.hbm [resolvable:$true] %s379_s18 }
  0x1a   : > { %s381_s19 = scalar_lea.hbm %s380_s18, 8  ;;  %p383_p11 = pneg %p573_p10 }
  0x1b   : > { %p382_p2 = scmp.ne.s32.totalorder %s380_s18, %s381_s19  ;;  %p387_p0 = scmp.lt.s32.totalorder %s380_s18, %s636_s1 }
  0x1c   : > { %p388_p5 = scmp.lt.s32.totalorder %s386_s24, %s381_s19 }
  0x1d   : > { %p384_p12 = pnand %p383_p11, %p382_p2 }
  0x1e   : > { %p389_p7 = por %p388_p5, %p387_p0 }
  0x1f   : > { %p385_p13 = pneg %p384_p12 }
  0x21   : > { %p390_p9 = pnand %p389_p7, %p385_p13 }
  0x23   : > { %393 = shalt.err (!%p390_p9)
}
  0x24   : > { %307 = dma.hbm_to_vmem [thread:$0]  (!%p573_p10), %s133_s6, 128, %s135_s8, %s123_s17  }
  0x25   : > { %143 = sbr.rel (%p540_p8) target bundleno = 62 (0x3e), region = 28 }
  0x2a   : > { %454 = dma.done.wait (%p61_p1), [#allocation3], 128  }
  0x2b   : > { %456 = vsyncadd (%p61_p1), [#allocation3], 4294967168  ;;  %s594_s28 = sand.u32 1, %s471_s10  }
  0x2c   : > { %s286_s30 = sshll.u32 %s594_s28, 3  ;;  %s151_s3 = scalar_lea.sflag [#allocation6], %s594_s28 }
  0x2d   : > { %s154_s4 = scalar_lea.vmem [#allocation5], %s286_s30 }
  0x2e   : > { %458 = dma.done.wait (%p527_p4), %s151_s3, 128  }
  0x2f   : > { %460 = vsyncadd (%p527_p4), %s151_s3, 4294967168  ;;  %s289_s20 = sshll.u32 %s518_s13, 3  ;;  %s175_s8 = scalar_lea.vmem [#allocation7], %s286_s30  ;;  %v176_v0 = vld [vmem:[%s154_s4] sm:$0xff]  ;;  %v177_v1 = vld [vmem:[#allocation2] sm:$0xff] }
  0x30   : > { %s191_s7 = scalar_lea.hbm %s637_s2, %s289_s20  ;;  %s193_s14 = sshll.u32 %s175_s8, 4  ;;  %v178_v2 = vadd.f32 %v177_v1, %v176_v0  ;;  %s194_s14 = int_to_ptr.vmem [resolvable:$true] %s193_s14 }
  0x31   : > { %s195_s17 = sshll.u32 %s191_s7, 4  ;;  %s181_s18 = scalar_lea.sflag [#allocation4], %s594_s28  ;;  %s196_s17 = int_to_ptr.hbm [resolvable:$true] %s195_s17 }
  0x32   : > { %179 = vst [vmem:[%s175_s8] sm:$0xff] %v178_v2  ;;  %s423_s15 = sshra.s32 %s196_s17, 4  ;;  %s429_s22 = scalar_lea.hbm %s637_s2, 16  ;;  %s424_s15 = int_to_ptr.hbm [resolvable:$true] %s423_s15 }
  0x33   : > { %s425_s19 = scalar_lea.hbm %s424_s15, 8  ;;  %p430_p9 = scmp.lt.s32.totalorder %s424_s15, %s637_s2 }
  0x34   : > { %p426_p1 = scmp.ne.s32.totalorder %s424_s15, %s425_s19  ;;  %p431_p10 = scmp.lt.s32.totalorder %s429_s22, %s425_s19 }
  0x36   : > { %p427_p4 = pnand %p426_p1, %p563_p3  ;;  %p432_p2 = por %p431_p10, %p430_p9 }
  0x38   : > { %p428_p8 = pneg %p427_p4 }
  0x3a   : > { %p433_p11 = pnand %p432_p2, %p428_p8 }
  0x3c   : > { %436 = shalt.err (!%p433_p11)
}
  0x3d   : > { %298 = dma.vmem_to_hbm [thread:$0]  (%p563_p3), %s194_s14, 128, %s196_s17, %s181_s18  }
  0x3e PF: > { %s207_s29 = sand.u32 1, %s467_s9   ;;  %p643_p12 = scmp.ge.s32.totalorder %s479_s12, 2 }
  0x3f   : > { %s208_s28 = scalar_lea.sflag [#allocation4], %s207_s29 }
  0x40   : > { %p309_p13 = pnand %p643_p12, %p532_p6 }
  0x42   : > { %p310_p0 = pneg %p309_p13 }
  0x44   : > { %462 = dma.done.wait (%p310_p0), %s208_s28, 128  }
  0x45   : > { %464 = vsyncadd (%p310_p0), %s208_s28, 4294967168  ;;  %p16_p5 = scmp.ge.s32.totalorder %s550_s23, 4   ;;  %s644_s9 = smov %s471_s10 }
  0x46   : > { %s645_s10 = smov %s475_s11  ;;  %s646_s11 = smov %s559_s26 }
  0x47   : > { %s647_s12 = smov %s550_s23  ;;  %18 = sbr.rel (!%p16_p5) target bundleno = 6 (0x6), region = 78 }
  0x4c   :  { %214 = vsyncpa [#allocation3], 1 }
  0x4d   :  { %216 = vsyncpa [#allocation3 + $0x1], 1 }
  0x4e   :  { %217 = vsyncpa [#allocation6], 1 }
  0x4f   :  { %219 = vsyncpa [#allocation6 + $0x1], 1 }
  0x50   :  { %220 = vsyncpa [#allocation4], 1 }
  0x51   :  { %222 = vsyncpa [#allocation4 + $0x1], 1 }

// kernel: basic_layer_forward.4
= control target key start
LH: loop header
LB: loop body
LE: loop exit
PB: predicated region body
PF: predicated region fallthrough
CT: control target
= control target key end

     0   :  { %12 = vsyncpa [#allocation5], 0  ;;  %s1575_s24 = smov 0   ;;  %s1577_s25 = smov 0   ;;  %s1891_s0 = inlined_call_operand.vmem [shape: bf16[2,4,16,32], index: 0, kind: input, shape index: {}]   ;;  %s1892_s1 = inlined_call_operand.vmem [shape: bf16[32,96], index: 1, kind: input, shape index: {}]   ;;  %s1893_s2 = inlined_call_operand.vmem [shape: f32[1,96], index: 2, kind: input, shape index: {}]   ;;  %s1894_s3 = inlined_call_operand.vmem [shape: bf16[32,32], index: 3, kind: input, shape index: {}]   ;;  %s1895_s4 = inlined_call_operand.vmem [shape: f32[1,32], index: 4, kind: input, shape index: {}]   ;;  %s1896_s5 = inlined_call_operand.vmem [shape: f32[2], index: 5, kind: input, shape index: {}]   ;;  %s1897_s6 = inlined_call_operand.vmem [shape: f32[2,16,16], index: 6, kind: input, shape index: {}]   ;;  %s1898_s7 = inlined_call_operand.vmem [shape: f32[2,4,16,32], index: 7, kind: output, shape index: {}]  }
   0x1   :  { %s1579_s26 = smov 0   ;;  %s1581_s27 = smov 0  }
   0x2   :  { %s1583_s28 = smov 0  }
   0x3 LB: > { %s1284_s29 = sadd.s32 4294967295, %s1526_s28   ;;  %s27_s30 = sadd.s32 1, %s1518_s26  ;;  %s1526_s28 = sphi %s1583_s28, %s18_s28   ;;  %s1522_s27 = sphi %s1581_s27, %s1904_s27   ;;  %s1518_s26 = sphi %s1579_s26, %s1903_s26   ;;  %s1514_s25 = sphi %s1577_s25, %s1902_s25   ;;  %s1510_s24 = sphi %s1575_s24, %s1901_s24  }
   0x4   : > { %p28_p0 = scmp.ge.s32.totalorder %s27_s30, 2  ;;  %s30_s8 = sadd.s32 1, %s1522_s27 }
   0x5   : > { %p1286_p1 = scmp.ge.s32.totalorder %s1526_s28, 1  ;;  %p217_p2 = scmp.lt.s32.totalorder %s1526_s28, 5 }
   0x6   : > { %s1906_s30 = smov (%p28_p0, %s27_s30), 0  ;;  %s1908_s8 = smov (!%p28_p0, %s30_s8), %s1522_s27 }
   0x7   : > { %p218_p3 = pnand %p1286_p1, %p217_p2  ;;  %p32_p4 = scmp.ge.s32.totalorder %s1908_s8, 2 }
   0x8   : > { %p1354_p5 = scmp.eq.s32.totalorder %s1284_s29, 0  ;;  %s241_s11 = sshll.u32 %s1896_s5, 4  ;;  %s242_s11 = int_to_ptr.vmem [resolvable:$true] %s241_s11 }
   0x9   : > { %p1350_p6 = pneg %p218_p3  ;;  %s1910_s8 = smov (%p32_p4, %s1908_s8), 0 }
   0xa   : > { %s1528_s12 = smov [#allocation4]   ;;  %271 = sbr.rel (%p218_p3) target bundleno = 1500 (0x5dc), region = 48 }
   0xb   : > { %p1351_p7 = pnand %p1354_p5, %p1350_p6 }
   0xd   : > { %1353 = dma.vmem_to_smem (!%p1351_p7), %s242_s11, 16, %s1528_s12, [#allocation5]  }
   0xf   : > { %1505 = dma.done.wait (%p1354_p5), [#allocation5], 16  }
  0x10   : > { %1507 = vsyncadd (%p1354_p5), [#allocation5], 4294967280 }
  0x11   : > { %278 = sfence }
  0x12   : > { %v1343_v0 = vld [vmem:[%s1892_s1 + $0x8] sm:$0xff]  ;;  %s1291_s15 = sshll.u32 %s1510_s24, 1  ;;  %p316_p8 = scmp.lt.s32.totalorder %s1514_s25, 1  ;;  %v1342_v1 = vld [vmem:[%s1892_s1] sm:$0xff]  ;;  %vm372_vm0 = vcmask 261120   ;;  %vm398_vm1 = vcmask 785408  }
  0x13   : > { %p318_p9 = scmp.lt.s32.totalorder %s1291_s15, 3  ;;  %385 = vmatpush.bf16.msra.mxu0 %v1343_v0  ;;  %v1403_v4 = vld [vmem:[%s1893_s2] ss:$0 sm:$0xff]  ;;  %s1530_s10 = smov 96   ;;  %vm411_vm2 = vcmask 130048  }
  0x14   : > { %s1912_s25 = smov (!%p316_p8, %s1514_s25), 1  ;;  %s1531_s11 = smov 112  }
  0x15   : > { %s1914_s15 = smov (!%p318_p9, %s1291_s15), 3  ;;  %s1293_s18 = sshll.u32 %s1912_s25, 3 }
  0x16   : > { %s1292_s19 = sshll.u32 %s1914_s15, 1  ;;  %s1529_s25 = smov 80  }
  0x17   : > { %386 = vmatpush.bf16.msra.mxu0 %v1342_v1  ;;  %s1622_s20 = sadd.s32 %s1293_s18, %s1292_s19  ;;  %s1321_s12 = sld [smem:[#allocation4 + $0x1]] }
  0x18   : > { %s1294_s21 = sshll.u32 %s1622_s20, 2  ;;  %s548_s13 = sld [smem:[#allocation4]] }
  0x19   : > { %s324_s24 = scalar_lea.vmem %s1891_s0, %s1294_s21  ;;  %s1532_s23 = smov 64  }
  0x1a   : > { %v1340_v2 = vld [vmem:[%s324_s24] sm:$0xff]  ;;  %v1341_v3 = vld [vmem:[%s324_s24 + $0x8] sm:$0xff]  ;;  %s1533_s24 = smov 48   ;;  %s1534_s29 = smov 16  }
  0x1b   : > { %1315 = vmatmul.msk.bf16.vlgmr.msra.gmra.mxu0 %vm372_vm0, %v1340_v2 }
  0x2b   : > { %1316 = vmatmul.msk.bf16.gmra.mxu0 %vm372_vm0, %v1341_v3 }
  0x98   : > { %v388_v5 = vpop.f32.mrf.mxu0 }
  0x99   : > { %v389_v6 = vadd.f32 %v1403_v4, %v388_v5 }
  0x9b   : > { %399 = vst.msk [vmem:[#allocation2] sm:$0xff] %vm398_vm1, %v389_v6 }
  0xa0   : > { %v390_v7 = vpop.f32.mrf.mxu0 }
  0xa1   : > { %v391_v8 = vadd.f32 %v1403_v4, %v390_v7 }
  0xa2   : > { %v1634_v9 = vld [vmem:[#allocation2] sm:$0xff] }
  0xa3   : > { %400 = vst.msk [vmem:[#allocation2 + $0x8] sm:$0xff] %vm398_vm1, %v391_v8  ;;  %v748_v10 = vmul.f32 %v1634_v9, %v1634_v9 }
  0xa5   : > { %828 = vrot.lane.b32.xlu2 %v748_v10, %s1529_s25  ;;  %476 = vrot.lane.b32.xlu0 %v748_v10, %s1530_s10  ;;  %v412_v35 = vsel %vm411_vm2, %v748_v10, 0.0 }
  0xa8   : > { %v393_v11 = vpop.f32.mrf.mxu0 }
  0xa9   : > { %v394_v12 = vadd.f32 %v1403_v4, %v393_v11 }
  0xaa   : > { %v1641_v13 = vld [vmem:[#allocation2 + $0x8] sm:$0xff] }
  0xab   : > { %401 = vst.msk [vmem:[#allocation2 + $0x10] sm:$0xff] %vm398_vm1, %v394_v12  ;;  %v408_v14 = vmul.f32 %v1641_v13, %v1641_v13 }
  0xad   : > { %756 = vrot.lane.b32.xlu2 %v748_v10, %s1531_s11  ;;  %478 = vrot.lane.b32.xlu0 %v408_v14, %s1530_s10  ;;  %v415_v36 = vsel %vm411_vm2, %v408_v14, 0.0 }
  0xb0   : > { %v395_v15 = vpop.f32.mrf.mxu0 }
  0xb1   : > { %v396_v16 = vadd.f32 %v1403_v4, %v395_v15 }
  0xb2   : > { %v1648_v17 = vld [vmem:[#allocation2 + $0x10] sm:$0xff] }
  0xb3   : > { %402 = vst.msk [vmem:[#allocation2 + $0x18] sm:$0xff] %vm398_vm1, %v396_v16  ;;  %v409_v18 = vmul.f32 %v1648_v17, %v1648_v17 }
  0xb5   : > { %480 = vrot.lane.b32.xlu1 %v409_v18, %s1530_s10  ;;  %830 = vrot.lane.b32.xlu2 %v408_v14, %s1529_s25  ;;  %v418_v40 = vsel %vm411_vm2, %v409_v18, 0.0 }
  0xba   : > { %v1655_v19 = vld [vmem:[#allocation2 + $0x18] sm:$0xff] }
  0xbb   : > { %v1659_v20 = vmul.f32 %v1655_v19, %v1655_v19 }
  0xbd   : > { %482 = vrot.lane.b32.xlu1 %v1659_v20, %s1530_s10  ;;  %758 = vrot.lane.b32.xlu2 %v408_v14, %s1531_s11 }
  0xc5   : > { %832 = vrot.lane.b32.xlu2 %v409_v18, %s1529_s25 }
  0xcd   : > { %834 = vrot.lane.b32.xlu2 %v1659_v20, %s1529_s25 }
  0xff   : > { %v829_v21 = vpop.permute.xlu2 %828 }
 0x100   : > { %v840_v39 = vsel %vm411_vm2, %v829_v21, 0.0 }
 0x107   : > { %v757_v26 = vpop.permute.xlu2 %756 }
 0x108   : > { %v768_v31 = vsel %vm411_vm2, %v757_v26, 0.0 }
 0x10f   : > { %v831_v29 = vpop.permute.xlu2 %830 }
 0x110   : > { %v843_v41 = vsel %vm411_vm2, %v831_v29, 0.0 }
 0x117   : > { %v477_v22 = vpop.permute.xlu0 %476  ;;  %v759_v33 = vpop.permute.xlu2 %758 }
 0x118   : > { %v488_v23 = vsel %vm411_vm2, %v477_v22, 0.0  ;;  %v771_v34 = vsel %vm411_vm2, %v759_v33, 0.0  ;;  %v421_v22 = vsel %vm411_vm2, %v1659_v20, 0.0 }
 0x119   : > { %489 = vadd.xlane.f32.xlu0 %v488_v23 }
 0x11f   : > { %v479_v24 = vpop.permute.xlu0 %478  ;;  %v833_v37 = vpop.permute.xlu2 %832 }
 0x120   : > { %v491_v25 = vsel %vm411_vm2, %v479_v24, 0.0  ;;  %v846_v38 = vsel %vm411_vm2, %v833_v37, 0.0 }
 0x121   : > { %492 = vadd.xlane.f32.xlu1 %v491_v25 }
 0x127   : > { %v481_v27 = vpop.permute.xlu1 %480  ;;  %v835_v42 = vpop.permute.xlu2 %834 }
 0x128   : > { %v494_v28 = vsel %vm411_vm2, %v481_v27, 0.0  ;;  %v849_v43 = vsel %vm411_vm2, %v835_v42, 0.0 }
 0x129   : > { %495 = vadd.xlane.f32.xlu2 %v494_v28 }
 0x12f   : > { %v483_v30 = vpop.permute.xlu1 %482 }
 0x130   : > { %v497_v32 = vsel %vm411_vm2, %v483_v30, 0.0 }
 0x131   : > { %769 = vadd.xlane.f32.xlu2 %v768_v31  ;;  %498 = vadd.xlane.f32.xlu0 %v497_v32 }
 0x139   : > { %772 = vadd.xlane.f32.xlu2 %v771_v34 }
 0x13a   : > { %760 = vrot.lane.b32.xlu1 %v409_v18, %s1531_s11 }
 0x141   : > { %413 = vadd.xlane.f32.xlu2 %v412_v35 }
 0x145   : > { %762 = vrot.lane.b32.xlu0 %v1659_v20, %s1531_s11 }
 0x149   : > { %416 = vadd.xlane.f32.xlu2 %v415_v36 }
 0x151   : > { %847 = vadd.xlane.f32.xlu2 %v846_v38 }
 0x164   : > { %841 = vadd.xlane.f32.xlu1 %v840_v39 }
 0x16c   : > { %419 = vadd.xlane.f32.xlu1 %v418_v40 }
 0x16f   : > { %844 = vadd.xlane.f32.xlu0 %v843_v41 }
 0x174   : > { %850 = vadd.xlane.f32.xlu1 %v849_v43 }
 0x18c   : > { %v490_v44 = vpop.xlane.xlu0 %489 }
 0x18d   : > { %v1685_v49 = vmax.f32 %v490_v44, 1e-24 }
 0x18f   : > { %vm510_vm12 = vweird.f32 %v1685_v49 }
 0x194   : > { %v493_v45 = vpop.xlane.xlu1 %492 }
 0x195   : > { %v1683_v48 = vmax.f32 %v493_v45, 1e-24 }
 0x197   : > { %vm520_vm11 = vweird.f32 %v1683_v48 }
 0x19c   : > { %v496_v46 = vpop.xlane.xlu2 %495 }
 0x19d   : > { %v502_v47 = vmax.f32 %v496_v46, 1e-24 }
 0x19f   : > { %1405 = vrsqrt.f32 %v502_v47  ;;  %vm530_vm4 = vweird.f32 %v502_v47 }
 0x1a0   : > { %1407 = vrsqrt.f32 %v1683_v48 }
 0x1a1   : > { %1409 = vrsqrt.f32 %v1685_v49 }
 0x1a4   : > { %v770_v50 = vpop.xlane.xlu2 %769  ;;  %v499_v51 = vpop.xlane.xlu0 %498 }
 0x1a5   : > { %v1406_v52 = vpop.eup %1405  ;;  %v1689_v53 = vmax.f32 %v770_v50, 1e-24  ;;  %v503_v54 = vmax.f32 %v499_v51, 1e-24 }
 0x1a6   : > { %v525_v55 = vmul.f32 %v1406_v52, %v502_v47  ;;  %v1691_v57 = vpop.eup %1407  ;;  %vm531_vm3 = vweird.f32 %v1406_v52 }
 0x1a7   : > { %1411 = vrsqrt.f32 %v503_v54  ;;  %v1694_v58 = vpop.eup %1409  ;;  %v515_v60 = vmul.f32 %v1691_v57, %v1683_v48  ;;  %vm532_vm5 = vmor %vm530_vm4, %vm531_vm3  ;;  %vm540_vm7 = vweird.f32 %v503_v54  ;;  %vm521_vm9 = vweird.f32 %v1691_v57 }
 0x1a8   : > { %v526_v56 = vmul.f32 %v1406_v52, %v525_v55  ;;  %1413 = vrsqrt.f32 %v1689_v53  ;;  %v505_v0 = vmul.f32 %v1694_v58, %v1685_v49  ;;  %vm511_vm10 = vweird.f32 %v1694_v58  ;;  %vm522_vm13 = vmor %vm520_vm11, %vm521_vm9 }
 0x1a9   : > { %v516_v7 = vmul.f32 %v1691_v57, %v515_v60  ;;  %vm512_vm15 = vmor %vm510_vm12, %vm511_vm10 }
 0x1aa   : > { %v527_v59 = vmul.f32 0.5, %v526_v56  ;;  %v506_v8 = vmul.f32 %v1694_v58, %v505_v0 }
 0x1ab   : > { %v517_v15 = vmul.f32 0.5, %v516_v7 }
 0x1ac   : > { %v528_v61 = vsub.f32 1.5, %v527_v59  ;;  %v773_v62 = vpop.xlane.xlu2 %772  ;;  %v761_v63 = vpop.permute.xlu1 %760  ;;  %v507_v18 = vmul.f32 0.5, %v506_v8 }
 0x1ad   : > { %v1700_v1 = vmax.f32 %v773_v62, 1e-24  ;;  %v774_v2 = vsel %vm411_vm2, %v761_v63, 0.0  ;;  %v1412_v3 = vpop.eup %1411  ;;  %v518_v28 = vsub.f32 1.5, %v517_v15 }
 0x1ae   : > { %775 = vadd.xlane.f32.xlu0 %v774_v2  ;;  %v1703_v4 = vpop.eup %1413  ;;  %v529_v5 = vmul.f32 %v1406_v52, %v528_v61  ;;  %v535_v6 = vmul.f32 %v1412_v3, %v503_v54  ;;  %vm541_vm6 = vweird.f32 %v1412_v3  ;;  %v508_v31 = vsub.f32 1.5, %v507_v18 }
 0x1af   : > { %1415 = vrsqrt.f32 %v1700_v1  ;;  %v785_v11 = vmul.f32 %v1703_v4, %v1689_v53  ;;  %vm542_vm8 = vmor %vm540_vm7, %vm541_vm6  ;;  %v519_v36 = vmul.f32 %v1691_v57, %v518_v28  ;;  %vm791_vm1 = vweird.f32 %v1703_v4 }
 0x1b0   : > { %v536_v10 = vmul.f32 %v1412_v3, %v535_v6  ;;  %v533_v14 = vsel %vm532_vm5, %v1406_v52, %v529_v5  ;;  %v509_v39 = vmul.f32 %v1694_v58, %v508_v31  ;;  %vm800_vm3 = vweird.f32 %v1700_v1 }
 0x1b1   : > { %v786_v23 = vmul.f32 %v1703_v4, %v785_v11  ;;  %v546_v25 = vmul.f32 %v533_v14, %v1648_v17  ;;  %v523_v46 = vsel %vm522_vm13, %v1691_v57, %v519_v36  ;;  %vm790_vm5 = vweird.f32 %v1689_v53 }
 0x1b2   : > { %v537_v12 = vmul.f32 0.5, %v536_v10  ;;  %v513_v48 = vsel %vm512_vm15, %v1694_v58, %v509_v39  ;;  %v545_v49 = vmul.f32 %v523_v46, %v1641_v13  ;;  %vm792_vm6 = vmor %vm790_vm5, %vm791_vm1  ;;  %v1739_v58 = vstv %s1321_s12  ;;  %s1298_s12 = sshll.u32 %s1622_s20, 3 }
 0x1b3   : > { %v787_v33 = vmul.f32 0.5, %v786_v23  ;;  %v560_v35 = vpack.c.bf16 %v546_v25, %v546_v25  ;;  %v544_v51 = vmul.f32 %v1634_v9, %v513_v48  ;;  %s335_s17 = scalar_lea.vmem %s1898_s7, %s1298_s12 }
 0x1b4   : > { %v538_v21 = vsub.f32 1.5, %v537_v12  ;;  %v1723_v44 = vpop.xlane.xlu2 %413  ;;  %v559_v54 = vpack.c.bf16 %v545_v49, %v545_v49 }
 0x1b5   : > { %v1416_v16 = vpop.eup %1415  ;;  %v788_v40 = vsub.f32 1.5, %v787_v33  ;;  %v607_v41 = vunpack.c.l.b16 %v560_v35  ;;  %v558_v56 = vpack.c.bf16 %v544_v51, %v544_v51 }
 0x1b6   : > { %v795_v24 = vmul.f32 %v1416_v16, %v1700_v1  ;;  %422 = vadd.xlane.f32.xlu0 %v421_v22  ;;  %v539_v26 = vmul.f32 %v1412_v3, %v538_v21  ;;  %vm801_vm14 = vweird.f32 %v1416_v16  ;;  %v576_v60 = vunpack.c.l.b16 %v559_v54 }
 0x1b7   : > { %v763_v27 = vpop.permute.xlu0 %762  ;;  %v789_v47 = vmul.f32 %v1703_v4, %v788_v40  ;;  %vm802_vm4 = vmor %vm800_vm3, %vm801_vm14  ;;  %v575_v53 = vunpack.c.l.b16 %v558_v56 }
 0x1b8   : > { %v796_v29 = vmul.f32 %v1416_v16, %v795_v24  ;;  %v777_v30 = vsel %vm411_vm2, %v763_v27, 0.0  ;;  %v543_v32 = vsel %vm542_vm8, %v1412_v3, %v539_v26 }
 0x1b9   : > { %778 = vadd.xlane.f32.xlu2 %v777_v30  ;;  %v547_v34 = vmul.f32 %v543_v32, %v1655_v19  ;;  %v793_v52 = vsel %vm792_vm6, %v1703_v4, %v789_v47  ;;  %v577_v63 = vpack.c.b16 %v576_v60, %v575_v53 }
 0x1ba   : > { %v797_v20 = vmul.f32 0.5, %v796_v29  ;;  %v824_v57 = vmul.f32 %v793_v52, %v1634_v9 }
 0x1bb   : > { %v561_v38 = vpack.c.bf16 %v547_v34, %v547_v34 }
 0x1bc   : > { %v798_v37 = vsub.f32 1.5, %v797_v20  ;;  %v1737_v59 = vpop.xlane.xlu2 %416  ;;  %v902_v62 = vmul.f32 %v1739_v58, %v824_v57 }
 0x1bd   : > { %v608_v42 = vunpack.c.l.b16 %v561_v38 }
 0x1be   : > { %v799_v43 = vmul.f32 %v1416_v16, %v798_v37  ;;  %v906_v1 = vpack.c.bf16 %v902_v62, %v902_v62 }
 0x1bf   : > { %v609_v45 = vpack.c.b16 %v608_v42, %v607_v41 }
 0x1c0   : > { %v803_v50 = vsel %vm802_vm4, %v1416_v16, %v799_v43  ;;  %v923_v4 = vunpack.c.l.b16 %v906_v1 }
 0x1c1   : > { %610 = vrot.lane.b32.xlu1 %v609_v45, %s1530_s10  ;;  %v825_v55 = vmul.f32 %v803_v50, %v1641_v13 }
 0x1c3   : > { %v903_v61 = vmul.f32 %v1739_v58, %v825_v55 }
 0x1c4   : > { %v848_v3 = vpop.xlane.xlu2 %847 }
 0x1c5   : > { %v907_v0 = vpack.c.bf16 %v903_v61, %v903_v61  ;;  %v854_v5 = vmax.f32 %v848_v3, 1e-24 }
 0x1c7   : > { %v924_v2 = vunpack.c.l.b16 %v907_v0  ;;  %vm882_vm14 = vweird.f32 %v854_v5  ;;  %v424_v0 = vmax.f32 %v1723_v44, 1e-24 }
 0x1c9   : > { %v925_v7 = vpack.c.b16 %v924_v2, %v923_v4 }
 0x1d1   : > { %578 = vrot.lane.b32.xlu2 %v577_v63, %s1530_s10  ;;  %v425_v63 = vmax.f32 %v1737_v59, 1e-24 }
 0x1d7   : > { %v842_v6 = vpop.xlane.xlu1 %841 }
 0x1d8   : > { %v852_v8 = vmax.f32 %v842_v6, 1e-24 }
 0x1d9   : > { %926 = vrot.lane.b32.xlu2 %v925_v7, %s1531_s11 }
 0x1da   : > { %1417 = vrsqrt.f32 %v852_v8  ;;  %vm862_vm8 = vweird.f32 %v852_v8 }
 0x1db   : > { %1419 = vrsqrt.f32 %v854_v5 }
 0x1df   : > { %v1745_v10 = vpop.xlane.xlu1 %419 }
 0x1e0   : > { %v1418_v11 = vpop.eup %1417  ;;  %v1756_v6 = vmax.f32 %v1745_v10, 1e-24 }
 0x1e1   : > { %v1420_v12 = vpop.eup %1419  ;;  %v857_v14 = vmul.f32 %v1418_v11, %v852_v8  ;;  %vm863_vm7 = vweird.f32 %v1418_v11 }
 0x1e2   : > { %v845_v15 = vpop.xlane.xlu0 %844  ;;  %v877_v21 = vmul.f32 %v1420_v12, %v854_v5  ;;  %vm864_vm9 = vmor %vm862_vm8, %vm863_vm7  ;;  %vm883_vm11 = vweird.f32 %v1420_v12  ;;  %vm444_vm7 = vweird.f32 %v425_v63 }
 0x1e3   : > { %v858_v16 = vmul.f32 %v1418_v11, %v857_v14  ;;  %v853_v18 = vmax.f32 %v845_v15, 1e-24  ;;  %vm884_vm15 = vmor %vm882_vm14, %vm883_vm11 }
 0x1e4   : > { %v878_v24 = vmul.f32 %v1420_v12, %v877_v21 }
 0x1e5   : > { %v859_v22 = vmul.f32 0.5, %v858_v16  ;;  %1421 = vrsqrt.f32 %v853_v18  ;;  %vm872_vm12 = vweird.f32 %v853_v18 }
 0x1e6   : > { %v879_v28 = vmul.f32 0.5, %v878_v24 }
 0x1e7   : > { %v851_v23 = vpop.xlane.xlu1 %850  ;;  %v860_v25 = vsub.f32 1.5, %v859_v22 }
 0x1e8   : > { %v855_v26 = vmax.f32 %v851_v23, 1e-24  ;;  %v880_v33 = vsub.f32 1.5, %v879_v28 }
 0x1e9   : > { %v861_v29 = vmul.f32 %v1418_v11, %v860_v25 }
 0x1ea   : > { %1423 = vrsqrt.f32 %v855_v26  ;;  %v881_v39 = vmul.f32 %v1420_v12, %v880_v33  ;;  %vm892_vm3 = vweird.f32 %v855_v26 }
 0x1eb   : > { %v1422_v27 = vpop.eup %1421  ;;  %v865_v34 = vsel %vm864_vm9, %v1418_v11, %v861_v29  ;;  %1425 = vrsqrt.f32 %v425_v63  ;;  %vm434_vm9 = vweird.f32 %v424_v0 }
 0x1ec   : > { %v867_v30 = vmul.f32 %v1422_v27, %v853_v18  ;;  %vm873_vm10 = vweird.f32 %v1422_v27  ;;  %v896_v38 = vmul.f32 %v865_v34, %v1634_v9  ;;  %v885_v47 = vsel %vm884_vm15, %v1420_v12, %v881_v39 }
 0x1ed   : > { %vm874_vm13 = vmor %vm872_vm12, %vm873_vm10  ;;  %v898_v54 = vmul.f32 %v885_v47, %v1648_v17  ;;  %1427 = vrsqrt.f32 %v424_v0  ;;  %vm454_vm15 = vweird.f32 %v1756_v6 }
 0x1ee   : > { %v868_v31 = vmul.f32 %v1422_v27, %v867_v30  ;;  %v910_v46 = vpack.c.bf16 %v896_v38, %v896_v38  ;;  %1429 = vrsqrt.f32 %v1756_v6 }
 0x1ef   : > { %v912_v60 = vpack.c.bf16 %v898_v54, %v898_v54 }
 0x1f0   : > { %v1424_v32 = vpop.eup %1423  ;;  %v869_v20 = vmul.f32 0.5, %v868_v31  ;;  %v930_v50 = vunpack.c.l.b16 %v910_v46 }
 0x1f1   : > { %v887_v35 = vmul.f32 %v1424_v32, %v855_v26  ;;  %vm893_vm1 = vweird.f32 %v1424_v32  ;;  %v964_v53 = vunpack.c.l.b16 %v912_v60  ;;  %v1426_v1 = vpop.eup %1425 }
 0x1f2   : > { %v870_v36 = vsub.f32 1.5, %v869_v20  ;;  %vm894_vm4 = vmor %vm892_vm3, %vm893_vm1  ;;  %v439_v3 = vmul.f32 %v1426_v1, %v425_v63  ;;  %vm445_vm5 = vweird.f32 %v1426_v1  ;;  %v549_v20 = vstv %s548_s13 }
 0x1f3   : > { %v888_v37 = vmul.f32 %v1424_v32, %v887_v35  ;;  %v1428_v2 = vpop.eup %1427  ;;  %vm446_vm8 = vmor %vm444_vm7, %vm445_vm5 }
 0x1f4   : > { %v871_v40 = vmul.f32 %v1422_v27, %v870_v36  ;;  %v429_v4 = vmul.f32 %v1428_v2, %v424_v0  ;;  %v440_v5 = vmul.f32 %v1426_v1, %v439_v3  ;;  %v1759_v44 = vpop.eup %1429  ;;  %vm435_vm6 = vweird.f32 %v1428_v2 }
 0x1f5   : > { %v889_v41 = vmul.f32 0.5, %v888_v37  ;;  %v449_v10 = vmul.f32 %v1759_v44, %v1756_v6  ;;  %vm436_vm10 = vmor %vm434_vm9, %vm435_vm6  ;;  %vm455_vm12 = vweird.f32 %v1759_v44 }
 0x1f6   : > { %v875_v42 = vsel %vm874_vm13, %v1422_v27, %v871_v40  ;;  %v430_v7 = vmul.f32 %v1428_v2, %v429_v4  ;;  %v441_v8 = vmul.f32 0.5, %v440_v5  ;;  %vm456_vm1 = vmor %vm454_vm15, %vm455_vm12 }
 0x1f7   : > { %v890_v43 = vsub.f32 1.5, %v889_v41  ;;  %v897_v45 = vmul.f32 %v875_v42, %v1641_v13  ;;  %v450_v25 = vmul.f32 %v1759_v44, %v449_v10 }
 0x1f8   : > { %v431_v11 = vmul.f32 0.5, %v430_v7  ;;  %v442_v59 = vsub.f32 1.5, %v441_v8 }
 0x1f9   : > { %v891_v48 = vmul.f32 %v1424_v32, %v890_v43  ;;  %v911_v49 = vpack.c.bf16 %v897_v45, %v897_v45  ;;  %v451_v33 = vmul.f32 0.5, %v450_v25 }
 0x1fa   : > { %v432_v14 = vsub.f32 1.5, %v431_v11  ;;  %v443_v16 = vmul.f32 %v1426_v1, %v442_v59 }
 0x1fb   : > { %v931_v51 = vunpack.c.l.b16 %v911_v49  ;;  %v895_v52 = vsel %vm894_vm4, %v1424_v32, %v891_v48  ;;  %v452_v39 = vsub.f32 1.5, %v451_v33 }
 0x1fc   : > { %v899_v55 = vmul.f32 %v895_v52, %v1655_v19  ;;  %v433_v18 = vmul.f32 %v1428_v2, %v432_v14  ;;  %v447_v21 = vsel %vm446_vm8, %v1426_v1, %v443_v16 }
 0x1fd   : > { %v932_v56 = vpack.c.b16 %v931_v51, %v930_v50  ;;  %v469_v28 = vmul.f32 %v447_v21, %v1641_v13  ;;  %v453_v50 = vmul.f32 %v1759_v44, %v452_v39 }
 0x1fe   : > { %v913_v57 = vpack.c.bf16 %v899_v55, %v899_v55  ;;  %v437_v24 = vsel %vm436_vm10, %v1428_v2, %v433_v18 }
 0x1ff   : > { %933 = vrot.lane.b32.xlu0 %v932_v56, %s1529_s25  ;;  %v468_v32 = vmul.f32 %v1634_v9, %v437_v24  ;;  %v551_v35 = vmul.f32 %v549_v20, %v469_v28 }
 0x200   : > { %v965_v61 = vunpack.c.l.b16 %v913_v57 }
 0x201   : > { %v550_v37 = vmul.f32 %v549_v20, %v468_v32  ;;  %v555_v41 = vpack.c.bf16 %v551_v35, %v551_v35  ;;  %v566_v32 = vld [vmem:[%s1897_s6] sm:$0xff]  ;;  %v567_v35 = vld [vmem:[%s1897_s6 + $0x8] sm:$0xff] }
 0x202   : > { %v966_v62 = vpack.c.b16 %v965_v61, %v964_v53 }
 0x203   : > { %v554_v49 = vpack.c.bf16 %v550_v37, %v550_v37  ;;  %v571_v56 = vunpack.c.l.b16 %v555_v41 }
 0x205   : > { %v570_v53 = vunpack.c.l.b16 %v554_v49 }
 0x207   : > { %967 = vrot.lane.b32.xlu0 %v966_v62, %s1529_s25  ;;  %v457_v62 = vsel %vm456_vm1, %v1759_v44, %v453_v50  ;;  %v572_v1 = vpack.c.b16 %v571_v56, %v570_v53  ;;  %v1323_v50 = vld [vmem:[%s1897_s6 + $0x18] sm:$0xff] }
 0x208   : > { %v470_v4 = vmul.f32 %v457_v62, %v1648_v17 }
 0x20a   : > { %v552_v14 = vmul.f32 %v549_v20, %v470_v4 }
 0x20c   : > { %v556_v10 = vpack.c.bf16 %v552_v14, %v552_v14 }
 0x20e   : > { %v602_v25 = vunpack.c.l.b16 %v556_v10 }
 0x221   : > { %v776_v12 = vpop.xlane.xlu0 %775 }
 0x222   : > { %v782_v15 = vmax.f32 %v776_v12, 1e-24 }
 0x224   : > { %1431 = vrsqrt.f32 %v782_v15  ;;  %vm810_vm13 = vweird.f32 %v782_v15 }
 0x229   : > { %v423_v22 = vpop.xlane.xlu0 %422 }
 0x22a   : > { %v1432_v23 = vpop.eup %1431  ;;  %v427_v26 = vmax.f32 %v423_v22, 1e-24 }
 0x22b   : > { %v805_v27 = vmul.f32 %v1432_v23, %v782_v15  ;;  %vm811_vm11 = vweird.f32 %v1432_v23 }
 0x22c   : > { %1433 = vrsqrt.f32 %v427_v26  ;;  %v779_v29 = vpop.xlane.xlu2 %778  ;;  %vm1770_vm14 = vmor %vm810_vm13, %vm811_vm11  ;;  %vm464_vm4 = vweird.f32 %v427_v26 }
 0x22d   : > { %v806_v30 = vmul.f32 %v1432_v23, %v805_v27  ;;  %v783_v31 = vmax.f32 %v779_v29, 1e-24 }
 0x22f   : > { %v807_v34 = vmul.f32 0.5, %v806_v30  ;;  %1435 = vrsqrt.f32 %v783_v31  ;;  %vm820_vm7 = vweird.f32 %v783_v31 }
 0x231   : > { %v808_v36 = vsub.f32 1.5, %v807_v34 }
 0x232   : > { %v1434_v38 = vpop.eup %1433 }
 0x233   : > { %v459_v40 = vmul.f32 %v1434_v38, %v427_v26  ;;  %v809_v42 = vmul.f32 %v1432_v23, %v808_v36  ;;  %v611_v43 = vpop.permute.xlu1 %610  ;;  %vm465_vm3 = vweird.f32 %v1434_v38 }
 0x234   : > { %v579_v45 = vpop.permute.xlu2 %578  ;;  %v616_v52 = vsel %vm411_vm2, %v611_v43, 0  ;;  %vm466_vm5 = vmor %vm464_vm4, %vm465_vm3 }
 0x235   : > { %v1436_v46 = vpop.eup %1435  ;;  %v460_v47 = vmul.f32 %v1434_v38, %v459_v40  ;;  %v584_v48 = vsel %vm411_vm2, %v579_v45, 0  ;;  %v813_v57 = vsel %vm1770_vm14, %v1432_v23, %v809_v42 }
 0x236   : > { %v815_v51 = vmul.f32 %v1436_v46, %v783_v31  ;;  %593 = vmatpush.bf16.xpose.msra.mxu2 %v584_v48  ;;  %v826_v2 = vmul.f32 %v813_v57, %v1648_v17  ;;  %vm821_vm6 = vweird.f32 %v1436_v46 }
 0x237   : > { %v461_v55 = vmul.f32 0.5, %v460_v47  ;;  %vm822_vm8 = vmor %vm820_vm7, %vm821_vm6 }
 0x238   : > { %v816_v60 = vmul.f32 %v1436_v46, %v815_v51  ;;  %v904_v8 = vmul.f32 %v1739_v58, %v826_v2 }
 0x239   : > { %v462_v61 = vsub.f32 1.5, %v461_v55 }
 0x23a   : > { %v817_v63 = vmul.f32 0.5, %v816_v60  ;;  %v908_v44 = vpack.c.bf16 %v904_v8, %v904_v8 }
 0x23b   : > { %v463_v0 = vmul.f32 %v1434_v38, %v462_v61 }
 0x23c   : > { %v818_v3 = vsub.f32 1.5, %v817_v63  ;;  %v957_v21 = vunpack.c.l.b16 %v908_v44  ;;  %v927_v29 = vpop.permute.xlu2 %926  ;;  %v562_v44 = vpack.c.bf16 %v1634_v9, %v1634_v9 }
 0x23d   : > { %v467_v5 = vsel %vm466_vm5, %v1434_v38, %v463_v0  ;;  %1317 = vmatmul.msk.bf16.vlgmr.msra.gmra.mxu2 %vm411_vm2, %v572_v1 }
 0x23e   : > { %625 = vmatpush.bf16.xpose.msrb.mxu2 %v616_v52  ;;  %v471_v6 = vmul.f32 %v467_v5, %v1655_v19  ;;  %v819_v7 = vmul.f32 %v1436_v46, %v818_v3 }
 0x240   : > { %v823_v11 = vsel %vm822_vm8, %v1436_v46, %v819_v7  ;;  %v553_v59 = vmul.f32 %v549_v20, %v471_v6  ;;  %v1322_v46 = vld [vmem:[%s1897_s6 + $0x10] sm:$0xff] }
 0x241   : > { %v827_v12 = vmul.f32 %v823_v11, %v1655_v19 }
 0x242   : > { %v557_v16 = vpack.c.bf16 %v553_v59, %v553_v59 }
 0x243   : > { %v905_v15 = vmul.f32 %v1739_v58, %v827_v12 }
 0x244   : > { %v603_v23 = vunpack.c.l.b16 %v557_v16 }
 0x245   : > { %v909_v18 = vpack.c.bf16 %v905_v15, %v905_v15  ;;  %v563_v15 = vpack.c.bf16 %v1641_v13, %v1641_v13 }
 0x246   : > { %v604_v26 = vpack.c.b16 %v603_v23, %v602_v25 }
 0x247   : > { %v958_v22 = vunpack.c.l.b16 %v909_v18  ;;  %v688_v16 = vunpack.c.l.b16 %v563_v15  ;;  %v687_v18 = vunpack.c.l.b16 %v562_v44 }
 0x249   : > { %v959_v24 = vpack.c.b16 %v958_v22, %v957_v21  ;;  %v689_v10 = vpack.c.b16 %v688_v16, %v687_v18  ;;  %v565_v21 = vpack.c.bf16 %v1655_v19, %v1655_v19  ;;  %v564_v22 = vpack.c.bf16 %v1648_v17, %v1648_v17 }
 0x24b   : > { %960 = vrot.lane.b32.xlu1 %v959_v24, %s1531_s11  ;;  %v718_v23 = vunpack.c.l.b16 %v565_v21  ;;  %v717_v24 = vunpack.c.l.b16 %v564_v22 }
 0x24d   : > { %1318 = vmatmul.msk.bf16.vlgmr.msrb.gmra.mxu2 %vm411_vm2, %v604_v26  ;;  %v719_v25 = vpack.c.b16 %v718_v23, %v717_v24 }
 0x271   : > { %v934_v27 = vpop.permute.xlu0 %933 }
 0x272   : > { %v939_v28 = vsel %vm411_vm2, %v934_v27, 0 }
 0x273   : > { %948 = vmatpush.bf16.xpose.msra.mxu1 %v939_v28 }
 0x279   : > { %v968_v58 = vpop.permute.xlu0 %967 }
 0x27a   : > { %v973_v30 = vsel %vm411_vm2, %v968_v58, 0  ;;  %1324 = vmatmul.msk.bf16.vlgmr.msra.gmra.mxu1 %vm411_vm2, %v927_v29 }
 0x27b   : > { %982 = vmatpush.bf16.xpose.msra.mxu2 %v973_v30 }
 0x2bd   : > { %v961_v31 = vpop.permute.xlu1 %960 }
 0x2be   : > { %1325 = vmatmul.msk.bf16.vlgmr.msra.gmra.mxu2 %vm411_vm2, %v961_v31 }
 0x2c0   : > { %v595_v33 = vpop.f32.mrf.mxu2 }
 0x2c1   : > { %v596_v20 = vadd.f32 %v595_v33, %v566_v32 }
 0x2c3   : > { %v632_v34 = vsel %vm411_vm2, %v596_v20, -inf }
 0x2c4   : > { %633 = vmax.xlane.f32.xlu2 %v632_v34 }
 0x2c8   : > { %v597_v36 = vpop.f32.mrf.mxu2 }
 0x2c9   : > { %v598_v37 = vadd.f32 %v597_v36, %v567_v35 }
 0x2cb   : > { %v635_v38 = vsel %vm411_vm2, %v598_v37, -inf }
 0x2cc   : > { %636 = vmax.xlane.f32.xlu0 %v635_v38 }
 0x2d0   : > { %v627_v39 = vpop.f32.mrf.mxu2 }
 0x2d1   : > { %v628_v40 = vadd.f32 %v627_v39, %v566_v32 }
 0x2d3   : > { %v638_v41 = vsel %vm411_vm2, %v628_v40, -inf }
 0x2d4   : > { %639 = vmax.xlane.f32.xlu1 %v638_v41 }
 0x2d8   : > { %v629_v42 = vpop.f32.mrf.mxu2 }
 0x2d9   : > { %v630_v43 = vadd.f32 %v629_v42, %v567_v35 }
 0x2db   : > { %v641_v45 = vsel %vm411_vm2, %v630_v43, -inf }
 0x2dc   : > { %642 = vmax.xlane.f32.xlu2 %v641_v45 }
 0x2f7   : > { %v950_v47 = vpop.f32.mrf.mxu1 }
 0x2f8   : > { %v951_v48 = vadd.f32 %v1322_v46, %v950_v47 }
 0x2fa   : > { %v989_v49 = vsel %vm411_vm2, %v951_v48, -inf }
 0x2fb   : > { %990 = vmax.xlane.f32.xlu0 %v989_v49 }
 0x2ff   : > { %v952_v51 = vpop.f32.mrf.mxu1 }
 0x300   : > { %v953_v52 = vadd.f32 %v1323_v50, %v952_v51 }
 0x302   : > { %v992_v54 = vsel %vm411_vm2, %v953_v52, -inf }
 0x303   : > { %993 = vmax.xlane.f32.xlu1 %v992_v54 }
 0x337   : > { %v634_v56 = vpop.xlane.xlu2 %633 }
 0x338   : > { %v644_v62 = vsub.f32 %v596_v20, %v634_v56 }
 0x33a   : > { %v648_v0 = vmul.f32 1.442695, %v644_v62 }
 0x33f   : > { %v637_v55 = vpop.xlane.xlu0 %636 }
 0x340   : > { %v645_v57 = vsub.f32 %v598_v37, %v637_v55 }
 0x341   : > { %v984_v60 = vpop.f32.mrf.mxu2 }
 0x342   : > { %v650_v61 = vmul.f32 1.442695, %v645_v57  ;;  %v1811_v53 = vadd.f32 %v1322_v46, %v984_v60 }
 0x344   : > { %1437 = vpow2.f32 %v650_v61  ;;  %v995_v63 = vsel %vm411_vm2, %v1811_v53, -inf }
 0x345   : > { %996 = vmax.xlane.f32.xlu1 %v995_v63  ;;  %1439 = vpow2.f32 %v648_v0 }
 0x347   : > { %v640_v1 = vpop.xlane.xlu1 %639 }
 0x348   : > { %v646_v2 = vsub.f32 %v628_v40, %v640_v1 }
 0x349   : > { %v986_v3 = vpop.f32.mrf.mxu2 }
 0x34a   : > { %v1815_v4 = vpop.eup %1437  ;;  %v652_v5 = vmul.f32 1.442695, %v646_v2  ;;  %v987_v6 = vadd.f32 %v1323_v50, %v986_v3 }
 0x34b   : > { %v659_v7 = vsel %vm411_vm2, %v1815_v4, 0.0  ;;  %v1820_v11 = vpop.eup %1439 }
 0x34c   : > { %1441 = vpow2.f32 %v652_v5  ;;  %660 = vadd.xlane.f32.xlu0 %v659_v7  ;;  %v998_v8 = vsel %vm411_vm2, %v987_v6, -inf  ;;  %v656_v14 = vsel %vm411_vm2, %v1820_v11, 0.0 }
 0x34d   : > { %999 = vmax.xlane.f32.xlu2 %v998_v8 }
 0x34f   : > { %v643_v26 = vpop.xlane.xlu2 %642 }
 0x350   : > { %v647_v28 = vsub.f32 %v630_v43, %v643_v26 }
 0x352   : > { %v1822_v59 = vpop.eup %1441  ;;  %v654_v29 = vmul.f32 1.442695, %v647_v28 }
 0x353   : > { %v662_v12 = vsel %vm411_vm2, %v1822_v59, 0.0 }
 0x354   : > { %663 = vadd.xlane.f32.xlu1 %v662_v12 }
 0x355   : > { %657 = vadd.xlane.f32.xlu2 %v656_v14 }
 0x360   : > { %690 = vrot.lane.b32.xlu0 %v689_v10, %s1532_s23 }
 0x36d   : > { %720 = vrot.lane.b32.xlu1 %v719_v25, %s1532_s23 }
 0x36e   : > { %v991_v13 = vpop.xlane.xlu0 %990 }
 0x36f   : > { %v1001_v27 = vsub.f32 %v951_v48, %v991_v13 }
 0x371   : > { %v1005_v9 = vmul.f32 1.442695, %v1001_v27 }
 0x373   : > { %1443 = vpow2.f32 %v1005_v9 }
 0x374   : > { %1445 = vpow2.f32 %v654_v29 }
 0x376   : > { %v994_v58 = vpop.xlane.xlu1 %993 }
 0x377   : > { %v1002_v30 = vsub.f32 %v953_v52, %v994_v58 }
 0x379   : > { %v1836_v31 = vpop.eup %1443  ;;  %v1007_v17 = vmul.f32 1.442695, %v1002_v30 }
 0x37a   : > { %v1013_v19 = vsel %vm411_vm2, %v1836_v31, 0.0  ;;  %v1446_v32 = vpop.eup %1445 }
 0x37b   : > { %1014 = vadd.xlane.f32.xlu2 %v1013_v19  ;;  %1447 = vpow2.f32 %v1007_v17  ;;  %v665_v33 = vsel %vm411_vm2, %v1446_v32, 0.0 }
 0x381   : > { %v1448_v20 = vpop.eup %1447 }
 0x382   : > { %v1016_v34 = vsel %vm411_vm2, %v1448_v20, 0.0 }
 0x383   : > { %666 = vadd.xlane.f32.xlu2 %v665_v33 }
 0x38a   : > { %1017 = vadd.xlane.f32.xlu0 %v1016_v34 }
 0x39b   : > { %1047 = vrot.lane.b32.xlu2 %v689_v10, %s1533_s24 }
 0x39e   : > { %1077 = vrot.lane.b32.xlu0 %v719_v25, %s1533_s24 }
 0x3b8   : > { %v997_v35 = vpop.xlane.xlu1 %996 }
 0x3b9   : > { %v1003_v36 = vsub.f32 %v1811_v53, %v997_v35 }
 0x3bb   : > { %v1009_v37 = vmul.f32 1.442695, %v1003_v36 }
 0x3bd   : > { %1449 = vpow2.f32 %v1009_v37  ;;  %v1345_v37 = vld [vmem:[%s1894_s3 + $0x8] sm:$0xff] }
 0x3be   : > { %1156 = vmatpush.bf16.msrb.mxu1 %v1345_v37 }
 0x3bf   : > { %v661_v38 = vpop.xlane.xlu0 %660 }
 0x3c0   : > { %v1000_v39 = vpop.xlane.xlu2 %999  ;;  %1451 = vrcp.f32 %v661_v38  ;;  %v1344_v38 = vld [vmem:[%s1894_s3] sm:$0xff] }
 0x3c1   : > { %v1004_v40 = vsub.f32 %v987_v6, %v1000_v39 }
 0x3c2   : > { %1157 = vmatpush.bf16.msrb.mxu1 %v1344_v38 }
 0x3c3   : > { %v1450_v41 = vpop.eup %1449  ;;  %v1011_v42 = vmul.f32 1.442695, %v1004_v40 }
 0x3c4   : > { %v1019_v43 = vsel %vm411_vm2, %v1450_v41, 0.0 }
 0x3c5   : > { %1453 = vpow2.f32 %v1011_v42  ;;  %1020 = vadd.xlane.f32.xlu1 %v1019_v43 }
 0x3c6   : > { %v1452_v46 = vpop.eup %1451 }
 0x3c7   : > { %v673_v49 = vmul.f32 %v1452_v46, %v1815_v4  ;;  %v664_v61 = vpop.xlane.xlu1 %663 }
 0x3c8   : > { %v658_v45 = vpop.xlane.xlu2 %657 }
 0x3c9   : > { %1455 = vrcp.f32 %v658_v45  ;;  %v677_v52 = vpack.c.bf16 %v673_v49, %v673_v49 }
 0x3ca   : > { %1457 = vrcp.f32 %v664_v61 }
 0x3cb   : > { %v1454_v47 = vpop.eup %1453  ;;  %v683_v57 = vunpack.c.l.b16 %v677_v52 }
 0x3cc   : > { %v1022_v48 = vsel %vm411_vm2, %v1454_v47, 0.0 }
 0x3cd   : > { %1023 = vadd.xlane.f32.xlu2 %v1022_v48 }
 0x3cf   : > { %v1456_v50 = vpop.eup %1455 }
 0x3d0   : > { %v672_v51 = vmul.f32 %v1456_v50, %v1820_v11  ;;  %v1458_v0 = vpop.eup %1457  ;;  %v1404_v50 = vld [vmem:[%s1895_s4] ss:$0 sm:$0xff] }
 0x3d1   : > { %v674_v1 = vmul.f32 %v1458_v0, %v1822_v59 }
 0x3d2   : > { %v691_v54 = vpop.permute.xlu0 %690  ;;  %v676_v55 = vpack.c.bf16 %v672_v51, %v672_v51 }
 0x3d3   : > { %703 = vmatpush.bf16.msra.mxu3 %v691_v54  ;;  %v678_v4 = vpack.c.bf16 %v674_v1, %v674_v1 }
 0x3d4   : > { %v682_v56 = vunpack.c.l.b16 %v676_v55 }
 0x3d5   : > { %v712_v8 = vunpack.c.l.b16 %v678_v4 }
 0x3d6   : > { %v684_v60 = vpack.c.b16 %v683_v57, %v682_v56 }
 0x3d8   : > { %1319 = vmatmul.msk.bf16.vlgmr.msra.gmra.mxu3 %vm411_vm2, %v684_v60 }
 0x3df   : > { %v721_v53 = vpop.permute.xlu1 %720 }
 0x3e0   : > { %733 = vmatpush.bf16.msrb.mxu3 %v721_v53 }
 0x3ee   : > { %v1015_v62 = vpop.xlane.xlu2 %1014 }
 0x3f6   : > { %v667_v63 = vpop.xlane.xlu2 %666 }
 0x3f7   : > { %1459 = vrcp.f32 %v667_v63 }
 0x3fd   : > { %v1460_v2 = vpop.eup %1459  ;;  %v1018_v3 = vpop.xlane.xlu0 %1017 }
 0x3fe   : > { %v675_v5 = vmul.f32 %v1460_v2, %v1446_v32  ;;  %v1048_v6 = vpop.permute.xlu2 %1047  ;;  %1461 = vrcp.f32 %v1018_v3 }
 0x3ff   : > { %1060 = vmatpush.bf16.msra.mxu3 %v1048_v6  ;;  %1463 = vrcp.f32 %v1015_v62 }
 0x400   : > { %v679_v7 = vpack.c.bf16 %v675_v5, %v675_v5 }
 0x402   : > { %v713_v11 = vunpack.c.l.b16 %v679_v7 }
 0x404   : > { %v714_v12 = vpack.c.b16 %v713_v11, %v712_v8  ;;  %v1462_v14 = vpop.eup %1461 }
 0x405   : > { %v1464_v15 = vpop.eup %1463  ;;  %v1030_v44 = vmul.f32 %v1462_v14, %v1448_v20 }
 0x406   : > { %1320 = vmatmul.msk.bf16.vlgmr.msrb.gmra.mxu3 %vm411_vm2, %v714_v12  ;;  %v1029_v16 = vmul.f32 %v1464_v15, %v1836_v31 }
 0x407   : > { %v1034_v59 = vpack.c.bf16 %v1030_v44, %v1030_v44 }
 0x408   : > { %v1033_v18 = vpack.c.bf16 %v1029_v16, %v1029_v16 }
 0x409   : > { %v1040_v10 = vunpack.c.l.b16 %v1034_v59 }
 0x40a   : > { %v1039_v22 = vunpack.c.l.b16 %v1033_v18 }
 0x40c   : > { %v1041_v23 = vpack.c.b16 %v1040_v10, %v1039_v22 }
 0x410   : > { %v1078_v21 = vpop.permute.xlu0 %1077 }
 0x411   : > { %1090 = vmatpush.bf16.msrb.mxu0 %v1078_v21 }
 0x416   : > { %1326 = vmatmul.msk.bf16.vlgmr.msra.gmra.mxu3 %vm411_vm2, %v1041_v23 }
 0x438   : > { %v1021_v24 = vpop.xlane.xlu1 %1020 }
 0x439   : > { %1465 = vrcp.f32 %v1021_v24 }
 0x43f   : > { %v1466_v26 = vpop.eup %1465 }
 0x440   : > { %v1024_v25 = vpop.xlane.xlu2 %1023  ;;  %v1031_v13 = vmul.f32 %v1466_v26, %v1450_v41 }
 0x441   : > { %1467 = vrcp.f32 %v1024_v25 }
 0x442   : > { %v1035_v28 = vpack.c.bf16 %v1031_v13, %v1031_v13 }
 0x444   : > { %v1069_v58 = vunpack.c.l.b16 %v1035_v28 }
 0x447   : > { %v1468_v27 = vpop.eup %1467 }
 0x448   : > { %v1032_v9 = vmul.f32 %v1468_v27, %v1454_v47 }
 0x44a   : > { %v1036_v29 = vpack.c.bf16 %v1032_v9, %v1032_v9 }
 0x44c   : > { %v1070_v30 = vunpack.c.l.b16 %v1036_v29 }
 0x44e   : > { %v1071_v31 = vpack.c.b16 %v1070_v30, %v1069_v58 }
 0x450   : > { %1327 = vmatmul.msk.bf16.vlgmr.msrb.gmra.mxu0 %vm411_vm2, %v1071_v31 }
 0x45b   : > { %v705_v19 = vpop.f32.mrf.mxu3 }
 0x45c   : > { %740 = vst.msk [vmem:[#allocation3] sm:$0xff] %vm411_vm2, %v705_v19 }
 0x463   : > { %v707_v17 = vpop.f32.mrf.mxu3 }
 0x464   : > { %741 = vst.msk [vmem:[#allocation3 + $0x8] sm:$0xff] %vm411_vm2, %v707_v17 }
 0x489   : > { %v735_v32 = vpop.f32.mrf.mxu3 }
 0x48a   : > { %742 = vst.msk [vmem:[#allocation3 + $0x10] sm:$0xff] %vm411_vm2, %v735_v32 }
 0x491   : > { %v737_v33 = vpop.f32.mrf.mxu3 }
 0x492   : > { %743 = vst.msk [vmem:[#allocation3 + $0x18] sm:$0xff] %vm411_vm2, %v737_v33  ;;  %vm1113_vm2 = vcmask 261248  }
 0x499   : > { %v1062_v20 = vpop.f32.mrf.mxu3 }
 0x49a   : > { %1101 = vrot.lane.b32.xlu1 %v1062_v20, %s1534_s29 }
 0x4a1   : > { %v1064_v34 = vpop.f32.mrf.mxu3 }
 0x4a2   : > { %1103 = vrot.lane.b32.xlu0 %v1064_v34, %s1534_s29 }
 0x4cd   : > { %v1092_v35 = vpop.f32.mrf.mxu0 }
 0x4ce   : > { %1105 = vrot.lane.b32.xlu2 %v1092_v35, %s1534_s29 }
 0x4d5   : > { %v1094_v36 = vpop.f32.mrf.mxu0 }
 0x4d6   : > { %1107 = vrot.lane.b32.xlu0 %v1094_v36, %s1534_s29 }
 0x50c   : > { %v1102_v39 = vpop.permute.xlu1 %1101 }
 0x50d   : > { %1114 = vst.msk [vmem:[#allocation3] sm:$0xff] %vm1113_vm2, %v1102_v39 }
 0x514   : > { %v1104_v40 = vpop.permute.xlu0 %1103  ;;  %v1118_v41 = vld [vmem:[#allocation3] sm:$0xff] }
 0x515   : > { %1115 = vst.msk [vmem:[#allocation3 + $0x8] sm:$0xff] %vm1113_vm2, %v1104_v40 }
 0x51c   : > { %v1119_v42 = vld [vmem:[#allocation3 + $0x8] sm:$0xff] }
 0x51d   : > { %v1122_v43 = vpack.c.bf16 %v1119_v42, %v1118_v41 }
 0x51f   : > { %1336 = vmatmul.msk.bf16.vlgmr.msrb.gmra.mxu1 %vm372_vm0, %v1122_v43 }
 0x528   : > { %v1106_v45 = vpop.permute.xlu2 %1105 }
 0x529   : > { %1116 = vst.msk [vmem:[#allocation3 + $0x10] sm:$0xff] %vm1113_vm2, %v1106_v45 }
 0x530   : > { %v1120_v47 = vld [vmem:[#allocation3 + $0x10] sm:$0xff] }
 0x548   : > { %v1108_v46 = vpop.permute.xlu0 %1107 }
 0x549   : > { %1117 = vst.msk [vmem:[#allocation3 + $0x18] sm:$0xff] %vm1113_vm2, %v1108_v46 }
 0x550   : > { %v1121_v48 = vld [vmem:[#allocation3 + $0x18] sm:$0xff] }
 0x551   : > { %v1123_v49 = vpack.c.bf16 %v1121_v48, %v1120_v47 }
 0x553   : > { %1337 = vmatmul.msk.bf16.gmra.mxu1 %vm372_vm0, %v1123_v49 }
 0x59c   : > { %v1159_v51 = vpop.f32.mrf.mxu1 }
 0x59d   : > { %v1160_v52 = vadd.f32 %v1404_v50, %v1159_v51 }
 0x59f   : > { %1169 = vst.msk [vmem:[%s335_s17] sm:$0xff] %vm372_vm0, %v1160_v52 }
 0x5a4   : > { %v1161_v54 = vpop.f32.mrf.mxu1 }
 0x5a5   : > { %v1162_v55 = vadd.f32 %v1404_v50, %v1161_v54 }
 0x5a7   : > { %1170 = vst.msk [vmem:[%s335_s17 + $0x8] sm:$0xff] %vm372_vm0, %v1162_v55 }
 0x5d0   : > { %v1164_v56 = vpop.f32.mrf.mxu1 }
 0x5d1   : > { %v1165_v57 = vadd.f32 %v1404_v50, %v1164_v56 }
 0x5d3   : > { %1171 = vst.msk [vmem:[%s335_s17 + $0x10] sm:$0xff] %vm372_vm0, %v1165_v57 }
 0x5d8   : > { %v1166_v60 = vpop.f32.mrf.mxu1 }
 0x5d9   : > { %v1167_v61 = vadd.f32 %v1404_v50, %v1166_v60 }
 0x5db   : > { %1172 = vst.msk [vmem:[%s335_s17 + $0x18] sm:$0xff] %vm372_vm0, %v1167_v61 }
 0x5dc PF: > { %s18_s28 = sadd.s32 1, %s1526_s28   ;;  %s1901_s24 = smov %s1518_s26 }
 0x5dd   : > { %p15_p10 = scmp.ge.s32.totalorder %s18_s28, 6   ;;  %s1902_s25 = smov %s1522_s27 }
 0x5de   : > { %s1903_s26 = smov %s1906_s30  ;;  %s1904_s27 = smov %s1910_s8 }
 0x5df   :  { %17 = sbr.rel (!%p15_p10) target bundleno = 3 (0x3), region = 84 }
 0x5e4   :  { %1205 = vsyncpa [#allocation5], 1 }
 0x5e5   :  { %1207 = vsyncpa [#allocation5 + $0x1], 1 }

// kernel: basic_layer_forward.5
= control target key start
LH: loop header
LB: loop body
LE: loop exit
PB: predicated region body
PF: predicated region fallthrough
CT: control target
= control target key end

     0   :  { %s862_s27 = smov 0   ;;  %s974_s0 = inlined_call_operand.vmem [shape: f32[128,32], index: 0, kind: input, shape index: {}]   ;;  %s975_s1 = inlined_call_operand.vmem [shape: f32[128,32], index: 1, kind: input, shape index: {}]   ;;  %s976_s2 = inlined_call_operand.vmem [shape: f32[1,32], index: 2, kind: input, shape index: {}]   ;;  %s977_s3 = inlined_call_operand.vmem [shape: f32[1,32], index: 3, kind: input, shape index: {}]   ;;  %s978_s4 = inlined_call_operand.vmem [shape: bf16[32,128], index: 4, kind: input, shape index: {}]   ;;  %s979_s5 = inlined_call_operand.vmem [shape: f32[1,128], index: 5, kind: input, shape index: {}]   ;;  %s980_s6 = inlined_call_operand.vmem [shape: bf16[128,32], index: 6, kind: input, shape index: {}]   ;;  %s981_s7 = inlined_call_operand.vmem [shape: f32[1,32], index: 7, kind: input, shape index: {}]   ;;  %s982_s8 = inlined_call_operand.vmem [shape: f32[128,32], index: 8, kind: output, shape index: {}]  }
   0x1 LB: > { %s704_s28 = sadd.s32 4294967295, %s814_s27   ;;  %p708_p0 = scmp.ge.s32.totalorder %s814_s27, 1  ;;  %s814_s27 = sphi %s862_s27, %s18_s27  }
   0x2   : > { %p274_p1 = scmp.lt.s32.totalorder %s814_s27, 5 }
   0x4   : > { %p275_p2 = pnand %p708_p0, %p274_p1 }
   0x5   : > { %s709_s29 = sshll.u32 (!%p275_p2), %s704_s28, 2 }
   0x6   : > { %278 = sbr.rel (%p275_p2) target bundleno = 616 (0x268), region = 52  ;;  %p314_p3 = scmp.lt.s32.totalorder (!%p275_p2), %s709_s29, 15 }
   0xb   : > { %s984_s29 = smov (!%p314_p3, %s709_s29), 15  ;;  %vm336_vm0 = vcmask 261120   ;;  %v816_v8 = vmov 32.0   ;;  %v760_v37 = vld [vmem:[%s978_s4 + $0x8] sm:$0xff]  ;;  %v759_v40 = vld [vmem:[%s978_s4] sm:$0xff] }
   0xc   : > { %s870_s30 = sshll.u32 %s984_s29, 3  ;;  %790 = vrcp.f32 %v816_v8  ;;  %490 = vmatpush.bf16.msra.mxu0 %v760_v37 }
   0xd   : > { %s323_s11 = scalar_lea.vmem %s975_s1, %s870_s30  ;;  %s317_s22 = scalar_lea.vmem %s974_s0, %s870_s30 }
   0xe   : > { %v334_v0 = vld [vmem:[%s323_s11 + $0x10] sm:$0xff]  ;;  %v332_v1 = vld [vmem:[%s323_s11] sm:$0xff]  ;;  %v335_v4 = vld [vmem:[%s323_s11 + $0x18] sm:$0xff]  ;;  %s329_s25 = scalar_lea.vmem %s982_s8, %s870_s30 }
   0xf   : > { %v343_v2 = vsel %vm336_vm0, %v334_v0, 0.0  ;;  %v337_v3 = vsel %vm336_vm0, %v332_v1, 0.0  ;;  %v333_v5 = vld [vmem:[%s323_s11 + $0x8] sm:$0xff]  ;;  %v346_v6 = vsel %vm336_vm0, %v335_v4, 0.0 }
  0x10   : > { %344 = vadd.xlane.f32.xlu1 %v343_v2  ;;  %338 = vadd.xlane.f32.xlu0 %v337_v3  ;;  %v340_v7 = vsel %vm336_vm0, %v333_v5, 0.0 }
  0x11   : > { %491 = vmatpush.bf16.msra.mxu0 %v759_v40  ;;  %v765_v40 = vld [vmem:[%s980_s6 + $0x20] sm:$0xff] }
  0x12   : > { %v791_v9 = vpop.eup %790 }
  0x13   : > { %v350_v10 = vmul.f32 32.0, %v791_v9  ;;  %vm354_vm1 = vweird.f32 %v791_v9 }
  0x15   : > { %v351_v11 = vsub.f32 1.0, %v350_v10  ;;  %v787_v10 = vld [vmem:[%s977_s3] ss:$0 sm:$0xff] }
  0x17   : > { %v352_v12 = vmul.f32 %v791_v9, %v351_v11 }
  0x18   : > { %347 = vadd.xlane.f32.xlu1 %v346_v6  ;;  %341 = vadd.xlane.f32.xlu0 %v340_v7 }
  0x19   : > { %v353_v13 = vadd.f32 %v791_v9, %v352_v12 }
  0x1b   : > { %v355_v14 = vsel %vm354_vm1, %v791_v9, %v353_v13 }
  0x83   : > { %v345_v15 = vpop.xlane.xlu1 %344  ;;  %v339_v16 = vpop.xlane.xlu0 %338 }
  0x84   : > { %v358_v17 = vmul.f32 %v355_v14, %v345_v15  ;;  %v356_v18 = vmul.f32 %v355_v14, %v339_v16 }
  0x86   : > { %v880_v19 = vsub.f32 %v334_v0, %v358_v17  ;;  %v360_v20 = vsub.f32 %v332_v1, %v356_v18  ;;  %v448_v18 = vld [vmem:[%s317_s22] sm:$0xff] }
  0x88   : > { %v366_v21 = vmul.f32 %v880_v19, %v880_v19  ;;  %v364_v22 = vmul.f32 %v360_v20, %v360_v20 }
  0x8a   : > { %v374_v23 = vsel %vm336_vm0, %v366_v21, 0.0  ;;  %v368_v24 = vsel %vm336_vm0, %v364_v22, 0.0 }
  0x8b   : > { %v348_v25 = vpop.xlane.xlu1 %347  ;;  %375 = vadd.xlane.f32.xlu0 %v374_v23  ;;  %369 = vadd.xlane.f32.xlu2 %v368_v24  ;;  %v342_v26 = vpop.xlane.xlu0 %341 }
  0x8c   : > { %v359_v27 = vmul.f32 %v355_v14, %v348_v25  ;;  %v357_v28 = vmul.f32 %v355_v14, %v342_v26 }
  0x8e   : > { %v886_v29 = vsub.f32 %v335_v4, %v359_v27  ;;  %v888_v30 = vsub.f32 %v333_v5, %v357_v28  ;;  %v786_v4 = vld [vmem:[%s976_s2] ss:$0 sm:$0xff] }
  0x90   : > { %v367_v31 = vmul.f32 %v886_v29, %v886_v29  ;;  %v365_v32 = vmul.f32 %v888_v30, %v888_v30 }
  0x92   : > { %v377_v33 = vsel %vm336_vm0, %v367_v31, 0.0  ;;  %v371_v34 = vsel %vm336_vm0, %v365_v32, 0.0 }
  0x93   : > { %378 = vadd.xlane.f32.xlu1 %v377_v33  ;;  %372 = vadd.xlane.f32.xlu2 %v371_v34  ;;  %v451_v33 = vld [vmem:[%s317_s22 + $0x18] sm:$0xff] }
  0xfe   : > { %v370_v35 = vpop.xlane.xlu2 %369  ;;  %v376_v36 = vpop.xlane.xlu0 %375 }
  0xff   : > { %v380_v38 = vmul.f32 %v370_v35, %v355_v14  ;;  %v382_v39 = vmul.f32 %v376_v36, %v355_v14  ;;  %v450_v35 = vld [vmem:[%s317_s22 + $0x10] sm:$0xff] }
 0x101   : > { %v384_v41 = vadd.f32 1e-05, %v380_v38  ;;  %v386_v42 = vadd.f32 1e-05, %v382_v39  ;;  %v767_v38 = vld [vmem:[%s980_s6 + $0x30] sm:$0xff]  ;;  %v766_v39 = vld [vmem:[%s980_s6 + $0x28] sm:$0xff] }
 0x103   : > { %792 = vrsqrt.f32 %v384_v41  ;;  %vm394_vm3 = vweird.f32 %v384_v41  ;;  %vm414_vm10 = vweird.f32 %v386_v42 }
 0x104   : > { %794 = vrsqrt.f32 %v386_v42 }
 0x106   : > { %v379_v43 = vpop.xlane.xlu1 %378  ;;  %v373_v44 = vpop.xlane.xlu2 %372 }
 0x107   : > { %v383_v45 = vmul.f32 %v379_v43, %v355_v14  ;;  %v381_v46 = vmul.f32 %v373_v44, %v355_v14  ;;  %v762_v43 = vld [vmem:[%s980_s6 + $0x8] sm:$0xff]  ;;  %v761_v44 = vld [vmem:[%s980_s6] sm:$0xff] }
 0x109   : > { %v793_v47 = vpop.eup %792  ;;  %v387_v48 = vadd.f32 1e-05, %v383_v45  ;;  %v385_v49 = vadd.f32 1e-05, %v381_v46  ;;  %v788_v45 = vld [vmem:[%s979_s5] ss:$0 sm:$0xff] }
 0x10a   : > { %v389_v50 = vmul.f32 %v793_v47, %v384_v41  ;;  %v795_v52 = vpop.eup %794  ;;  %vm395_vm2 = vweird.f32 %v793_v47  ;;  %v764_v41 = vld [vmem:[%s980_s6 + $0x18] sm:$0xff] }
 0x10b   : > { %796 = vrsqrt.f32 %v387_v48  ;;  %v409_v56 = vmul.f32 %v795_v52, %v386_v42  ;;  %vm396_vm4 = vmor %vm394_vm3, %vm395_vm2  ;;  %vm404_vm6 = vweird.f32 %v385_v49  ;;  %vm424_vm8 = vweird.f32 %v387_v48  ;;  %v763_v42 = vld [vmem:[%s980_s6 + $0x10] sm:$0xff] }
 0x10c   : > { %v390_v51 = vmul.f32 %v793_v47, %v389_v50  ;;  %798 = vrsqrt.f32 %v385_v49  ;;  %vm415_vm11 = vweird.f32 %v795_v52 }
 0x10d   : > { %v410_v63 = vmul.f32 %v795_v52, %v409_v56  ;;  %vm416_vm13 = vmor %vm414_vm10, %vm415_vm11 }
 0x10e   : > { %v391_v53 = vmul.f32 0.5, %v390_v51 }
 0x10f   : > { %v411_v5 = vmul.f32 0.5, %v410_v63 }
 0x110   : > { %v392_v54 = vsub.f32 1.5, %v391_v53 }
 0x111   : > { %v797_v55 = vpop.eup %796  ;;  %v412_v11 = vsub.f32 1.5, %v411_v5 }
 0x112   : > { %v799_v57 = vpop.eup %798  ;;  %v393_v58 = vmul.f32 %v793_v47, %v392_v54  ;;  %v419_v59 = vmul.f32 %v797_v55, %v387_v48  ;;  %vm425_vm9 = vweird.f32 %v797_v55 }
 0x113   : > { %v399_v60 = vmul.f32 %v799_v57, %v385_v49  ;;  %vm405_vm5 = vweird.f32 %v799_v57  ;;  %vm426_vm12 = vmor %vm424_vm8, %vm425_vm9  ;;  %v413_v17 = vmul.f32 %v795_v52, %v412_v11 }
 0x114   : > { %v420_v61 = vmul.f32 %v797_v55, %v419_v59  ;;  %v397_v62 = vsel %vm396_vm4, %v793_v47, %v393_v58  ;;  %vm406_vm7 = vmor %vm404_vm6, %vm405_vm5 }
 0x115   : > { %v400_v0 = vmul.f32 %v799_v57, %v399_v60  ;;  %v428_v3 = vmul.f32 %v397_v62, %v360_v20  ;;  %v449_v20 = vld [vmem:[%s317_s22 + $0x8] sm:$0xff]  ;;  %v417_v25 = vsel %vm416_vm13, %v795_v52, %v413_v17 }
 0x116   : > { %v421_v1 = vmul.f32 0.5, %v420_v61  ;;  %v430_v28 = vmul.f32 %v417_v25, %v880_v19  ;;  %v768_v19 = vld [vmem:[%s980_s6 + $0x38] sm:$0xff] }
 0x117   : > { %v401_v2 = vmul.f32 0.5, %v400_v0  ;;  %v436_v9 = vmul.f32 %v786_v4, %v428_v3  ;;  %609 = vmatpush.bf16.msra.mxu1 %v768_v19  ;;  %769 = vmatpush.bf16.msra.mxu2 %v768_v19 }
 0x118   : > { %v422_v7 = vsub.f32 1.5, %v421_v1  ;;  %v438_v31 = vmul.f32 %v786_v4, %v430_v28 }
 0x119   : > { %v402_v6 = vsub.f32 1.5, %v401_v2  ;;  %v444_v16 = vadd.f32 %v787_v10, %v436_v9 }
 0x11a   : > { %v423_v14 = vmul.f32 %v797_v55, %v422_v7  ;;  %v446_v34 = vadd.f32 %v787_v10, %v438_v31 }
 0x11b   : > { %v403_v8 = vmul.f32 %v799_v57, %v402_v6  ;;  %v913_v23 = vadd.f32 %v448_v18, %v444_v16  ;;  %610 = vmatpush.bf16.msra.mxu1 %v767_v38  ;;  %770 = vmatpush.bf16.msra.mxu2 %v767_v38 }
 0x11c   : > { %v427_v22 = vsel %vm426_vm12, %v797_v55, %v423_v14  ;;  %v924_v37 = vadd.f32 %v450_v35, %v446_v34 }
 0x11d   : > { %v407_v12 = vsel %vm406_vm7, %v799_v57, %v403_v8  ;;  %v431_v26 = vmul.f32 %v427_v22, %v886_v29 }
 0x11e   : > { %v429_v13 = vmul.f32 %v407_v12, %v888_v30 }
 0x11f   : > { %v439_v30 = vmul.f32 %v786_v4, %v431_v26  ;;  %611 = vmatpush.bf16.msra.mxu1 %v766_v39  ;;  %771 = vmatpush.bf16.msra.mxu2 %v766_v39 }
 0x120   : > { %v437_v15 = vmul.f32 %v786_v4, %v429_v13 }
 0x121   : > { %v447_v32 = vadd.f32 %v787_v10, %v439_v30 }
 0x122   : > { %v445_v21 = vadd.f32 %v787_v10, %v437_v15 }
 0x123   : > { %v922_v36 = vadd.f32 %v451_v33, %v447_v32  ;;  %612 = vmatpush.bf16.msra.mxu1 %v765_v40  ;;  %772 = vmatpush.bf16.msra.mxu2 %v765_v40  ;;  %v789_v32 = vld [vmem:[%s981_s7] ss:$0 sm:$0xff] }
 0x124   : > { %v915_v24 = vadd.f32 %v449_v20, %v445_v21 }
 0x125   : > { %v457_v29 = vpack.c.bf16 %v922_v36, %v924_v37 }
 0x126   : > { %v456_v27 = vpack.c.bf16 %v915_v24, %v913_v23 }
 0x127   : > { %613 = vmatpush.bf16.msra.mxu1 %v764_v41  ;;  %773 = vmatpush.bf16.msra.mxu2 %v764_v41 }
 0x128   : > { %723 = vmatmul.msk.bf16.vlgmr.msra.gmra.mxu0 %vm336_vm0, %v456_v27 }
 0x12b   : > { %614 = vmatpush.bf16.msra.mxu1 %v763_v42  ;;  %774 = vmatpush.bf16.msra.mxu2 %v763_v42 }
 0x12f   : > { %615 = vmatpush.bf16.msra.mxu1 %v762_v43  ;;  %775 = vmatpush.bf16.msra.mxu2 %v762_v43 }
 0x133   : > { %616 = vmatpush.bf16.msra.mxu1 %v761_v44  ;;  %776 = vmatpush.bf16.msra.mxu2 %v761_v44 }
 0x138   : > { %724 = vmatmul.msk.bf16.gmra.mxu0 %vm336_vm0, %v457_v29 }
 0x1a5   : > { %v493_v46 = vpop.f32.mrf.mxu0 }
 0x1a6   : > { %v494_v47 = vadd.f32 %v788_v45, %v493_v46 }
 0x1a8   : > { %v507_v48 = vmul.f32 0.044715, %v494_v47  ;;  %v503_v8 = vmul.f32 0.5, %v494_v47 }
 0x1aa   : > { %v511_v49 = vmul.f32 %v507_v48, %v494_v47 }
 0x1ac   : > { %v515_v50 = vmul.f32 %v511_v49, %v494_v47 }
 0x1ad   : > { %v495_v51 = vpop.f32.mrf.mxu0 }
 0x1ae   : > { %v496_v52 = vadd.f32 %v788_v45, %v495_v51  ;;  %v519_v53 = vadd.f32 %v515_v50, %v494_v47 }
 0x1b0   : > { %v508_v54 = vmul.f32 0.044715, %v496_v52  ;;  %v523_v56 = vmul.f32 0.7978846, %v519_v53  ;;  %v504_v9 = vmul.f32 0.5, %v496_v52 }
 0x1b2   : > { %v512_v55 = vmul.f32 %v508_v54, %v496_v52  ;;  %800 = vtanh.f32 %v523_v56 }
 0x1b4   : > { %v516_v57 = vmul.f32 %v512_v55, %v496_v52 }
 0x1b5   : > { %v498_v58 = vpop.f32.mrf.mxu0 }
 0x1b6   : > { %v499_v59 = vadd.f32 %v788_v45, %v498_v58  ;;  %v520_v60 = vadd.f32 %v516_v57, %v496_v52 }
 0x1b8   : > { %v509_v61 = vmul.f32 0.044715, %v499_v59  ;;  %v524_v62 = vmul.f32 0.7978846, %v520_v60  ;;  %v801_v0 = vpop.eup %800  ;;  %v505_v25 = vmul.f32 0.5, %v499_v59 }
 0x1b9   : > { %v531_v5 = vadd.f32 1.0, %v801_v0 }
 0x1ba   : > { %802 = vtanh.f32 %v524_v62  ;;  %v513_v63 = vmul.f32 %v509_v61, %v499_v59 }
 0x1bb   : > { %v535_v13 = vmul.f32 %v531_v5, %v503_v8 }
 0x1bc   : > { %v517_v1 = vmul.f32 %v513_v63, %v499_v59 }
 0x1bd   : > { %v500_v2 = vpop.f32.mrf.mxu0 }
 0x1be   : > { %v501_v3 = vadd.f32 %v788_v45, %v500_v2  ;;  %v521_v4 = vadd.f32 %v517_v1, %v499_v59 }
 0x1c0   : > { %v803_v6 = vpop.eup %802  ;;  %v510_v7 = vmul.f32 0.044715, %v501_v3  ;;  %v525_v12 = vmul.f32 0.7978846, %v521_v4  ;;  %v506_v26 = vmul.f32 0.5, %v501_v3 }
 0x1c1   : > { %v532_v10 = vadd.f32 1.0, %v803_v6 }
 0x1c2   : > { %v514_v11 = vmul.f32 %v510_v7, %v501_v3  ;;  %804 = vtanh.f32 %v525_v12 }
 0x1c3   : > { %v536_v14 = vmul.f32 %v532_v10, %v504_v9 }
 0x1c4   : > { %v518_v15 = vmul.f32 %v514_v11, %v501_v3 }
 0x1c5   : > { %v539_v16 = vpack.c.bf16 %v536_v14, %v535_v13 }
 0x1c6   : > { %v522_v17 = vadd.f32 %v518_v15, %v501_v3 }
 0x1c7   : > { %617 = vmatmul.bf16.vlgmr.msra.gmra.mxu1 %v539_v16 }
 0x1c8   : > { %v526_v18 = vmul.f32 0.7978846, %v522_v17  ;;  %v805_v20 = vpop.eup %804 }
 0x1c9   : > { %v533_v21 = vadd.f32 1.0, %v805_v20 }
 0x1ca   : > { %806 = vtanh.f32 %v526_v18 }
 0x1cb   : > { %v537_v28 = vmul.f32 %v533_v21, %v505_v25 }
 0x1d0   : > { %v807_v22 = vpop.eup %806 }
 0x1d1   : > { %v534_v27 = vadd.f32 1.0, %v807_v22 }
 0x1d3   : > { %v538_v30 = vmul.f32 %v534_v27, %v506_v26 }
 0x1d5   : > { %v540_v31 = vpack.c.bf16 %v538_v30, %v537_v28 }
 0x1d7   : > { %622 = vmatmul.bf16.vlgmr.msra.gmra.mxu2 %v540_v31 }
 0x244   : > { %v618_v33 = vpop.f32.mrf.mxu1 }
 0x245   : > { %v619_v34 = vadd.f32 %v789_v32, %v618_v33 }
 0x247   : > { %v628_v35 = vadd.f32 %v619_v34, %v913_v23 }
 0x249   : > { %632 = vst.msk [vmem:[%s329_s25] sm:$0xff] %vm336_vm0, %v628_v35 }
 0x24c   : > { %v620_v29 = vpop.f32.mrf.mxu1 }
 0x24d   : > { %v621_v19 = vadd.f32 %v789_v32, %v620_v29 }
 0x24f   : > { %v629_v38 = vadd.f32 %v621_v19, %v915_v24 }
 0x251   : > { %633 = vst.msk [vmem:[%s329_s25 + $0x8] sm:$0xff] %vm336_vm0, %v629_v38 }
 0x25a   : > { %v623_v39 = vpop.f32.mrf.mxu2 }
 0x25b   : > { %v624_v40 = vadd.f32 %v789_v32, %v623_v39 }
 0x25d   : > { %v630_v41 = vadd.f32 %v624_v40, %v924_v37 }
 0x25f   : > { %634 = vst.msk [vmem:[%s329_s25 + $0x10] sm:$0xff] %vm336_vm0, %v630_v41 }
 0x262   : > { %v625_v42 = vpop.f32.mrf.mxu2 }
 0x263   : > { %v626_v43 = vadd.f32 %v789_v32, %v625_v42 }
 0x265   : > { %v631_v44 = vadd.f32 %v626_v43, %v922_v36 }
 0x267   : > { %635 = vst.msk [vmem:[%s329_s25 + $0x18] sm:$0xff] %vm336_vm0, %v631_v44 }
 0x268 PF: > { %s18_s27 = sadd.s32 1, %s814_s27  }
 0x269   : > { %p15_p4 = scmp.ge.s32.totalorder %s18_s27, 6  }
 0x26b   :  { %17 = sbr.rel (!%p15_p4) target bundleno = 1 (0x1), region = 85 }

// kernel: basic_layer_forward.6
= control target key start
LH: loop header
LB: loop body
LE: loop exit
PB: predicated region body
PF: predicated region fallthrough
CT: control target
= control target key end

     0   :  { %13 = vsyncpa [#allocation5], 0  ;;  %s1627_s27 = smov 0   ;;  %s1629_s28 = smov 0   ;;  %s1951_s0 = inlined_call_operand.vmem [shape: bf16[2,4,16,32], index: 0, kind: input, shape index: {}]   ;;  %s1952_s1 = inlined_call_operand.vmem [shape: bf16[32,96], index: 1, kind: input, shape index: {}]   ;;  %s1953_s2 = inlined_call_operand.vmem [shape: f32[1,96], index: 2, kind: input, shape index: {}]   ;;  %s1954_s3 = inlined_call_operand.vmem [shape: bf16[32,32], index: 3, kind: input, shape index: {}]   ;;  %s1955_s4 = inlined_call_operand.vmem [shape: f32[1,32], index: 4, kind: input, shape index: {}]   ;;  %s1956_s5 = inlined_call_operand.vmem [shape: f32[2], index: 5, kind: input, shape index: {}]   ;;  %s1957_s6 = inlined_call_operand.vmem [shape: f32[2,16,16], index: 6, kind: input, shape index: {}]   ;;  %s1958_s7 = inlined_call_operand.vmem [shape: f32[4,16,16], index: 7, kind: input, shape index: {}]   ;;  %s1959_s8 = inlined_call_operand.vmem [shape: f32[2,4,16,32], index: 8, kind: output, shape index: {}]  }
   0x1   :  { %s1631_s29 = smov 0   ;;  %s1633_s30 = smov 0  }
   0x2   :  { %s1635_s9 = smov 0  }
   0x3 LB: > { %s1328_s10 = sadd.s32 4294967295, %s1573_s9   ;;  %s28_s11 = sadd.s32 1, %s1565_s29  ;;  %s1573_s9 = sphi %s1635_s9, %s19_s9   ;;  %s1569_s30 = sphi %s1633_s30, %s1965_s30   ;;  %s1565_s29 = sphi %s1631_s29, %s1964_s29   ;;  %s1561_s28 = sphi %s1629_s28, %s1963_s28   ;;  %s1557_s27 = sphi %s1627_s27, %s1962_s27  }
   0x4   : > { %p29_p0 = scmp.ge.s32.totalorder %s28_s11, 2  ;;  %s31_s12 = sadd.s32 1, %s1569_s30 }
   0x5   : > { %p1330_p1 = scmp.ge.s32.totalorder %s1573_s9, 1  ;;  %p239_p2 = scmp.lt.s32.totalorder %s1573_s9, 5 }
   0x6   : > { %s1967_s11 = smov (%p29_p0, %s28_s11), 0  ;;  %s1969_s12 = smov (!%p29_p0, %s31_s12), %s1569_s30 }
   0x7   : > { %p240_p3 = pnand %p1330_p1, %p239_p2  ;;  %p33_p4 = scmp.ge.s32.totalorder %s1969_s12, 2 }
   0x8   : > { %p1401_p5 = scmp.eq.s32.totalorder %s1328_s10, 0  ;;  %s263_s15 = sshll.u32 %s1956_s5, 4  ;;  %s264_s15 = int_to_ptr.vmem [resolvable:$true] %s263_s15 }
   0x9   : > { %p1397_p6 = pneg %p240_p3  ;;  %s1971_s12 = smov (%p33_p4, %s1969_s12), 0 }
   0xa   : > { %s1575_s16 = smov [#allocation4]   ;;  %296 = sbr.rel (%p240_p3) target bundleno = 1502 (0x5de), region = 52 }
   0xb   : > { %p1398_p7 = pnand %p1401_p5, %p1397_p6 }
   0xd   : > { %1400 = dma.vmem_to_smem (!%p1398_p7), %s264_s15, 16, %s1575_s16, [#allocation5]  }
   0xf   : > { %1552 = dma.done.wait (%p1401_p5), [#allocation5], 16  }
  0x10   : > { %1554 = vsyncadd (%p1401_p5), [#allocation5], 4294967280 }
  0x11   : > { %303 = sfence }
  0x12   : > { %v1389_v0 = vld [vmem:[%s1952_s1 + $0x8] sm:$0xff]  ;;  %s1335_s19 = sshll.u32 %s1557_s27, 1  ;;  %p343_p8 = scmp.lt.s32.totalorder %s1561_s28, 1  ;;  %v1388_v1 = vld [vmem:[%s1952_s1] sm:$0xff]  ;;  %vm399_vm0 = vcmask 261120   ;;  %vm425_vm1 = vcmask 785408  }
  0x13   : > { %p345_p9 = scmp.lt.s32.totalorder %s1335_s19, 3  ;;  %412 = vmatpush.bf16.msra.mxu0 %v1389_v0  ;;  %v1450_v4 = vld [vmem:[%s1953_s2] ss:$0 sm:$0xff]  ;;  %s1577_s16 = smov 96   ;;  %vm445_vm2 = vcmask 130048  }
  0x14   : > { %s1973_s28 = smov (!%p343_p8, %s1561_s28), 1  ;;  %s1578_s17 = smov 112  }
  0x15   : > { %s1975_s19 = smov (!%p345_p9, %s1335_s19), 3  ;;  %s1337_s22 = sshll.u32 %s1973_s28, 3 }
  0x16   : > { %s1336_s23 = sshll.u32 %s1975_s19, 1  ;;  %s1576_s28 = smov 80  }
  0x17   : > { %413 = vmatpush.bf16.msra.mxu0 %v1388_v1  ;;  %s1674_s24 = sadd.s32 %s1337_s22, %s1336_s23  ;;  %s1367_s18 = sld [smem:[#allocation4 + $0x1]] }
  0x18   : > { %s1338_s25 = sshll.u32 %s1674_s24, 2  ;;  %s582_s19 = sld [smem:[#allocation4]] }
  0x19   : > { %s351_s13 = scalar_lea.vmem %s1951_s0, %s1338_s25  ;;  %s1390_s20 = sshll.u32 %s1557_s27, 5 }
  0x1a   : > { %v1386_v2 = vld [vmem:[%s351_s13] sm:$0xff]  ;;  %v1387_v3 = vld [vmem:[%s351_s13 + $0x8] sm:$0xff]  ;;  %s432_s23 = scalar_lea.vmem %s1958_s7, %s1390_s20 }
  0x1b   : > { %1359 = vmatmul.msk.bf16.vlgmr.msra.gmra.mxu0 %vm399_vm0, %v1386_v2 }
  0x2b   : > { %1360 = vmatmul.msk.bf16.gmra.mxu0 %vm399_vm0, %v1387_v3 }
  0x98   : > { %v415_v5 = vpop.f32.mrf.mxu0 }
  0x99   : > { %v416_v6 = vadd.f32 %v1450_v4, %v415_v5 }
  0x9b   : > { %426 = vst.msk [vmem:[#allocation2] sm:$0xff] %vm425_vm1, %v416_v6 }
  0xa0   : > { %v417_v7 = vpop.f32.mrf.mxu0 }
  0xa1   : > { %v418_v8 = vadd.f32 %v1450_v4, %v417_v7 }
  0xa2   : > { %v1686_v9 = vld [vmem:[#allocation2] sm:$0xff] }
  0xa3   : > { %427 = vst.msk [vmem:[#allocation2 + $0x8] sm:$0xff] %vm425_vm1, %v418_v8  ;;  %v786_v10 = vmul.f32 %v1686_v9, %v1686_v9 }
  0xa5   : > { %866 = vrot.lane.b32.xlu2 %v786_v10, %s1576_s28  ;;  %510 = vrot.lane.b32.xlu0 %v786_v10, %s1577_s16  ;;  %v446_v35 = vsel %vm445_vm2, %v786_v10, 0.0 }
  0xa8   : > { %v420_v11 = vpop.f32.mrf.mxu0 }
  0xa9   : > { %v421_v12 = vadd.f32 %v1450_v4, %v420_v11 }
  0xaa   : > { %v1693_v13 = vld [vmem:[#allocation2 + $0x8] sm:$0xff] }
  0xab   : > { %428 = vst.msk [vmem:[#allocation2 + $0x10] sm:$0xff] %vm425_vm1, %v421_v12  ;;  %v442_v14 = vmul.f32 %v1693_v13, %v1693_v13 }
  0xad   : > { %794 = vrot.lane.b32.xlu2 %v786_v10, %s1578_s17  ;;  %512 = vrot.lane.b32.xlu0 %v442_v14, %s1577_s16  ;;  %v449_v36 = vsel %vm445_vm2, %v442_v14, 0.0 }
  0xb0   : > { %v422_v15 = vpop.f32.mrf.mxu0 }
  0xb1   : > { %v423_v16 = vadd.f32 %v1450_v4, %v422_v15 }
  0xb2   : > { %v1700_v17 = vld [vmem:[#allocation2 + $0x10] sm:$0xff] }
  0xb3   : > { %429 = vst.msk [vmem:[#allocation2 + $0x18] sm:$0xff] %vm425_vm1, %v423_v16  ;;  %v443_v18 = vmul.f32 %v1700_v17, %v1700_v17 }
  0xb5   : > { %514 = vrot.lane.b32.xlu1 %v443_v18, %s1577_s16  ;;  %868 = vrot.lane.b32.xlu2 %v442_v14, %s1576_s28  ;;  %v452_v40 = vsel %vm445_vm2, %v443_v18, 0.0 }
  0xba   : > { %v1707_v19 = vld [vmem:[#allocation2 + $0x18] sm:$0xff] }
  0xbb   : > { %v1711_v20 = vmul.f32 %v1707_v19, %v1707_v19 }
  0xbd   : > { %516 = vrot.lane.b32.xlu1 %v1711_v20, %s1577_s16  ;;  %796 = vrot.lane.b32.xlu2 %v442_v14, %s1578_s17 }
  0xc5   : > { %870 = vrot.lane.b32.xlu2 %v443_v18, %s1576_s28 }
  0xcd   : > { %872 = vrot.lane.b32.xlu2 %v1711_v20, %s1576_s28 }
  0xff   : > { %v867_v21 = vpop.permute.xlu2 %866 }
 0x100   : > { %v878_v39 = vsel %vm445_vm2, %v867_v21, 0.0 }
 0x107   : > { %v795_v26 = vpop.permute.xlu2 %794 }
 0x108   : > { %v806_v31 = vsel %vm445_vm2, %v795_v26, 0.0 }
 0x10f   : > { %v869_v29 = vpop.permute.xlu2 %868 }
 0x110   : > { %v881_v41 = vsel %vm445_vm2, %v869_v29, 0.0 }
 0x117   : > { %v511_v22 = vpop.permute.xlu0 %510  ;;  %v797_v33 = vpop.permute.xlu2 %796 }
 0x118   : > { %v522_v23 = vsel %vm445_vm2, %v511_v22, 0.0  ;;  %v809_v34 = vsel %vm445_vm2, %v797_v33, 0.0  ;;  %v455_v22 = vsel %vm445_vm2, %v1711_v20, 0.0 }
 0x119   : > { %523 = vadd.xlane.f32.xlu0 %v522_v23 }
 0x11f   : > { %v513_v24 = vpop.permute.xlu0 %512  ;;  %v871_v37 = vpop.permute.xlu2 %870 }
 0x120   : > { %v525_v25 = vsel %vm445_vm2, %v513_v24, 0.0  ;;  %v884_v38 = vsel %vm445_vm2, %v871_v37, 0.0 }
 0x121   : > { %526 = vadd.xlane.f32.xlu1 %v525_v25 }
 0x127   : > { %v515_v27 = vpop.permute.xlu1 %514  ;;  %v873_v42 = vpop.permute.xlu2 %872 }
 0x128   : > { %v528_v28 = vsel %vm445_vm2, %v515_v27, 0.0  ;;  %v887_v43 = vsel %vm445_vm2, %v873_v42, 0.0 }
 0x129   : > { %529 = vadd.xlane.f32.xlu2 %v528_v28 }
 0x12f   : > { %v517_v30 = vpop.permute.xlu1 %516 }
 0x130   : > { %v531_v32 = vsel %vm445_vm2, %v517_v30, 0.0 }
 0x131   : > { %807 = vadd.xlane.f32.xlu2 %v806_v31  ;;  %532 = vadd.xlane.f32.xlu0 %v531_v32 }
 0x139   : > { %810 = vadd.xlane.f32.xlu2 %v809_v34 }
 0x13a   : > { %798 = vrot.lane.b32.xlu1 %v443_v18, %s1578_s17 }
 0x141   : > { %447 = vadd.xlane.f32.xlu2 %v446_v35 }
 0x145   : > { %800 = vrot.lane.b32.xlu0 %v1711_v20, %s1578_s17 }
 0x149   : > { %450 = vadd.xlane.f32.xlu2 %v449_v36 }
 0x151   : > { %885 = vadd.xlane.f32.xlu2 %v884_v38 }
 0x164   : > { %879 = vadd.xlane.f32.xlu1 %v878_v39 }
 0x16c   : > { %453 = vadd.xlane.f32.xlu1 %v452_v40 }
 0x16f   : > { %882 = vadd.xlane.f32.xlu0 %v881_v41 }
 0x174   : > { %888 = vadd.xlane.f32.xlu1 %v887_v43 }
 0x18c   : > { %v524_v44 = vpop.xlane.xlu0 %523 }
 0x18d   : > { %v1737_v49 = vmax.f32 %v524_v44, 1e-24 }
 0x18f   : > { %vm544_vm12 = vweird.f32 %v1737_v49 }
 0x194   : > { %v527_v45 = vpop.xlane.xlu1 %526 }
 0x195   : > { %v1735_v48 = vmax.f32 %v527_v45, 1e-24 }
 0x197   : > { %vm554_vm11 = vweird.f32 %v1735_v48 }
 0x19c   : > { %v530_v46 = vpop.xlane.xlu2 %529 }
 0x19d   : > { %v536_v47 = vmax.f32 %v530_v46, 1e-24 }
 0x19f   : > { %1452 = vrsqrt.f32 %v536_v47  ;;  %vm564_vm4 = vweird.f32 %v536_v47 }
 0x1a0   : > { %1454 = vrsqrt.f32 %v1735_v48 }
 0x1a1   : > { %1456 = vrsqrt.f32 %v1737_v49 }
 0x1a4   : > { %v808_v50 = vpop.xlane.xlu2 %807  ;;  %v533_v51 = vpop.xlane.xlu0 %532 }
 0x1a5   : > { %v1453_v52 = vpop.eup %1452  ;;  %v1741_v53 = vmax.f32 %v808_v50, 1e-24  ;;  %v537_v54 = vmax.f32 %v533_v51, 1e-24 }
 0x1a6   : > { %v559_v55 = vmul.f32 %v1453_v52, %v536_v47  ;;  %v1743_v57 = vpop.eup %1454  ;;  %vm565_vm3 = vweird.f32 %v1453_v52 }
 0x1a7   : > { %1458 = vrsqrt.f32 %v537_v54  ;;  %v1746_v58 = vpop.eup %1456  ;;  %v549_v60 = vmul.f32 %v1743_v57, %v1735_v48  ;;  %vm566_vm5 = vmor %vm564_vm4, %vm565_vm3  ;;  %vm574_vm7 = vweird.f32 %v537_v54  ;;  %vm555_vm9 = vweird.f32 %v1743_v57 }
 0x1a8   : > { %v560_v56 = vmul.f32 %v1453_v52, %v559_v55  ;;  %1460 = vrsqrt.f32 %v1741_v53  ;;  %v539_v0 = vmul.f32 %v1746_v58, %v1737_v49  ;;  %vm545_vm10 = vweird.f32 %v1746_v58  ;;  %vm556_vm13 = vmor %vm554_vm11, %vm555_vm9 }
 0x1a9   : > { %v550_v7 = vmul.f32 %v1743_v57, %v549_v60  ;;  %vm546_vm15 = vmor %vm544_vm12, %vm545_vm10 }
 0x1aa   : > { %v561_v59 = vmul.f32 0.5, %v560_v56  ;;  %v540_v8 = vmul.f32 %v1746_v58, %v539_v0 }
 0x1ab   : > { %v551_v15 = vmul.f32 0.5, %v550_v7 }
 0x1ac   : > { %v562_v61 = vsub.f32 1.5, %v561_v59  ;;  %v811_v62 = vpop.xlane.xlu2 %810  ;;  %v799_v63 = vpop.permute.xlu1 %798  ;;  %v541_v18 = vmul.f32 0.5, %v540_v8 }
 0x1ad   : > { %v1752_v1 = vmax.f32 %v811_v62, 1e-24  ;;  %v812_v2 = vsel %vm445_vm2, %v799_v63, 0.0  ;;  %v1459_v3 = vpop.eup %1458  ;;  %v552_v28 = vsub.f32 1.5, %v551_v15 }
 0x1ae   : > { %813 = vadd.xlane.f32.xlu0 %v812_v2  ;;  %v1755_v4 = vpop.eup %1460  ;;  %v563_v5 = vmul.f32 %v1453_v52, %v562_v61  ;;  %v569_v6 = vmul.f32 %v1459_v3, %v537_v54  ;;  %vm575_vm6 = vweird.f32 %v1459_v3  ;;  %v542_v31 = vsub.f32 1.5, %v541_v18 }
 0x1af   : > { %1462 = vrsqrt.f32 %v1752_v1  ;;  %v823_v11 = vmul.f32 %v1755_v4, %v1741_v53  ;;  %vm576_vm8 = vmor %vm574_vm7, %vm575_vm6  ;;  %v553_v36 = vmul.f32 %v1743_v57, %v552_v28  ;;  %vm829_vm1 = vweird.f32 %v1755_v4 }
 0x1b0   : > { %v570_v10 = vmul.f32 %v1459_v3, %v569_v6  ;;  %v567_v14 = vsel %vm566_vm5, %v1453_v52, %v563_v5  ;;  %v543_v39 = vmul.f32 %v1746_v58, %v542_v31  ;;  %vm838_vm3 = vweird.f32 %v1752_v1 }
 0x1b1   : > { %v824_v23 = vmul.f32 %v1755_v4, %v823_v11  ;;  %v580_v25 = vmul.f32 %v567_v14, %v1700_v17  ;;  %v557_v46 = vsel %vm556_vm13, %v1743_v57, %v553_v36  ;;  %vm828_vm5 = vweird.f32 %v1741_v53 }
 0x1b2   : > { %v571_v12 = vmul.f32 0.5, %v570_v10  ;;  %v547_v48 = vsel %vm546_vm15, %v1746_v58, %v543_v39  ;;  %v579_v49 = vmul.f32 %v557_v46, %v1693_v13  ;;  %vm830_vm6 = vmor %vm828_vm5, %vm829_vm1  ;;  %v1791_v58 = vstv %s1367_s18  ;;  %s1581_s18 = smov 16  }
 0x1b3   : > { %v825_v33 = vmul.f32 0.5, %v824_v23  ;;  %v594_v35 = vpack.c.bf16 %v580_v25, %v580_v25  ;;  %v578_v51 = vmul.f32 %v1686_v9, %v547_v48 }
 0x1b4   : > { %v572_v21 = vsub.f32 1.5, %v571_v12  ;;  %v1775_v44 = vpop.xlane.xlu2 %447  ;;  %v593_v54 = vpack.c.bf16 %v579_v49, %v579_v49 }
 0x1b5   : > { %v1463_v16 = vpop.eup %1462  ;;  %v826_v40 = vsub.f32 1.5, %v825_v33  ;;  %v641_v41 = vunpack.c.l.b16 %v594_v35  ;;  %v592_v56 = vpack.c.bf16 %v578_v51, %v578_v51 }
 0x1b6   : > { %v833_v24 = vmul.f32 %v1463_v16, %v1752_v1  ;;  %456 = vadd.xlane.f32.xlu0 %v455_v22  ;;  %v573_v26 = vmul.f32 %v1459_v3, %v572_v21  ;;  %vm839_vm14 = vweird.f32 %v1463_v16  ;;  %v610_v60 = vunpack.c.l.b16 %v593_v54 }
 0x1b7   : > { %v801_v27 = vpop.permute.xlu0 %800  ;;  %v827_v47 = vmul.f32 %v1755_v4, %v826_v40  ;;  %vm840_vm4 = vmor %vm838_vm3, %vm839_vm14  ;;  %v609_v53 = vunpack.c.l.b16 %v592_v56 }
 0x1b8   : > { %v834_v29 = vmul.f32 %v1463_v16, %v833_v24  ;;  %v815_v30 = vsel %vm445_vm2, %v801_v27, 0.0  ;;  %v577_v32 = vsel %vm576_vm8, %v1459_v3, %v573_v26 }
 0x1b9   : > { %816 = vadd.xlane.f32.xlu2 %v815_v30  ;;  %v581_v34 = vmul.f32 %v577_v32, %v1707_v19  ;;  %v831_v52 = vsel %vm830_vm6, %v1755_v4, %v827_v47  ;;  %v611_v63 = vpack.c.b16 %v610_v60, %v609_v53 }
 0x1ba   : > { %v835_v20 = vmul.f32 0.5, %v834_v29  ;;  %v862_v57 = vmul.f32 %v831_v52, %v1686_v9 }
 0x1bb   : > { %v595_v38 = vpack.c.bf16 %v581_v34, %v581_v34 }
 0x1bc   : > { %v836_v37 = vsub.f32 1.5, %v835_v20  ;;  %v1789_v59 = vpop.xlane.xlu2 %450  ;;  %v940_v62 = vmul.f32 %v1791_v58, %v862_v57 }
 0x1bd   : > { %v642_v42 = vunpack.c.l.b16 %v595_v38 }
 0x1be   : > { %v837_v43 = vmul.f32 %v1463_v16, %v836_v37  ;;  %v944_v1 = vpack.c.bf16 %v940_v62, %v940_v62 }
 0x1bf   : > { %v643_v45 = vpack.c.b16 %v642_v42, %v641_v41 }
 0x1c0   : > { %v841_v50 = vsel %vm840_vm4, %v1463_v16, %v837_v43  ;;  %v961_v4 = vunpack.c.l.b16 %v944_v1 }
 0x1c1   : > { %644 = vrot.lane.b32.xlu1 %v643_v45, %s1577_s16  ;;  %v863_v55 = vmul.f32 %v841_v50, %v1693_v13 }
 0x1c3   : > { %v941_v61 = vmul.f32 %v1791_v58, %v863_v55 }
 0x1c4   : > { %v886_v3 = vpop.xlane.xlu2 %885 }
 0x1c5   : > { %v945_v0 = vpack.c.bf16 %v941_v61, %v941_v61  ;;  %v892_v5 = vmax.f32 %v886_v3, 1e-24 }
 0x1c7   : > { %v962_v2 = vunpack.c.l.b16 %v945_v0  ;;  %vm920_vm14 = vweird.f32 %v892_v5  ;;  %v458_v0 = vmax.f32 %v1775_v44, 1e-24 }
 0x1c9   : > { %v963_v7 = vpack.c.b16 %v962_v2, %v961_v4 }
 0x1d1   : > { %612 = vrot.lane.b32.xlu2 %v611_v63, %s1577_s16  ;;  %v459_v63 = vmax.f32 %v1789_v59, 1e-24  ;;  %s1579_s16 = smov 64  }
 0x1d7   : > { %v880_v6 = vpop.xlane.xlu1 %879 }
 0x1d8   : > { %v890_v8 = vmax.f32 %v880_v6, 1e-24 }
 0x1d9   : > { %964 = vrot.lane.b32.xlu2 %v963_v7, %s1578_s17 }
 0x1da   : > { %1464 = vrsqrt.f32 %v890_v8  ;;  %vm900_vm8 = vweird.f32 %v890_v8 }
 0x1db   : > { %1466 = vrsqrt.f32 %v892_v5 }
 0x1df   : > { %v1797_v10 = vpop.xlane.xlu1 %453 }
 0x1e0   : > { %v1465_v11 = vpop.eup %1464  ;;  %v1808_v6 = vmax.f32 %v1797_v10, 1e-24 }
 0x1e1   : > { %v1467_v12 = vpop.eup %1466  ;;  %v895_v14 = vmul.f32 %v1465_v11, %v890_v8  ;;  %vm901_vm7 = vweird.f32 %v1465_v11 }
 0x1e2   : > { %v883_v15 = vpop.xlane.xlu0 %882  ;;  %v915_v21 = vmul.f32 %v1467_v12, %v892_v5  ;;  %vm902_vm9 = vmor %vm900_vm8, %vm901_vm7  ;;  %vm921_vm11 = vweird.f32 %v1467_v12  ;;  %vm478_vm7 = vweird.f32 %v459_v63 }
 0x1e3   : > { %v896_v16 = vmul.f32 %v1465_v11, %v895_v14  ;;  %v891_v18 = vmax.f32 %v883_v15, 1e-24  ;;  %vm922_vm15 = vmor %vm920_vm14, %vm921_vm11 }
 0x1e4   : > { %v916_v24 = vmul.f32 %v1467_v12, %v915_v21 }
 0x1e5   : > { %v897_v22 = vmul.f32 0.5, %v896_v16  ;;  %1468 = vrsqrt.f32 %v891_v18  ;;  %vm910_vm12 = vweird.f32 %v891_v18 }
 0x1e6   : > { %v917_v28 = vmul.f32 0.5, %v916_v24 }
 0x1e7   : > { %v889_v23 = vpop.xlane.xlu1 %888  ;;  %v898_v25 = vsub.f32 1.5, %v897_v22 }
 0x1e8   : > { %v893_v26 = vmax.f32 %v889_v23, 1e-24  ;;  %v918_v33 = vsub.f32 1.5, %v917_v28 }
 0x1e9   : > { %v899_v29 = vmul.f32 %v1465_v11, %v898_v25 }
 0x1ea   : > { %1470 = vrsqrt.f32 %v893_v26  ;;  %v919_v39 = vmul.f32 %v1467_v12, %v918_v33  ;;  %vm930_vm3 = vweird.f32 %v893_v26 }
 0x1eb   : > { %v1469_v27 = vpop.eup %1468  ;;  %v903_v34 = vsel %vm902_vm9, %v1465_v11, %v899_v29  ;;  %1472 = vrsqrt.f32 %v459_v63  ;;  %vm468_vm9 = vweird.f32 %v458_v0 }
 0x1ec   : > { %v905_v30 = vmul.f32 %v1469_v27, %v891_v18  ;;  %vm911_vm10 = vweird.f32 %v1469_v27  ;;  %v934_v38 = vmul.f32 %v903_v34, %v1686_v9  ;;  %v923_v47 = vsel %vm922_vm15, %v1467_v12, %v919_v39 }
 0x1ed   : > { %vm912_vm13 = vmor %vm910_vm12, %vm911_vm10  ;;  %v936_v54 = vmul.f32 %v923_v47, %v1700_v17  ;;  %1474 = vrsqrt.f32 %v458_v0  ;;  %vm488_vm15 = vweird.f32 %v1808_v6 }
 0x1ee   : > { %v906_v31 = vmul.f32 %v1469_v27, %v905_v30  ;;  %v948_v46 = vpack.c.bf16 %v934_v38, %v934_v38  ;;  %1476 = vrsqrt.f32 %v1808_v6 }
 0x1ef   : > { %v950_v60 = vpack.c.bf16 %v936_v54, %v936_v54 }
 0x1f0   : > { %v1471_v32 = vpop.eup %1470  ;;  %v907_v20 = vmul.f32 0.5, %v906_v31  ;;  %v968_v50 = vunpack.c.l.b16 %v948_v46 }
 0x1f1   : > { %v925_v35 = vmul.f32 %v1471_v32, %v893_v26  ;;  %vm931_vm1 = vweird.f32 %v1471_v32  ;;  %v1002_v53 = vunpack.c.l.b16 %v950_v60  ;;  %v1473_v1 = vpop.eup %1472 }
 0x1f2   : > { %v908_v36 = vsub.f32 1.5, %v907_v20  ;;  %vm932_vm4 = vmor %vm930_vm3, %vm931_vm1  ;;  %v473_v3 = vmul.f32 %v1473_v1, %v459_v63  ;;  %vm479_vm5 = vweird.f32 %v1473_v1  ;;  %v583_v20 = vstv %s582_s19 }
 0x1f3   : > { %v926_v37 = vmul.f32 %v1471_v32, %v925_v35  ;;  %v1475_v2 = vpop.eup %1474  ;;  %vm480_vm8 = vmor %vm478_vm7, %vm479_vm5 }
 0x1f4   : > { %v909_v40 = vmul.f32 %v1469_v27, %v908_v36  ;;  %v463_v4 = vmul.f32 %v1475_v2, %v458_v0  ;;  %v474_v5 = vmul.f32 %v1473_v1, %v473_v3  ;;  %v1811_v44 = vpop.eup %1476  ;;  %vm469_vm6 = vweird.f32 %v1475_v2 }
 0x1f5   : > { %v927_v41 = vmul.f32 0.5, %v926_v37  ;;  %v483_v10 = vmul.f32 %v1811_v44, %v1808_v6  ;;  %vm470_vm10 = vmor %vm468_vm9, %vm469_vm6  ;;  %vm489_vm12 = vweird.f32 %v1811_v44 }
 0x1f6   : > { %v913_v42 = vsel %vm912_vm13, %v1469_v27, %v909_v40  ;;  %v464_v7 = vmul.f32 %v1475_v2, %v463_v4  ;;  %v475_v8 = vmul.f32 0.5, %v474_v5  ;;  %vm490_vm1 = vmor %vm488_vm15, %vm489_vm12 }
 0x1f7   : > { %v928_v43 = vsub.f32 1.5, %v927_v41  ;;  %v935_v45 = vmul.f32 %v913_v42, %v1693_v13  ;;  %v484_v25 = vmul.f32 %v1811_v44, %v483_v10 }
 0x1f8   : > { %v465_v11 = vmul.f32 0.5, %v464_v7  ;;  %v476_v59 = vsub.f32 1.5, %v475_v8 }
 0x1f9   : > { %v929_v48 = vmul.f32 %v1471_v32, %v928_v43  ;;  %v949_v49 = vpack.c.bf16 %v935_v45, %v935_v45  ;;  %v485_v33 = vmul.f32 0.5, %v484_v25 }
 0x1fa   : > { %v466_v14 = vsub.f32 1.5, %v465_v11  ;;  %v477_v16 = vmul.f32 %v1473_v1, %v476_v59 }
 0x1fb   : > { %v969_v51 = vunpack.c.l.b16 %v949_v49  ;;  %v933_v52 = vsel %vm932_vm4, %v1471_v32, %v929_v48  ;;  %v486_v39 = vsub.f32 1.5, %v485_v33 }
 0x1fc   : > { %v937_v55 = vmul.f32 %v933_v52, %v1707_v19  ;;  %v467_v18 = vmul.f32 %v1475_v2, %v466_v14  ;;  %v481_v21 = vsel %vm480_vm8, %v1473_v1, %v477_v16 }
 0x1fd   : > { %v970_v56 = vpack.c.b16 %v969_v51, %v968_v50  ;;  %v503_v28 = vmul.f32 %v481_v21, %v1693_v13  ;;  %v487_v50 = vmul.f32 %v1811_v44, %v486_v39  ;;  %v434_v39 = vld [vmem:[%s432_s23 + $0x8] sm:$0xff] }
 0x1fe   : > { %v951_v57 = vpack.c.bf16 %v937_v55, %v937_v55  ;;  %v471_v24 = vsel %vm470_vm10, %v1475_v2, %v467_v18 }
 0x1ff   : > { %971 = vrot.lane.b32.xlu0 %v970_v56, %s1576_s28  ;;  %v502_v32 = vmul.f32 %v1686_v9, %v471_v24  ;;  %v585_v35 = vmul.f32 %v583_v20, %v503_v28 }
 0x200   : > { %v1003_v61 = vunpack.c.l.b16 %v951_v57 }
 0x201   : > { %v584_v37 = vmul.f32 %v583_v20, %v502_v32  ;;  %v589_v41 = vpack.c.bf16 %v585_v35, %v585_v35  ;;  %v600_v32 = vld [vmem:[%s1957_s6] sm:$0xff] }
 0x202   : > { %v1004_v62 = vpack.c.b16 %v1003_v61, %v1002_v53 }
 0x203   : > { %v588_v49 = vpack.c.bf16 %v584_v37, %v584_v37  ;;  %v605_v56 = vunpack.c.l.b16 %v589_v41  ;;  %v601_v37 = vld [vmem:[%s1957_s6 + $0x8] sm:$0xff] }
 0x205   : > { %v604_v53 = vunpack.c.l.b16 %v588_v49 }
 0x207   : > { %1005 = vrot.lane.b32.xlu0 %v1004_v62, %s1576_s28  ;;  %v491_v62 = vsel %vm490_vm1, %v1811_v44, %v487_v50  ;;  %v606_v1 = vpack.c.b16 %v605_v56, %v604_v53  ;;  %v436_v50 = vld [vmem:[%s432_s23 + $0x18] sm:$0xff] }
 0x208   : > { %v504_v4 = vmul.f32 %v491_v62, %v1700_v17  ;;  %v1369_v53 = vld [vmem:[%s1957_s6 + $0x18] sm:$0xff] }
 0x20a   : > { %v586_v14 = vmul.f32 %v583_v20, %v504_v4 }
 0x20c   : > { %v590_v10 = vpack.c.bf16 %v586_v14, %v586_v14 }
 0x20e   : > { %v636_v25 = vunpack.c.l.b16 %v590_v10 }
 0x221   : > { %v814_v12 = vpop.xlane.xlu0 %813 }
 0x222   : > { %v820_v15 = vmax.f32 %v814_v12, 1e-24 }
 0x224   : > { %1478 = vrsqrt.f32 %v820_v15  ;;  %vm848_vm13 = vweird.f32 %v820_v15 }
 0x229   : > { %v457_v22 = vpop.xlane.xlu0 %456 }
 0x22a   : > { %v1479_v23 = vpop.eup %1478  ;;  %v461_v26 = vmax.f32 %v457_v22, 1e-24 }
 0x22b   : > { %v843_v27 = vmul.f32 %v1479_v23, %v820_v15  ;;  %vm849_vm11 = vweird.f32 %v1479_v23 }
 0x22c   : > { %1480 = vrsqrt.f32 %v461_v26  ;;  %v817_v29 = vpop.xlane.xlu2 %816  ;;  %vm1822_vm14 = vmor %vm848_vm13, %vm849_vm11  ;;  %vm498_vm4 = vweird.f32 %v461_v26 }
 0x22d   : > { %v844_v30 = vmul.f32 %v1479_v23, %v843_v27  ;;  %v821_v31 = vmax.f32 %v817_v29, 1e-24 }
 0x22f   : > { %v845_v34 = vmul.f32 0.5, %v844_v30  ;;  %1482 = vrsqrt.f32 %v821_v31  ;;  %vm858_vm7 = vweird.f32 %v821_v31 }
 0x231   : > { %v846_v36 = vsub.f32 1.5, %v845_v34 }
 0x232   : > { %v1481_v38 = vpop.eup %1480 }
 0x233   : > { %v493_v40 = vmul.f32 %v1481_v38, %v461_v26  ;;  %v847_v42 = vmul.f32 %v1479_v23, %v846_v36  ;;  %v645_v43 = vpop.permute.xlu1 %644  ;;  %vm499_vm3 = vweird.f32 %v1481_v38 }
 0x234   : > { %v613_v45 = vpop.permute.xlu2 %612  ;;  %v650_v52 = vsel %vm445_vm2, %v645_v43, 0  ;;  %vm500_vm5 = vmor %vm498_vm4, %vm499_vm3 }
 0x235   : > { %v1483_v46 = vpop.eup %1482  ;;  %v494_v47 = vmul.f32 %v1481_v38, %v493_v40  ;;  %v618_v48 = vsel %vm445_vm2, %v613_v45, 0  ;;  %v851_v57 = vsel %vm1822_vm14, %v1479_v23, %v847_v42  ;;  %v435_v45 = vld [vmem:[%s432_s23 + $0x10] sm:$0xff] }
 0x236   : > { %v853_v51 = vmul.f32 %v1483_v46, %v821_v31  ;;  %627 = vmatpush.bf16.xpose.msra.mxu2 %v618_v48  ;;  %v864_v2 = vmul.f32 %v851_v57, %v1700_v17  ;;  %vm859_vm6 = vweird.f32 %v1483_v46 }
 0x237   : > { %v495_v55 = vmul.f32 0.5, %v494_v47  ;;  %vm860_vm8 = vmor %vm858_vm7, %vm859_vm6 }
 0x238   : > { %v854_v60 = vmul.f32 %v1483_v46, %v853_v51  ;;  %v942_v8 = vmul.f32 %v1791_v58, %v864_v2 }
 0x239   : > { %v496_v61 = vsub.f32 1.5, %v495_v55  ;;  %v1368_v55 = vld [vmem:[%s1957_s6 + $0x10] sm:$0xff] }
 0x23a   : > { %v855_v63 = vmul.f32 0.5, %v854_v60  ;;  %v946_v44 = vpack.c.bf16 %v942_v8, %v942_v8 }
 0x23b   : > { %v497_v0 = vmul.f32 %v1481_v38, %v496_v61 }
 0x23c   : > { %v856_v3 = vsub.f32 1.5, %v855_v63  ;;  %v995_v21 = vunpack.c.l.b16 %v946_v44 }
 0x23d   : > { %v501_v5 = vsel %vm500_vm5, %v1481_v38, %v497_v0  ;;  %1363 = vmatmul.msk.bf16.vlgmr.msra.gmra.mxu2 %vm445_vm2, %v606_v1 }
 0x23e   : > { %659 = vmatpush.bf16.xpose.msrb.mxu2 %v650_v52  ;;  %v505_v6 = vmul.f32 %v501_v5, %v1707_v19  ;;  %v857_v7 = vmul.f32 %v1483_v46, %v856_v3 }
 0x240   : > { %v861_v11 = vsel %vm860_vm8, %v1483_v46, %v857_v7  ;;  %v587_v59 = vmul.f32 %v583_v20, %v505_v6  ;;  %v433_v20 = vld [vmem:[%s432_s23] sm:$0xff]  ;;  %s1342_s23 = sshll.u32 %s1674_s24, 3 }
 0x241   : > { %v865_v12 = vmul.f32 %v861_v11, %v1707_v19  ;;  %s362_s13 = scalar_lea.vmem %s1959_s8, %s1342_s23 }
 0x242   : > { %v591_v16 = vpack.c.bf16 %v587_v59, %v587_v59 }
 0x243   : > { %v943_v15 = vmul.f32 %v1791_v58, %v865_v12  ;;  %v965_v58 = vpop.permute.xlu2 %964 }
 0x244   : > { %v637_v23 = vunpack.c.l.b16 %v591_v16 }
 0x245   : > { %v947_v18 = vpack.c.bf16 %v943_v15, %v943_v15 }
 0x246   : > { %v638_v26 = vpack.c.b16 %v637_v23, %v636_v25 }
 0x247   : > { %v996_v22 = vunpack.c.l.b16 %v947_v18 }
 0x249   : > { %v997_v24 = vpack.c.b16 %v996_v22, %v995_v21 }
 0x24b   : > { %998 = vrot.lane.b32.xlu1 %v997_v24, %s1578_s17  ;;  %s1580_s17 = smov 48  }
 0x24d   : > { %1364 = vmatmul.msk.bf16.vlgmr.msrb.gmra.mxu2 %vm445_vm2, %v638_v26 }
 0x271   : > { %v972_v27 = vpop.permute.xlu0 %971 }
 0x272   : > { %v977_v28 = vsel %vm445_vm2, %v972_v27, 0 }
 0x273   : > { %986 = vmatpush.bf16.xpose.msra.mxu1 %v977_v28  ;;  %v597_v28 = vpack.c.bf16 %v1693_v13, %v1693_v13 }
 0x279   : > { %v1006_v29 = vpop.permute.xlu0 %1005 }
 0x27a   : > { %v1011_v30 = vsel %vm445_vm2, %v1006_v29, 0  ;;  %1370 = vmatmul.msk.bf16.vlgmr.msra.gmra.mxu1 %vm445_vm2, %v965_v58  ;;  %v596_v58 = vpack.c.bf16 %v1686_v9, %v1686_v9  ;;  %v726_v29 = vunpack.c.l.b16 %v597_v28 }
 0x27b   : > { %1020 = vmatpush.bf16.xpose.msra.mxu2 %v1011_v30 }
 0x27c   : > { %v725_v30 = vunpack.c.l.b16 %v596_v58 }
 0x2bd   : > { %v999_v31 = vpop.permute.xlu1 %998 }
 0x2be   : > { %1371 = vmatmul.msk.bf16.vlgmr.msra.gmra.mxu2 %vm445_vm2, %v999_v31  ;;  %v727_v31 = vpack.c.b16 %v726_v29, %v725_v30 }
 0x2c0   : > { %v629_v33 = vpop.f32.mrf.mxu2 }
 0x2c1   : > { %v630_v34 = vadd.f32 %v629_v33, %v600_v32  ;;  %v598_v33 = vpack.c.bf16 %v1700_v17, %v1700_v17 }
 0x2c3   : > { %v666_v35 = vadd.f32 %v630_v34, %v433_v20  ;;  %v755_v34 = vunpack.c.l.b16 %v598_v33 }
 0x2c5   : > { %v670_v36 = vsel %vm445_vm2, %v666_v35, -inf }
 0x2c6   : > { %671 = vmax.xlane.f32.xlu2 %v670_v36 }
 0x2c8   : > { %v631_v38 = vpop.f32.mrf.mxu2 }
 0x2c9   : > { %v632_v40 = vadd.f32 %v631_v38, %v601_v37 }
 0x2cb   : > { %v667_v41 = vadd.f32 %v632_v40, %v434_v39 }
 0x2cd   : > { %v673_v42 = vsel %vm445_vm2, %v667_v41, -inf }
 0x2ce   : > { %674 = vmax.xlane.f32.xlu0 %v673_v42 }
 0x2d0   : > { %v661_v43 = vpop.f32.mrf.mxu2 }
 0x2d1   : > { %v662_v46 = vadd.f32 %v661_v43, %v600_v32  ;;  %v599_v32 = vpack.c.bf16 %v1707_v19, %v1707_v19 }
 0x2d3   : > { %v668_v47 = vadd.f32 %v662_v46, %v435_v45 }
 0x2d5   : > { %v676_v48 = vsel %vm445_vm2, %v668_v47, -inf }
 0x2d6   : > { %677 = vmax.xlane.f32.xlu1 %v676_v48 }
 0x2d8   : > { %v663_v49 = vpop.f32.mrf.mxu2 }
 0x2d9   : > { %v664_v51 = vadd.f32 %v663_v49, %v601_v37 }
 0x2db   : > { %v1858_v52 = vadd.f32 %v664_v51, %v436_v50 }
 0x2dd   : > { %v679_v54 = vsel %vm445_vm2, %v1858_v52, -inf }
 0x2de   : > { %680 = vmax.xlane.f32.xlu2 %v679_v54 }
 0x2f7   : > { %v988_v56 = vpop.f32.mrf.mxu1 }
 0x2f8   : > { %v989_v57 = vadd.f32 %v1368_v55, %v988_v56 }
 0x2fa   : > { %v1027_v60 = vadd.f32 %v989_v57, %v433_v20  ;;  %v756_v20 = vunpack.c.l.b16 %v599_v32 }
 0x2fc   : > { %v1031_v61 = vsel %vm445_vm2, %v1027_v60, -inf }
 0x2fd   : > { %1032 = vmax.xlane.f32.xlu0 %v1031_v61 }
 0x2ff   : > { %v990_v62 = vpop.f32.mrf.mxu1 }
 0x300   : > { %v991_v63 = vadd.f32 %v1369_v53, %v990_v62 }
 0x302   : > { %v1028_v0 = vadd.f32 %v991_v63, %v434_v39 }
 0x304   : > { %v1034_v1 = vsel %vm445_vm2, %v1028_v0, -inf }
 0x305   : > { %1035 = vmax.xlane.f32.xlu1 %v1034_v1 }
 0x339   : > { %v672_v4 = vpop.xlane.xlu2 %671 }
 0x33a   : > { %v682_v11 = vsub.f32 %v666_v35, %v672_v4  ;;  %v757_v35 = vpack.c.b16 %v756_v20, %v755_v34 }
 0x33c   : > { %v686_v12 = vmul.f32 1.442695, %v682_v11 }
 0x341   : > { %v1022_v2 = vpop.f32.mrf.mxu2  ;;  %v675_v3 = vpop.xlane.xlu0 %674 }
 0x342   : > { %v1023_v5 = vadd.f32 %v1368_v55, %v1022_v2  ;;  %v683_v6 = vsub.f32 %v667_v41, %v675_v3 }
 0x344   : > { %v688_v7 = vmul.f32 1.442695, %v683_v6  ;;  %v1870_v8 = vadd.f32 %v1023_v5, %v435_v45 }
 0x346   : > { %1484 = vpow2.f32 %v688_v7  ;;  %v1037_v59 = vsel %vm445_vm2, %v1870_v8, -inf }
 0x347   : > { %1038 = vmax.xlane.f32.xlu1 %v1037_v59  ;;  %1486 = vpow2.f32 %v686_v12 }
 0x349   : > { %v1024_v14 = vpop.f32.mrf.mxu2  ;;  %v678_v15 = vpop.xlane.xlu1 %677 }
 0x34a   : > { %v1025_v44 = vadd.f32 %v1369_v53, %v1024_v14  ;;  %v684_v16 = vsub.f32 %v668_v47, %v678_v15 }
 0x34c   : > { %v1874_v18 = vpop.eup %1484  ;;  %v690_v10 = vmul.f32 1.442695, %v684_v16  ;;  %v1030_v21 = vadd.f32 %v1025_v44, %v436_v50 }
 0x34d   : > { %v697_v22 = vsel %vm445_vm2, %v1874_v18, 0.0  ;;  %v1879_v24 = vpop.eup %1486 }
 0x34e   : > { %1488 = vpow2.f32 %v690_v10  ;;  %698 = vadd.xlane.f32.xlu0 %v697_v22  ;;  %v1040_v23 = vsel %vm445_vm2, %v1030_v21, -inf  ;;  %v694_v27 = vsel %vm445_vm2, %v1879_v24, 0.0 }
 0x34f   : > { %1041 = vmax.xlane.f32.xlu2 %v1040_v23 }
 0x351   : > { %v681_v36 = vpop.xlane.xlu2 %680 }
 0x352   : > { %v685_v9 = vsub.f32 %v1858_v52, %v681_v36 }
 0x354   : > { %v1881_v25 = vpop.eup %1488  ;;  %v692_v39 = vmul.f32 1.442695, %v685_v9 }
 0x355   : > { %v700_v26 = vsel %vm445_vm2, %v1881_v25, 0.0 }
 0x356   : > { %701 = vadd.xlane.f32.xlu1 %v700_v26 }
 0x357   : > { %695 = vadd.xlane.f32.xlu2 %v694_v27 }
 0x362   : > { %728 = vrot.lane.b32.xlu0 %v727_v31, %s1579_s16 }
 0x36f   : > { %758 = vrot.lane.b32.xlu1 %v757_v35, %s1579_s16 }
 0x370   : > { %v1033_v13 = vpop.xlane.xlu0 %1032 }
 0x371   : > { %v1043_v37 = vsub.f32 %v1027_v60, %v1033_v13 }
 0x373   : > { %v1047_v38 = vmul.f32 1.442695, %v1043_v37 }
 0x375   : > { %1490 = vpow2.f32 %v1047_v38 }
 0x376   : > { %1492 = vpow2.f32 %v692_v39 }
 0x378   : > { %v1036_v40 = vpop.xlane.xlu1 %1035 }
 0x379   : > { %v1044_v41 = vsub.f32 %v1028_v0, %v1036_v40 }
 0x37b   : > { %v1896_v42 = vpop.eup %1490  ;;  %v1049_v19 = vmul.f32 1.442695, %v1044_v41 }
 0x37c   : > { %v1055_v17 = vsel %vm445_vm2, %v1896_v42, 0.0  ;;  %v1493_v43 = vpop.eup %1492 }
 0x37d   : > { %1056 = vadd.xlane.f32.xlu2 %v1055_v17  ;;  %1494 = vpow2.f32 %v1049_v19  ;;  %v703_v45 = vsel %vm445_vm2, %v1493_v43, 0.0 }
 0x383   : > { %v1495_v46 = vpop.eup %1494 }
 0x384   : > { %v1058_v47 = vsel %vm445_vm2, %v1495_v46, 0.0 }
 0x385   : > { %704 = vadd.xlane.f32.xlu2 %v703_v45 }
 0x38c   : > { %1059 = vadd.xlane.f32.xlu0 %v1058_v47 }
 0x39d   : > { %1089 = vrot.lane.b32.xlu2 %v727_v31, %s1580_s17 }
 0x3a0   : > { %1119 = vrot.lane.b32.xlu0 %v757_v35, %s1580_s17 }
 0x3ba   : > { %v1039_v48 = vpop.xlane.xlu1 %1038 }
 0x3bb   : > { %v1045_v49 = vsub.f32 %v1870_v8, %v1039_v48 }
 0x3bd   : > { %v1051_v50 = vmul.f32 1.442695, %v1045_v49 }
 0x3bf   : > { %1496 = vpow2.f32 %v1051_v50  ;;  %v1392_v50 = vld [vmem:[%s1954_s3 + $0x8] sm:$0xff] }
 0x3c0   : > { %1198 = vmatpush.bf16.msrb.mxu1 %v1392_v50 }
 0x3c1   : > { %v699_v51 = vpop.xlane.xlu0 %698 }
 0x3c2   : > { %v1042_v52 = vpop.xlane.xlu2 %1041  ;;  %1498 = vrcp.f32 %v699_v51  ;;  %v1391_v51 = vld [vmem:[%s1954_s3] sm:$0xff] }
 0x3c3   : > { %v1046_v54 = vsub.f32 %v1030_v21, %v1042_v52 }
 0x3c4   : > { %1199 = vmatpush.bf16.msrb.mxu1 %v1391_v51 }
 0x3c5   : > { %v1497_v55 = vpop.eup %1496  ;;  %v1053_v56 = vmul.f32 1.442695, %v1046_v54 }
 0x3c6   : > { %v1061_v57 = vsel %vm445_vm2, %v1497_v55, 0.0 }
 0x3c7   : > { %1500 = vpow2.f32 %v1053_v56  ;;  %1062 = vadd.xlane.f32.xlu1 %v1061_v57 }
 0x3c8   : > { %v1499_v61 = vpop.eup %1498 }
 0x3c9   : > { %v711_v63 = vmul.f32 %v1499_v61, %v1874_v18  ;;  %v702_v8 = vpop.xlane.xlu1 %701 }
 0x3ca   : > { %v696_v60 = vpop.xlane.xlu2 %695 }
 0x3cb   : > { %1502 = vrcp.f32 %v696_v60  ;;  %v715_v2 = vpack.c.bf16 %v711_v63, %v711_v63 }
 0x3cc   : > { %1504 = vrcp.f32 %v702_v8 }
 0x3cd   : > { %v1501_v53 = vpop.eup %1500  ;;  %v721_v6 = vunpack.c.l.b16 %v715_v2 }
 0x3ce   : > { %v1064_v62 = vsel %vm445_vm2, %v1501_v53, 0.0 }
 0x3cf   : > { %1065 = vadd.xlane.f32.xlu2 %v1064_v62 }
 0x3d1   : > { %v1503_v0 = vpop.eup %1502 }
 0x3d2   : > { %v710_v1 = vmul.f32 %v1503_v0, %v1879_v24  ;;  %v1505_v14 = vpop.eup %1504  ;;  %v1451_v0 = vld [vmem:[%s1955_s4] ss:$0 sm:$0xff] }
 0x3d3   : > { %v712_v15 = vmul.f32 %v1505_v14, %v1881_v25 }
 0x3d4   : > { %v729_v3 = vpop.permute.xlu0 %728  ;;  %v714_v4 = vpack.c.bf16 %v710_v1, %v710_v1 }
 0x3d5   : > { %741 = vmatpush.bf16.msra.mxu3 %v729_v3  ;;  %v716_v18 = vpack.c.bf16 %v712_v15, %v712_v15 }
 0x3d6   : > { %v720_v5 = vunpack.c.l.b16 %v714_v4 }
 0x3d7   : > { %v750_v23 = vunpack.c.l.b16 %v716_v18 }
 0x3d8   : > { %v722_v7 = vpack.c.b16 %v721_v6, %v720_v5 }
 0x3da   : > { %1365 = vmatmul.msk.bf16.vlgmr.msra.gmra.mxu3 %vm445_vm2, %v722_v7 }
 0x3e1   : > { %v759_v11 = vpop.permute.xlu1 %758 }
 0x3e2   : > { %771 = vmatpush.bf16.msrb.mxu3 %v759_v11 }
 0x3f0   : > { %v1057_v59 = vpop.xlane.xlu2 %1056 }
 0x3f8   : > { %v705_v12 = vpop.xlane.xlu2 %704 }
 0x3f9   : > { %1506 = vrcp.f32 %v705_v12 }
 0x3ff   : > { %v1507_v44 = vpop.eup %1506  ;;  %v1060_v16 = vpop.xlane.xlu0 %1059 }
 0x400   : > { %v713_v10 = vmul.f32 %v1507_v44, %v1493_v43  ;;  %v1090_v21 = vpop.permute.xlu2 %1089  ;;  %1508 = vrcp.f32 %v1060_v16 }
 0x401   : > { %1102 = vmatpush.bf16.msra.mxu3 %v1090_v21  ;;  %1510 = vrcp.f32 %v1057_v59 }
 0x402   : > { %v717_v22 = vpack.c.bf16 %v713_v10, %v713_v10 }
 0x404   : > { %v751_v24 = vunpack.c.l.b16 %v717_v22 }
 0x406   : > { %v752_v26 = vpack.c.b16 %v751_v24, %v750_v23  ;;  %v1509_v27 = vpop.eup %1508 }
 0x407   : > { %v1511_v28 = vpop.eup %1510  ;;  %v1072_v58 = vmul.f32 %v1509_v27, %v1495_v46 }
 0x408   : > { %1366 = vmatmul.msk.bf16.vlgmr.msrb.gmra.mxu3 %vm445_vm2, %v752_v26  ;;  %v1071_v29 = vmul.f32 %v1511_v28, %v1896_v42 }
 0x409   : > { %v1076_v25 = vpack.c.bf16 %v1072_v58, %v1072_v58 }
 0x40a   : > { %v1075_v30 = vpack.c.bf16 %v1071_v29, %v1071_v29 }
 0x40b   : > { %v1082_v31 = vunpack.c.l.b16 %v1076_v25 }
 0x40c   : > { %v1081_v33 = vunpack.c.l.b16 %v1075_v30 }
 0x40e   : > { %v1083_v20 = vpack.c.b16 %v1082_v31, %v1081_v33 }
 0x412   : > { %v1120_v32 = vpop.permute.xlu0 %1119 }
 0x413   : > { %1132 = vmatpush.bf16.msrb.mxu0 %v1120_v32 }
 0x418   : > { %1372 = vmatmul.msk.bf16.vlgmr.msra.gmra.mxu3 %vm445_vm2, %v1083_v20 }
 0x43a   : > { %v1063_v34 = vpop.xlane.xlu1 %1062 }
 0x43b   : > { %1512 = vrcp.f32 %v1063_v34 }
 0x441   : > { %v1513_v36 = vpop.eup %1512 }
 0x442   : > { %v1066_v35 = vpop.xlane.xlu2 %1065  ;;  %v1073_v13 = vmul.f32 %v1513_v36, %v1497_v55 }
 0x443   : > { %1514 = vrcp.f32 %v1066_v35 }
 0x444   : > { %v1077_v9 = vpack.c.bf16 %v1073_v13, %v1073_v13 }
 0x446   : > { %v1111_v40 = vunpack.c.l.b16 %v1077_v9 }
 0x449   : > { %v1515_v37 = vpop.eup %1514 }
 0x44a   : > { %v1074_v38 = vmul.f32 %v1515_v37, %v1501_v53 }
 0x44c   : > { %v1078_v39 = vpack.c.bf16 %v1074_v38, %v1074_v38 }
 0x44e   : > { %v1112_v41 = vunpack.c.l.b16 %v1078_v39 }
 0x450   : > { %v1113_v42 = vpack.c.b16 %v1112_v41, %v1111_v40 }
 0x452   : > { %1373 = vmatmul.msk.bf16.vlgmr.msrb.gmra.mxu0 %vm445_vm2, %v1113_v42 }
 0x45d   : > { %v743_v17 = vpop.f32.mrf.mxu3 }
 0x45e   : > { %778 = vst.msk [vmem:[#allocation3] sm:$0xff] %vm445_vm2, %v743_v17 }
 0x465   : > { %v745_v19 = vpop.f32.mrf.mxu3 }
 0x466   : > { %779 = vst.msk [vmem:[#allocation3 + $0x8] sm:$0xff] %vm445_vm2, %v745_v19 }
 0x48b   : > { %v773_v43 = vpop.f32.mrf.mxu3 }
 0x48c   : > { %780 = vst.msk [vmem:[#allocation3 + $0x10] sm:$0xff] %vm445_vm2, %v773_v43 }
 0x493   : > { %v775_v45 = vpop.f32.mrf.mxu3 }
 0x494   : > { %781 = vst.msk [vmem:[#allocation3 + $0x18] sm:$0xff] %vm445_vm2, %v775_v45  ;;  %vm1155_vm2 = vcmask 261248  }
 0x49b   : > { %v1104_v46 = vpop.f32.mrf.mxu3 }
 0x49c   : > { %1143 = vrot.lane.b32.xlu1 %v1104_v46, %s1581_s18 }
 0x4a3   : > { %v1106_v47 = vpop.f32.mrf.mxu3 }
 0x4a4   : > { %1145 = vrot.lane.b32.xlu0 %v1106_v47, %s1581_s18 }
 0x4cf   : > { %v1134_v48 = vpop.f32.mrf.mxu0 }
 0x4d0   : > { %1147 = vrot.lane.b32.xlu2 %v1134_v48, %s1581_s18 }
 0x4d7   : > { %v1136_v49 = vpop.f32.mrf.mxu0 }
 0x4d8   : > { %1149 = vrot.lane.b32.xlu0 %v1136_v49, %s1581_s18 }
 0x50e   : > { %v1144_v52 = vpop.permute.xlu1 %1143 }
 0x50f   : > { %1156 = vst.msk [vmem:[#allocation3] sm:$0xff] %vm1155_vm2, %v1144_v52 }
 0x516   : > { %v1146_v54 = vpop.permute.xlu0 %1145  ;;  %v1160_v55 = vld [vmem:[#allocation3] sm:$0xff] }
 0x517   : > { %1157 = vst.msk [vmem:[#allocation3 + $0x8] sm:$0xff] %vm1155_vm2, %v1146_v54 }
 0x51e   : > { %v1161_v56 = vld [vmem:[#allocation3 + $0x8] sm:$0xff] }
 0x51f   : > { %v1164_v57 = vpack.c.bf16 %v1161_v56, %v1160_v55 }
 0x521   : > { %1382 = vmatmul.msk.bf16.vlgmr.msrb.gmra.mxu1 %vm399_vm0, %v1164_v57 }
 0x52a   : > { %v1148_v60 = vpop.permute.xlu2 %1147 }
 0x52b   : > { %1158 = vst.msk [vmem:[#allocation3 + $0x10] sm:$0xff] %vm1155_vm2, %v1148_v60 }
 0x532   : > { %v1162_v53 = vld [vmem:[#allocation3 + $0x10] sm:$0xff] }
 0x54a   : > { %v1150_v61 = vpop.permute.xlu0 %1149 }
 0x54b   : > { %1159 = vst.msk [vmem:[#allocation3 + $0x18] sm:$0xff] %vm1155_vm2, %v1150_v61 }
 0x552   : > { %v1163_v62 = vld [vmem:[#allocation3 + $0x18] sm:$0xff] }
 0x553   : > { %v1165_v63 = vpack.c.bf16 %v1163_v62, %v1162_v53 }
 0x555   : > { %1383 = vmatmul.msk.bf16.gmra.mxu1 %vm399_vm0, %v1165_v63 }
 0x59e   : > { %v1201_v1 = vpop.f32.mrf.mxu1 }
 0x59f   : > { %v1202_v2 = vadd.f32 %v1451_v0, %v1201_v1 }
 0x5a1   : > { %1211 = vst.msk [vmem:[%s362_s13] sm:$0xff] %vm399_vm0, %v1202_v2 }
 0x5a6   : > { %v1203_v3 = vpop.f32.mrf.mxu1 }
 0x5a7   : > { %v1204_v4 = vadd.f32 %v1451_v0, %v1203_v3 }
 0x5a9   : > { %1212 = vst.msk [vmem:[%s362_s13 + $0x8] sm:$0xff] %vm399_vm0, %v1204_v4 }
 0x5d2   : > { %v1206_v5 = vpop.f32.mrf.mxu1 }
 0x5d3   : > { %v1207_v6 = vadd.f32 %v1451_v0, %v1206_v5 }
 0x5d5   : > { %1213 = vst.msk [vmem:[%s362_s13 + $0x10] sm:$0xff] %vm399_vm0, %v1207_v6 }
 0x5da   : > { %v1208_v7 = vpop.f32.mrf.mxu1 }
 0x5db   : > { %v1209_v8 = vadd.f32 %v1451_v0, %v1208_v7 }
 0x5dd   : > { %1214 = vst.msk [vmem:[%s362_s13 + $0x18] sm:$0xff] %vm399_vm0, %v1209_v8 }
 0x5de PF: > { %s19_s9 = sadd.s32 1, %s1573_s9   ;;  %s1962_s27 = smov %s1565_s29 }
 0x5df   : > { %p16_p10 = scmp.ge.s32.totalorder %s19_s9, 6   ;;  %s1963_s28 = smov %s1569_s30 }
 0x5e0   : > { %s1964_s29 = smov %s1967_s11  ;;  %s1965_s30 = smov %s1971_s12 }
 0x5e1   :  { %18 = sbr.rel (!%p16_p10) target bundleno = 3 (0x3), region = 89 }
 0x5e6   :  { %1247 = vsyncpa [#allocation5], 1 }
 0x5e7   :  { %1249 = vsyncpa [#allocation5 + $0x1], 1 }

</bundles_post_ra>
